<compile_context>
chip_gen: v7x
topology: tpu7x:2x2x1
jax: 0.10.0
libtpu: 0.0.40
codegen_flags: <defaults>
</compile_context>

<pallas_src>
import jax
import jax.numpy as jnp
from jax.experimental import pallas as pl
from jax.experimental.pallas import tpu as pltpu

INPUT_SIZE = 3
HIDDEN = 10
SEQ_LEN = 20

# ---- packed-parameter layout (row offsets tile-aligned to multiples of 8) ----
_R_WHH0 = 0      # rows  0:10, cols 0:40   whh0^T  (H, 4H)
_R_WIH1 = 16     # rows 16:26, cols 0:40   wih1^T  (H, 4H)
_R_WHH1 = 32     # rows 32:42, cols 0:40   whh1^T  (H, 4H)
_R_WF1 = 48      # rows 48:58, cols 0:10   fnn Linear(10,10)^T
_C_WF2 = 16      # rows 48:58, cols 16:19  fnn Linear(10,3)^T
_R_WX0 = 64      # rows 64:67, cols 0:40   wih0^T  (3, 4H)
_R_B0 = 72       # row 72,     cols 0:40   b_ih0 + b_hh0
_R_B1 = 73       # row 73,     cols 0:40   b_ih1 + b_hh1
_R_BF1 = 74      # row 74,     cols 0:10
_R_BF2 = 75      # row 75,     cols 0:3
_PACK_ROWS = 80
_PACK_COLS = 128


def _hmp_kernel(x2d_ref, wpack_ref, out_ref, gx_ref):
    """Whole forward pass in VMEM.

    x2d_ref  : (T*Bp, 3) float32, time-major rows (row t*Bp + b == x[b, :, t]; rows b>=B are 0)
    wpack_ref: (80, 128) float32, packed parameters (layout above)
    out_ref  : (B, 3)    float32, prediction from the last time step
    gx_ref   : (T*Bp, 4H) float32 VMEM scratch for the hoisted layer-0 input projection
    """
    H = HIDDEN
    Bp = x2d_ref.shape[0] // SEQ_LEN          # padded batch, multiple of 8
    B_out = out_ref.shape[0]
    f32 = jnp.float32

    # ---- one-time weight extraction (tile-aligned static slices) ----
    whh0 = wpack_ref[_R_WHH0:_R_WHH0 + H, 0:4 * H]                       # (10, 40)
    wih1 = wpack_ref[_R_WIH1:_R_WIH1 + H, 0:4 * H]                       # (10, 40)
    whh1 = wpack_ref[_R_WHH1:_R_WHH1 + H, 0:4 * H]                       # (10, 40)
    wx0 = wpack_ref[_R_WX0:_R_WX0 + INPUT_SIZE, 0:4 * H]                 # (3, 40)
    b0 = wpack_ref[_R_B0:_R_B0 + 1, 0:4 * H]                             # (1, 40)
    b1 = wpack_ref[_R_B1:_R_B1 + 1, 0:4 * H]                             # (1, 40)
    wf1 = wpack_ref[_R_WF1:_R_WF1 + H, 0:H]                              # (10, 10)
    wf2 = wpack_ref[_R_WF1:_R_WF1 + H, _C_WF2:_C_WF2 + INPUT_SIZE]       # (10, 3)
    bf1 = wpack_ref[_R_BF1:_R_BF1 + 1, 0:H]                              # (1, 10)
    bf2 = wpack_ref[_R_BF2:_R_BF2 + 1, 0:INPUT_SIZE]                     # (1, 3)

    # ---- hoisted layer-0 input projection for ALL time steps: one fused dot, staged
    #      in VMEM scratch (not register-resident across the unrolled recurrence) ----
    gx_ref[...] = jnp.dot(x2d_ref[...], wx0, preferred_element_type=f32) + b0

    def gates(g, c_prev):
        # One sigmoid over the whole (Bp, 4H) fused-gate vreg + one tanh on the g slice.
        s = jax.nn.sigmoid(g)
        gg = jnp.tanh(g[:, 2 * H:3 * H])
        i = s[:, 0:H]
        f = s[:, H:2 * H]
        o = s[:, 3 * H:4 * H]
        c = f * c_prev + i * gg
        h = o * jnp.tanh(c)
        return h, c

    zeros = jnp.zeros((Bp, H), f32)
    h0, c0, h1, c1 = zeros, zeros, zeros, zeros

    # ---- fully unrolled recurrence over the fixed 20 time steps ----
    for t in range(SEQ_LEN):
        r0 = t * Bp
        # layer-1 recurrent branch first: depends only on step t-1 state, so it overlaps
        # the layer-0 work of this step and stays off the h0 -> layer-1 critical edge.
        ga1 = jnp.dot(h1, whh1, preferred_element_type=f32)

        # layer 0: single fused-gate dot + precomputed input projection from scratch
        g0 = jnp.dot(h0, whh0, preferred_element_type=f32) + gx_ref[r0:r0 + Bp, :]
        h0, c0 = gates(g0, c0)

        # layer 1: second dot once h0 lands; accumulate form (v7x MRB in-place add)
        g1 = ga1 + jnp.dot(h0, wih1, preferred_element_type=f32) + b1
        h1, c1 = gates(g1, c1)

    # ---- FNN head: Linear(10,10) -> ReLU -> Linear(10,3) on the last hidden state ----
    z = jnp.maximum(jnp.dot(h1, wf1, preferred_element_type=f32) + bf1, 0.0)
    out = jnp.dot(z, wf2, preferred_element_type=f32) + bf2
    out_ref[...] = out[0:B_out, :]


def head_motion_prediction(x, params):
    """x: (B, 3, 20) float32 (PyTorch layout). Returns (B, 3)."""
    B = x.shape[0]
    assert x.shape[1] == INPUT_SIZE and x.shape[2] == SEQ_LEN
    Bp = max(8, ((B + 7) // 8) * 8)  # pad batch rows to a full sublane tile

    # input1[b, t, c] = x[b, c, t]  ->  time-major, batch-padded rows (T*Bp, 3)
    x_t = jnp.transpose(x, (2, 0, 1)).astype(jnp.float32)        # (T, B, 3)
    x_t = jnp.pad(x_t, ((0, 0), (0, Bp - B), (0, 0)))            # (T, Bp, 3)
    x2d = x_t.reshape(SEQ_LEN * Bp, INPUT_SIZE)

    vmem = pl.BlockSpec(memory_space=pltpu.MemorySpace.VMEM)
    out = pl.pallas_call(
        _hmp_kernel,
        out_shape=jax.ShapeDtypeStruct((B, INPUT_SIZE), jnp.float32),
        in_specs=[vmem, vmem],
        out_specs=vmem,
        scratch_shapes=[pltpu.VMEM((SEQ_LEN * Bp, 4 * HIDDEN), jnp.float32)],
    )(x2d, params["wpack"])
    return out


def _pack_params(wih0_t, whh0_t, b0, wih1_t, whh1_t, b1, wf1_t, bf1, wf2_t, bf2):
    """Pack all parameters into one (80, 128) f32 buffer (single DMA, tile-aligned blocks)."""
    wp = jnp.zeros((_PACK_ROWS, _PACK_COLS), jnp.float32)
    wp = wp.at[_R_WHH0:_R_WHH0 + HIDDEN, 0:4 * HIDDEN].set(whh0_t)
    wp = wp.at[_R_WIH1:_R_WIH1 + HIDDEN, 0:4 * HIDDEN].set(wih1_t)
    wp = wp.at[_R_WHH1:_R_WHH1 + HIDDEN, 0:4 * HIDDEN].set(whh1_t)
    wp = wp.at[_R_WX0:_R_WX0 + INPUT_SIZE, 0:4 * HIDDEN].set(wih0_t)
    wp = wp.at[_R_B0, 0:4 * HIDDEN].set(b0[0])
    wp = wp.at[_R_B1, 0:4 * HIDDEN].set(b1[0])
    wp = wp.at[_R_WF1:_R_WF1 + HIDDEN, 0:HIDDEN].set(wf1_t)
    wp = wp.at[_R_WF1:_R_WF1 + HIDDEN, _C_WF2:_C_WF2 + INPUT_SIZE].set(wf2_t)
    wp = wp.at[_R_BF1, 0:HIDDEN].set(bf1[0])
    wp = wp.at[_R_BF2, 0:INPUT_SIZE].set(bf2[0])
    return wp


def init_params(key):
    """Deterministic PyTorch-style uniform init; weights pre-transposed for x @ W."""
    ks = jax.random.split(key, 12)
    k_lstm = 1.0 / jnp.sqrt(HIDDEN)

    def u(k, shape, bound):
        return jax.random.uniform(k, shape, jnp.float32, -bound, bound)

    # Layer 0 (input_size=3): weight_ih_l0 (4H,3), weight_hh_l0 (4H,H); gate order i,f,g,o
    wih0 = u(ks[0], (4 * HIDDEN, INPUT_SIZE), k_lstm)
    whh0 = u(ks[1], (4 * HIDDEN, HIDDEN), k_lstm)
    bih0 = u(ks[2], (4 * HIDDEN,), k_lstm)
    bhh0 = u(ks[3], (4 * HIDDEN,), k_lstm)
    # Layer 1 (input = hidden of layer 0)
    wih1 = u(ks[4], (4 * HIDDEN, HIDDEN), k_lstm)
    whh1 = u(ks[5], (4 * HIDDEN, HIDDEN), k_lstm)
    bih1 = u(ks[6], (4 * HIDDEN,), k_lstm)
    bhh1 = u(ks[7], (4 * HIDDEN,), k_lstm)
    # FNN: Linear(10,10), Linear(10,3)
    k_f = 1.0 / jnp.sqrt(HIDDEN)
    wf1 = u(ks[8], (HIDDEN, HIDDEN), k_f)
    bf1 = u(ks[9], (HIDDEN,), k_f)
    wf2 = u(ks[10], (INPUT_SIZE, HIDDEN), k_f)
    bf2 = u(ks[11], (INPUT_SIZE,), k_f)

    p = {
        "wih0_t": wih0.T, "whh0_t": whh0.T, "b0": (bih0 + bhh0)[None, :],
        "wih1_t": wih1.T, "whh1_t": whh1.T, "b1": (bih1 + bhh1)[None, :],
        "wf1_t": wf1.T, "bf1": bf1[None, :],
        "wf2_t": wf2.T, "bf2": bf2[None, :],
    }
    p["wpack"] = _pack_params(p["wih0_t"], p["whh0_t"], p["b0"],
                              p["wih1_t"], p["whh1_t"], p["b1"],
                              p["wf1_t"], p["bf1"], p["wf2_t"], p["bf2"])
    return p


def reference_forward(x, params):
    """Pure-JAX reference matching the PyTorch forward semantics."""
    x_seq = jnp.transpose(x, (2, 0, 1)).astype(jnp.float32)  # (T, B, 3)
    B = x.shape[0]
    H = HIDDEN

    def cell(x_t, h, c, wih_t, whh_t, b):
        g = x_t @ wih_t + h @ whh_t + b
        i = jax.nn.sigmoid(g[:, 0 * H:1 * H])
        f = jax.nn.sigmoid(g[:, 1 * H:2 * H])
        gg = jnp.tanh(g[:, 2 * H:3 * H])
        o = jax.nn.sigmoid(g[:, 3 * H:4 * H])
        c_new = f * c + i * gg
        return o * jnp.tanh(c_new), c_new

    h0 = c0 = h1 = c1 = jnp.zeros((B, H), jnp.float32)
    for t in range(SEQ_LEN):
        h0, c0 = cell(x_seq[t], h0, c0, params["wih0_t"], params["whh0_t"], params["b0"])
        h1, c1 = cell(h0, h1, c1, params["wih1_t"], params["whh1_t"], params["b1"])
    z = jnp.maximum(h1 @ params["wf1_t"] + params["bf1"], 0.0)
    return z @ params["wf2_t"] + params["bf2"]


if __name__ == "__main__":
    key = jax.random.PRNGKey(0)
    k_x, k_p = jax.random.split(key)

    B = 4
    x = jax.random.normal(k_x, (B, INPUT_SIZE, SEQ_LEN), dtype=jnp.float32)
    params = init_params(k_p)

    out = head_motion_prediction(x, params)
    out = jax.block_until_ready(out)

    ref = reference_forward(x, params)
    assert out.shape == (B, INPUT_SIZE)
    assert jnp.allclose(out, ref, rtol=1e-3, atol=1e-3), "mismatch vs reference"

    print("KERNEL_OK")
</pallas_src>

<mosaic_0001>
module attributes {stable_mosaic.version = 11 : i64} {
  func.func @_hmp_kernel(%arg0: memref<160x3xf32, #tpu.memory_space<vmem>>, %arg1: memref<80x128xf32, #tpu.memory_space<vmem>>, %arg2: memref<4x3xf32, #tpu.memory_space<vmem>>, %arg3: memref<160x40xf32, #tpu.memory_space<vmem>>) attributes {dimension_semantics = [], scalar_prefetch = 0 : i64, scratch_operands = 1 : i64, tpu.core_type = #tpu.core_type<tc>} {
    %c0 = arith.constant 0 : index
    %c0_0 = arith.constant 0 : index
    %0 = vector.load %arg1[%c0, %c0_0] : memref<80x128xf32, #tpu.memory_space<vmem>>, vector<10x40xf32>
    %c16 = arith.constant 16 : index
    %c0_1 = arith.constant 0 : index
    %1 = vector.load %arg1[%c16, %c0_1] : memref<80x128xf32, #tpu.memory_space<vmem>>, vector<10x40xf32>
    %c32 = arith.constant 32 : index
    %c0_2 = arith.constant 0 : index
    %2 = vector.load %arg1[%c32, %c0_2] : memref<80x128xf32, #tpu.memory_space<vmem>>, vector<10x40xf32>
    %c64 = arith.constant 64 : index
    %c0_3 = arith.constant 0 : index
    %3 = vector.load %arg1[%c64, %c0_3] : memref<80x128xf32, #tpu.memory_space<vmem>>, vector<3x40xf32>
    %c72 = arith.constant 72 : index
    %c0_4 = arith.constant 0 : index
    %4 = vector.load %arg1[%c72, %c0_4] : memref<80x128xf32, #tpu.memory_space<vmem>>, vector<1x40xf32>
    %c73 = arith.constant 73 : index
    %c0_5 = arith.constant 0 : index
    %5 = vector.load %arg1[%c73, %c0_5] : memref<80x128xf32, #tpu.memory_space<vmem>>, vector<1x40xf32>
    %c48 = arith.constant 48 : index
    %c0_6 = arith.constant 0 : index
    %6 = vector.load %arg1[%c48, %c0_6] : memref<80x128xf32, #tpu.memory_space<vmem>>, vector<10x10xf32>
    %c48_7 = arith.constant 48 : index
    %c16_8 = arith.constant 16 : index
    %7 = vector.load %arg1[%c48_7, %c16_8] : memref<80x128xf32, #tpu.memory_space<vmem>>, vector<10x3xf32>
    %c74 = arith.constant 74 : index
    %c0_9 = arith.constant 0 : index
    %8 = vector.load %arg1[%c74, %c0_9] : memref<80x128xf32, #tpu.memory_space<vmem>>, vector<1x10xf32>
    %c75 = arith.constant 75 : index
    %c0_10 = arith.constant 0 : index
    %9 = vector.load %arg1[%c75, %c0_10] : memref<80x128xf32, #tpu.memory_space<vmem>>, vector<1x3xf32>
    %c0_11 = arith.constant 0 : index
    %c0_12 = arith.constant 0 : index
    %10 = vector.load %arg0[%c0_11, %c0_12] : memref<160x3xf32, #tpu.memory_space<vmem>>, vector<160x3xf32>
    %cst = arith.constant dense<0.000000e+00> : vector<160x40xf32>
    %11 = tpu.matmul %10, %3, %cst {dimension_numbers = #tpu.dot_dimension_numbers<[1], [0], [0], [1], [0, 0, 1, 1], [], []>} : vector<160x3xf32>, vector<3x40xf32>, vector<160x40xf32> -> vector<160x40xf32>
    %12 = vector.broadcast %4 : vector<1x40xf32> to vector<160x40xf32>
    %13 = arith.addf %11, %12 : vector<160x40xf32>
    %c0_13 = arith.constant 0 : index
    %c0_14 = arith.constant 0 : index
    %14 = vector.load %arg3[%c0_13, %c0_14] : memref<160x40xf32, #tpu.memory_space<vmem>>, vector<160x40xf32>
    tpu.vector_store %arg3[%c0_13, %c0_14], %13 {strides = array<i32>} : memref<160x40xf32, #tpu.memory_space<vmem>>, vector<160x40xf32>,
    %cst_15 = arith.constant 0.000000e+00 : f32
    %15 = vector.broadcast %cst_15 : f32 to vector<8x10xf32>
    %cst_16 = arith.constant dense<0.000000e+00> : vector<8x40xf32>
    %16 = tpu.matmul %15, %2, %cst_16 {dimension_numbers = #tpu.dot_dimension_numbers<[1], [0], [0], [1], [0, 0, 1, 1], [], []>} : vector<8x10xf32>, vector<10x40xf32>, vector<8x40xf32> -> vector<8x40xf32>
    %cst_17 = arith.constant dense<0.000000e+00> : vector<8x40xf32>
    %17 = tpu.matmul %15, %0, %cst_17 {dimension_numbers = #tpu.dot_dimension_numbers<[1], [0], [0], [1], [0, 0, 1, 1], [], []>} : vector<8x10xf32>, vector<10x40xf32>, vector<8x40xf32> -> vector<8x40xf32>
    %c0_18 = arith.constant 0 : index
    %c0_19 = arith.constant 0 : index
    %18 = vector.load %arg3[%c0_18, %c0_19] : memref<160x40xf32, #tpu.memory_space<vmem>>, vector<8x40xf32>
    %19 = arith.addf %17, %18 : vector<8x40xf32>
    %20 = arith.negf %19 : vector<8x40xf32>
    %21 = math.exp %20 : vector<8x40xf32>
    %cst_20 = arith.constant 1.000000e+00 : f32
    %22 = vector.broadcast %cst_20 : f32 to vector<8x40xf32>
    %23 = arith.addf %22, %21 : vector<8x40xf32>
    %24 = arith.divf %22, %23 : vector<8x40xf32>
    %25 = vector.extract_strided_slice %19 {offsets = [0, 20], sizes = [8, 10], strides = [1, 1]} : vector<8x40xf32> to vector<8x10xf32>
    %26 = math.tanh %25 : vector<8x10xf32>
    %27 = vector.extract_strided_slice %24 {offsets = [0, 0], sizes = [8, 10], strides = [1, 1]} : vector<8x40xf32> to vector<8x10xf32>
    %28 = vector.extract_strided_slice %24 {offsets = [0, 10], sizes = [8, 10], strides = [1, 1]} : vector<8x40xf32> to vector<8x10xf32>
    %29 = vector.extract_strided_slice %24 {offsets = [0, 30], sizes = [8, 10], strides = [1, 1]} : vector<8x40xf32> to vector<8x10xf32>
    %30 = arith.mulf %28, %15 : vector<8x10xf32>
    %31 = arith.mulf %27, %26 : vector<8x10xf32>
    %32 = arith.addf %30, %31 : vector<8x10xf32>
    %33 = math.tanh %32 : vector<8x10xf32>
    %34 = arith.mulf %29, %33 : vector<8x10xf32>
    %cst_21 = arith.constant dense<0.000000e+00> : vector<8x40xf32>
    %35 = tpu.matmul %34, %1, %cst_21 {dimension_numbers = #tpu.dot_dimension_numbers<[1], [0], [0], [1], [0, 0, 1, 1], [], []>} : vector<8x10xf32>, vector<10x40xf32>, vector<8x40xf32> -> vector<8x40xf32>
    %36 = arith.addf %16, %35 : vector<8x40xf32>
    %37 = vector.broadcast %5 : vector<1x40xf32> to vector<8x40xf32>
    %38 = arith.addf %36, %37 : vector<8x40xf32>
    %39 = arith.negf %38 : vector<8x40xf32>
    %40 = math.exp %39 : vector<8x40xf32>
    %cst_22 = arith.constant 1.000000e+00 : f32
    %41 = vector.broadcast %cst_22 : f32 to vector<8x40xf32>
    %42 = arith.addf %41, %40 : vector<8x40xf32>
    %43 = arith.divf %41, %42 : vector<8x40xf32>
    %44 = vector.extract_strided_slice %38 {offsets = [0, 20], sizes = [8, 10], strides = [1, 1]} : vector<8x40xf32> to vector<8x10xf32>
    %45 = math.tanh %44 : vector<8x10xf32>
    %46 = vector.extract_strided_slice %43 {offsets = [0, 0], sizes = [8, 10], strides = [1, 1]} : vector<8x40xf32> to vector<8x10xf32>
    %47 = vector.extract_strided_slice %43 {offsets = [0, 10], sizes = [8, 10], strides = [1, 1]} : vector<8x40xf32> to vector<8x10xf32>
    %48 = vector.extract_strided_slice %43 {offsets = [0, 30], sizes = [8, 10], strides = [1, 1]} : vector<8x40xf32> to vector<8x10xf32>
    %49 = arith.mulf %47, %15 : vector<8x10xf32>
    %50 = arith.mulf %46, %45 : vector<8x10xf32>
    %51 = arith.addf %49, %50 : vector<8x10xf32>
    %52 = math.tanh %51 : vector<8x10xf32>
    %53 = arith.mulf %48, %52 : vector<8x10xf32>
    %cst_23 = arith.constant dense<0.000000e+00> : vector<8x40xf32>
    %54 = tpu.matmul %53, %2, %cst_23 {dimension_numbers = #tpu.dot_dimension_numbers<[1], [0], [0], [1], [0, 0, 1, 1], [], []>} : vector<8x10xf32>, vector<10x40xf32>, vector<8x40xf32> -> vector<8x40xf32>
    %cst_24 = arith.constant dense<0.000000e+00> : vector<8x40xf32>
    %55 = tpu.matmul %34, %0, %cst_24 {dimension_numbers = #tpu.dot_dimension_numbers<[1], [0], [0], [1], [0, 0, 1, 1], [], []>} : vector<8x10xf32>, vector<10x40xf32>, vector<8x40xf32> -> vector<8x40xf32>
    %c8 = arith.constant 8 : index
    %c0_25 = arith.constant 0 : index
    %56 = vector.load %arg3[%c8, %c0_25] : memref<160x40xf32, #tpu.memory_space<vmem>>, vector<8x40xf32>
    %57 = arith.addf %55, %56 : vector<8x40xf32>
    %58 = arith.negf %57 : vector<8x40xf32>
    %59 = math.exp %58 : vector<8x40xf32>
    %cst_26 = arith.constant 1.000000e+00 : f32
    %60 = vector.broadcast %cst_26 : f32 to vector<8x40xf32>
    %61 = arith.addf %60, %59 : vector<8x40xf32>
    %62 = arith.divf %60, %61 : vector<8x40xf32>
    %63 = vector.extract_strided_slice %57 {offsets = [0, 20], sizes = [8, 10], strides = [1, 1]} : vector<8x40xf32> to vector<8x10xf32>
    %64 = math.tanh %63 : vector<8x10xf32>
    %65 = vector.extract_strided_slice %62 {offsets = [0, 0], sizes = [8, 10], strides = [1, 1]} : vector<8x40xf32> to vector<8x10xf32>
    %66 = vector.extract_strided_slice %62 {offsets = [0, 10], sizes = [8, 10], strides = [1, 1]} : vector<8x40xf32> to vector<8x10xf32>
    %67 = vector.extract_strided_slice %62 {offsets = [0, 30], sizes = [8, 10], strides = [1, 1]} : vector<8x40xf32> to vector<8x10xf32>
    %68 = arith.mulf %66, %32 : vector<8x10xf32>
    %69 = arith.mulf %65, %64 : vector<8x10xf32>
    %70 = arith.addf %68, %69 : vector<8x10xf32>
    %71 = math.tanh %70 : vector<8x10xf32>
    %72 = arith.mulf %67, %71 : vector<8x10xf32>
    %cst_27 = arith.constant dense<0.000000e+00> : vector<8x40xf32>
    %73 = tpu.matmul %72, %1, %cst_27 {dimension_numbers = #tpu.dot_dimension_numbers<[1], [0], [0], [1], [0, 0, 1, 1], [], []>} : vector<8x10xf32>, vector<10x40xf32>, vector<8x40xf32> -> vector<8x40xf32>
    %74 = arith.addf %54, %73 : vector<8x40xf32>
    %75 = vector.broadcast %5 : vector<1x40xf32> to vector<8x40xf32>
    %76 = arith.addf %74, %75 : vector<8x40xf32>
    %77 = arith.negf %76 : vector<8x40xf32>
    %78 = math.exp %77 : vector<8x40xf32>
    %cst_28 = arith.constant 1.000000e+00 : f32
    %79 = vector.broadcast %cst_28 : f32 to vector<8x40xf32>
    %80 = arith.addf %79, %78 : vector<8x40xf32>
    %81 = arith.divf %79, %80 : vector<8x40xf32>
    %82 = vector.extract_strided_slice %76 {offsets = [0, 20], sizes = [8, 10], strides = [1, 1]} : vector<8x40xf32> to vector<8x10xf32>
    %83 = math.tanh %82 : vector<8x10xf32>
    %84 = vector.extract_strided_slice %81 {offsets = [0, 0], sizes = [8, 10], strides = [1, 1]} : vector<8x40xf32> to vector<8x10xf32>
    %85 = vector.extract_strided_slice %81 {offsets = [0, 10], sizes = [8, 10], strides = [1, 1]} : vector<8x40xf32> to vector<8x10xf32>
    %86 = vector.extract_strided_slice %81 {offsets = [0, 30], sizes = [8, 10], strides = [1, 1]} : vector<8x40xf32> to vector<8x10xf32>
    %87 = arith.mulf %85, %51 : vector<8x10xf32>
    %88 = arith.mulf %84, %83 : vector<8x10xf32>
    %89 = arith.addf %87, %88 : vector<8x10xf32>
    %90 = math.tanh %89 : vector<8x10xf32>
    %91 = arith.mulf %86, %90 : vector<8x10xf32>
    %cst_29 = arith.constant dense<0.000000e+00> : vector<8x40xf32>
    %92 = tpu.matmul %91, %2, %cst_29 {dimension_numbers = #tpu.dot_dimension_numbers<[1], [0], [0], [1], [0, 0, 1, 1], [], []>} : vector<8x10xf32>, vector<10x40xf32>, vector<8x40xf32> -> vector<8x40xf32>
    %cst_30 = arith.constant dense<0.000000e+00> : vector<8x40xf32>
    %93 = tpu.matmul %72, %0, %cst_30 {dimension_numbers = #tpu.dot_dimension_numbers<[1], [0], [0], [1], [0, 0, 1, 1], [], []>} : vector<8x10xf32>, vector<10x40xf32>, vector<8x40xf32> -> vector<8x40xf32>
    %c16_31 = arith.constant 16 : index
    %c0_32 = arith.constant 0 : index
    %94 = vector.load %arg3[%c16_31, %c0_32] : memref<160x40xf32, #tpu.memory_space<vmem>>, vector<8x40xf32>
    %95 = arith.addf %93, %94 : vector<8x40xf32>
    %96 = arith.negf %95 : vector<8x40xf32>
    %97 = math.exp %96 : vector<8x40xf32>
    %cst_33 = arith.constant 1.000000e+00 : f32
    %98 = vector.broadcast %cst_33 : f32 to vector<8x40xf32>
    %99 = arith.addf %98, %97 : vector<8x40xf32>
    %100 = arith.divf %98, %99 : vector<8x40xf32>
    %101 = vector.extract_strided_slice %95 {offsets = [0, 20], sizes = [8, 10], strides = [1, 1]} : vector<8x40xf32> to vector<8x10xf32>
    %102 = math.tanh %101 : vector<8x10xf32>
    %103 = vector.extract_strided_slice %100 {offsets = [0, 0], sizes = [8, 10], strides = [1, 1]} : vector<8x40xf32> to vector<8x10xf32>
    %104 = vector.extract_strided_slice %100 {offsets = [0, 10], sizes = [8, 10], strides = [1, 1]} : vector<8x40xf32> to vector<8x10xf32>
    %105 = vector.extract_strided_slice %100 {offsets = [0, 30], sizes = [8, 10], strides = [1, 1]} : vector<8x40xf32> to vector<8x10xf32>
    %106 = arith.mulf %104, %70 : vector<8x10xf32>
    %107 = arith.mulf %103, %102 : vector<8x10xf32>
    %108 = arith.addf %106, %107 : vector<8x10xf32>
    %109 = math.tanh %108 : vector<8x10xf32>
    %110 = arith.mulf %105, %109 : vector<8x10xf32>
    %cst_34 = arith.constant dense<0.000000e+00> : vector<8x40xf32>
    %111 = tpu.matmul %110, %1, %cst_34 {dimension_numbers = #tpu.dot_dimension_numbers<[1], [0], [0], [1], [0, 0, 1, 1], [], []>} : vector<8x10xf32>, vector<10x40xf32>, vector<8x40xf32> -> vector<8x40xf32>
    %112 = arith.addf %92, %111 : vector<8x40xf32>
    %113 = vector.broadcast %5 : vector<1x40xf32> to vector<8x40xf32>
    %114 = arith.addf %112, %113 : vector<8x40xf32>
    %115 = arith.negf %114 : vector<8x40xf32>
    %116 = math.exp %115 : vector<8x40xf32>
    %cst_35 = arith.constant 1.000000e+00 : f32
    %117 = vector.broadcast %cst_35 : f32 to vector<8x40xf32>
    %118 = arith.addf %117, %116 : vector<8x40xf32>
    %119 = arith.divf %117, %118 : vector<8x40xf32>
    %120 = vector.extract_strided_slice %114 {offsets = [0, 20], sizes = [8, 10], strides = [1, 1]} : vector<8x40xf32> to vector<8x10xf32>
    %121 = math.tanh %120 : vector<8x10xf32>
    %122 = vector.extract_strided_slice %119 {offsets = [0, 0], sizes = [8, 10], strides = [1, 1]} : vector<8x40xf32> to vector<8x10xf32>
    %123 = vector.extract_strided_slice %119 {offsets = [0, 10], sizes = [8, 10], strides = [1, 1]} : vector<8x40xf32> to vector<8x10xf32>
    %124 = vector.extract_strided_slice %119 {offsets = [0, 30], sizes = [8, 10], strides = [1, 1]} : vector<8x40xf32> to vector<8x10xf32>
    %125 = arith.mulf %123, %89 : vector<8x10xf32>
    %126 = arith.mulf %122, %121 : vector<8x10xf32>
    %127 = arith.addf %125, %126 : vector<8x10xf32>
    %128 = math.tanh %127 : vector<8x10xf32>
    %129 = arith.mulf %124, %128 : vector<8x10xf32>
    %cst_36 = arith.constant dense<0.000000e+00> : vector<8x40xf32>
    %130 = tpu.matmul %129, %2, %cst_36 {dimension_numbers = #tpu.dot_dimension_numbers<[1], [0], [0], [1], [0, 0, 1, 1], [], []>} : vector<8x10xf32>, vector<10x40xf32>, vector<8x40xf32> -> vector<8x40xf32>
    %cst_37 = arith.constant dense<0.000000e+00> : vector<8x40xf32>
    %131 = tpu.matmul %110, %0, %cst_37 {dimension_numbers = #tpu.dot_dimension_numbers<[1], [0], [0], [1], [0, 0, 1, 1], [], []>} : vector<8x10xf32>, vector<10x40xf32>, vector<8x40xf32> -> vector<8x40xf32>
    %c24 = arith.constant 24 : index
    %c0_38 = arith.constant 0 : index
    %132 = vector.load %arg3[%c24, %c0_38] : memref<160x40xf32, #tpu.memory_space<vmem>>, vector<8x40xf32>
    %133 = arith.addf %131, %132 : vector<8x40xf32>
    %134 = arith.negf %133 : vector<8x40xf32>
    %135 = math.exp %134 : vector<8x40xf32>
    %cst_39 = arith.constant 1.000000e+00 : f32
    %136 = vector.broadcast %cst_39 : f32 to vector<8x40xf32>
    %137 = arith.addf %136, %135 : vector<8x40xf32>
    %138 = arith.divf %136, %137 : vector<8x40xf32>
    %139 = vector.extract_strided_slice %133 {offsets = [0, 20], sizes = [8, 10], strides = [1, 1]} : vector<8x40xf32> to vector<8x10xf32>
    %140 = math.tanh %139 : vector<8x10xf32>
    %141 = vector.extract_strided_slice %138 {offsets = [0, 0], sizes = [8, 10], strides = [1, 1]} : vector<8x40xf32> to vector<8x10xf32>
    %142 = vector.extract_strided_slice %138 {offsets = [0, 10], sizes = [8, 10], strides = [1, 1]} : vector<8x40xf32> to vector<8x10xf32>
    %143 = vector.extract_strided_slice %138 {offsets = [0, 30], sizes = [8, 10], strides = [1, 1]} : vector<8x40xf32> to vector<8x10xf32>
    %144 = arith.mulf %142, %108 : vector<8x10xf32>
    %145 = arith.mulf %141, %140 : vector<8x10xf32>
    %146 = arith.addf %144, %145 : vector<8x10xf32>
    %147 = math.tanh %146 : vector<8x10xf32>
    %148 = arith.mulf %143, %147 : vector<8x10xf32>
    %cst_40 = arith.constant dense<0.000000e+00> : vector<8x40xf32>
    %149 = tpu.matmul %148, %1, %cst_40 {dimension_numbers = #tpu.dot_dimension_numbers<[1], [0], [0], [1], [0, 0, 1, 1], [], []>} : vector<8x10xf32>, vector<10x40xf32>, vector<8x40xf32> -> vector<8x40xf32>
    %150 = arith.addf %130, %149 : vector<8x40xf32>
    %151 = vector.broadcast %5 : vector<1x40xf32> to vector<8x40xf32>
    %152 = arith.addf %150, %151 : vector<8x40xf32>
    %153 = arith.negf %152 : vector<8x40xf32>
    %154 = math.exp %153 : vector<8x40xf32>
    %cst_41 = arith.constant 1.000000e+00 : f32
    %155 = vector.broadcast %cst_41 : f32 to vector<8x40xf32>
    %156 = arith.addf %155, %154 : vector<8x40xf32>
    %157 = arith.divf %155, %156 : vector<8x40xf32>
    %158 = vector.extract_strided_slice %152 {offsets = [0, 20], sizes = [8, 10], strides = [1, 1]} : vector<8x40xf32> to vector<8x10xf32>
    %159 = math.tanh %158 : vector<8x10xf32>
    %160 = vector.extract_strided_slice %157 {offsets = [0, 0], sizes = [8, 10], strides = [1, 1]} : vector<8x40xf32> to vector<8x10xf32>
    %161 = vector.extract_strided_slice %157 {offsets = [0, 10], sizes = [8, 10], strides = [1, 1]} : vector<8x40xf32> to vector<8x10xf32>
    %162 = vector.extract_strided_slice %157 {offsets = [0, 30], sizes = [8, 10], strides = [1, 1]} : vector<8x40xf32> to vector<8x10xf32>
    %163 = arith.mulf %161, %127 : vector<8x10xf32>
    %164 = arith.mulf %160, %159 : vector<8x10xf32>
    %165 = arith.addf %163, %164 : vector<8x10xf32>
    %166 = math.tanh %165 : vector<8x10xf32>
    %167 = arith.mulf %162, %166 : vector<8x10xf32>
    %cst_42 = arith.constant dense<0.000000e+00> : vector<8x40xf32>
    %168 = tpu.matmul %167, %2, %cst_42 {dimension_numbers = #tpu.dot_dimension_numbers<[1], [0], [0], [1], [0, 0, 1, 1], [], []>} : vector<8x10xf32>, vector<10x40xf32>, vector<8x40xf32> -> vector<8x40xf32>
    %cst_43 = arith.constant dense<0.000000e+00> : vector<8x40xf32>
    %169 = tpu.matmul %148, %0, %cst_43 {dimension_numbers = #tpu.dot_dimension_numbers<[1], [0], [0], [1], [0, 0, 1, 1], [], []>} : vector<8x10xf32>, vector<10x40xf32>, vector<8x40xf32> -> vector<8x40xf32>
    %c32_44 = arith.constant 32 : index
    %c0_45 = arith.constant 0 : index
    %170 = vector.load %arg3[%c32_44, %c0_45] : memref<160x40xf32, #tpu.memory_space<vmem>>, vector<8x40xf32>
    %171 = arith.addf %169, %170 : vector<8x40xf32>
    %172 = arith.negf %171 : vector<8x40xf32>
    %173 = math.exp %172 : vector<8x40xf32>
    %cst_46 = arith.constant 1.000000e+00 : f32
    %174 = vector.broadcast %cst_46 : f32 to vector<8x40xf32>
    %175 = arith.addf %174, %173 : vector<8x40xf32>
    %176 = arith.divf %174, %175 : vector<8x40xf32>
    %177 = vector.extract_strided_slice %171 {offsets = [0, 20], sizes = [8, 10], strides = [1, 1]} : vector<8x40xf32> to vector<8x10xf32>
    %178 = math.tanh %177 : vector<8x10xf32>
    %179 = vector.extract_strided_slice %176 {offsets = [0, 0], sizes = [8, 10], strides = [1, 1]} : vector<8x40xf32> to vector<8x10xf32>
    %180 = vector.extract_strided_slice %176 {offsets = [0, 10], sizes = [8, 10], strides = [1, 1]} : vector<8x40xf32> to vector<8x10xf32>
    %181 = vector.extract_strided_slice %176 {offsets = [0, 30], sizes = [8, 10], strides = [1, 1]} : vector<8x40xf32> to vector<8x10xf32>
    %182 = arith.mulf %180, %146 : vector<8x10xf32>
    %183 = arith.mulf %179, %178 : vector<8x10xf32>
    %184 = arith.addf %182, %183 : vector<8x10xf32>
    %185 = math.tanh %184 : vector<8x10xf32>
    %186 = arith.mulf %181, %185 : vector<8x10xf32>
    %cst_47 = arith.constant dense<0.000000e+00> : vector<8x40xf32>
    %187 = tpu.matmul %186, %1, %cst_47 {dimension_numbers = #tpu.dot_dimension_numbers<[1], [0], [0], [1], [0, 0, 1, 1], [], []>} : vector<8x10xf32>, vector<10x40xf32>, vector<8x40xf32> -> vector<8x40xf32>
    %188 = arith.addf %168, %187 : vector<8x40xf32>
    %189 = vector.broadcast %5 : vector<1x40xf32> to vector<8x40xf32>
    %190 = arith.addf %188, %189 : vector<8x40xf32>
    %191 = arith.negf %190 : vector<8x40xf32>
    %192 = math.exp %191 : vector<8x40xf32>
    %cst_48 = arith.constant 1.000000e+00 : f32
    %193 = vector.broadcast %cst_48 : f32 to vector<8x40xf32>
    %194 = arith.addf %193, %192 : vector<8x40xf32>
    %195 = arith.divf %193, %194 : vector<8x40xf32>
    %196 = vector.extract_strided_slice %190 {offsets = [0, 20], sizes = [8, 10], strides = [1, 1]} : vector<8x40xf32> to vector<8x10xf32>
    %197 = math.tanh %196 : vector<8x10xf32>
    %198 = vector.extract_strided_slice %195 {offsets = [0, 0], sizes = [8, 10], strides = [1, 1]} : vector<8x40xf32> to vector<8x10xf32>
    %199 = vector.extract_strided_slice %195 {offsets = [0, 10], sizes = [8, 10], strides = [1, 1]} : vector<8x40xf32> to vector<8x10xf32>
    %200 = vector.extract_strided_slice %195 {offsets = [0, 30], sizes = [8, 10], strides = [1, 1]} : vector<8x40xf32> to vector<8x10xf32>
    %201 = arith.mulf %199, %165 : vector<8x10xf32>
    %202 = arith.mulf %198, %197 : vector<8x10xf32>
    %203 = arith.addf %201, %202 : vector<8x10xf32>
    %204 = math.tanh %203 : vector<8x10xf32>
    %205 = arith.mulf %200, %204 : vector<8x10xf32>
    %cst_49 = arith.constant dense<0.000000e+00> : vector<8x40xf32>
    %206 = tpu.matmul %205, %2, %cst_49 {dimension_numbers = #tpu.dot_dimension_numbers<[1], [0], [0], [1], [0, 0, 1, 1], [], []>} : vector<8x10xf32>, vector<10x40xf32>, vector<8x40xf32> -> vector<8x40xf32>
    %cst_50 = arith.constant dense<0.000000e+00> : vector<8x40xf32>
    %207 = tpu.matmul %186, %0, %cst_50 {dimension_numbers = #tpu.dot_dimension_numbers<[1], [0], [0], [1], [0, 0, 1, 1], [], []>} : vector<8x10xf32>, vector<10x40xf32>, vector<8x40xf32> -> vector<8x40xf32>
    %c40 = arith.constant 40 : index
    %c0_51 = arith.constant 0 : index
    %208 = vector.load %arg3[%c40, %c0_51] : memref<160x40xf32, #tpu.memory_space<vmem>>, vector<8x40xf32>
    %209 = arith.addf %207, %208 : vector<8x40xf32>
    %210 = arith.negf %209 : vector<8x40xf32>
    %211 = math.exp %210 : vector<8x40xf32>
    %cst_52 = arith.constant 1.000000e+00 : f32
    %212 = vector.broadcast %cst_52 : f32 to vector<8x40xf32>
    %213 = arith.addf %212, %211 : vector<8x40xf32>
    %214 = arith.divf %212, %213 : vector<8x40xf32>
    %215 = vector.extract_strided_slice %209 {offsets = [0, 20], sizes = [8, 10], strides = [1, 1]} : vector<8x40xf32> to vector<8x10xf32>
    %216 = math.tanh %215 : vector<8x10xf32>
    %217 = vector.extract_strided_slice %214 {offsets = [0, 0], sizes = [8, 10], strides = [1, 1]} : vector<8x40xf32> to vector<8x10xf32>
    %218 = vector.extract_strided_slice %214 {offsets = [0, 10], sizes = [8, 10], strides = [1, 1]} : vector<8x40xf32> to vector<8x10xf32>
    %219 = vector.extract_strided_slice %214 {offsets = [0, 30], sizes = [8, 10], strides = [1, 1]} : vector<8x40xf32> to vector<8x10xf32>
    %220 = arith.mulf %218, %184 : vector<8x10xf32>
    %221 = arith.mulf %217, %216 : vector<8x10xf32>
    %222 = arith.addf %220, %221 : vector<8x10xf32>
    %223 = math.tanh %222 : vector<8x10xf32>
    %224 = arith.mulf %219, %223 : vector<8x10xf32>
    %cst_53 = arith.constant dense<0.000000e+00> : vector<8x40xf32>
    %225 = tpu.matmul %224, %1, %cst_53 {dimension_numbers = #tpu.dot_dimension_numbers<[1], [0], [0], [1], [0, 0, 1, 1], [], []>} : vector<8x10xf32>, vector<10x40xf32>, vector<8x40xf32> -> vector<8x40xf32>
    %226 = arith.addf %206, %225 : vector<8x40xf32>
    %227 = vector.broadcast %5 : vector<1x40xf32> to vector<8x40xf32>
    %228 = arith.addf %226, %227 : vector<8x40xf32>
    %229 = arith.negf %228 : vector<8x40xf32>
    %230 = math.exp %229 : vector<8x40xf32>
    %cst_54 = arith.constant 1.000000e+00 : f32
    %231 = vector.broadcast %cst_54 : f32 to vector<8x40xf32>
    %232 = arith.addf %231, %230 : vector<8x40xf32>
    %233 = arith.divf %231, %232 : vector<8x40xf32>
    %234 = vector.extract_strided_slice %228 {offsets = [0, 20], sizes = [8, 10], strides = [1, 1]} : vector<8x40xf32> to vector<8x10xf32>
    %235 = math.tanh %234 : vector<8x10xf32>
    %236 = vector.extract_strided_slice %233 {offsets = [0, 0], sizes = [8, 10], strides = [1, 1]} : vector<8x40xf32> to vector<8x10xf32>
    %237 = vector.extract_strided_slice %233 {offsets = [0, 10], sizes = [8, 10], strides = [1, 1]} : vector<8x40xf32> to vector<8x10xf32>
    %238 = vector.extract_strided_slice %233 {offsets = [0, 30], sizes = [8, 10], strides = [1, 1]} : vector<8x40xf32> to vector<8x10xf32>
    %239 = arith.mulf %237, %203 : vector<8x10xf32>
    %240 = arith.mulf %236, %235 : vector<8x10xf32>
    %241 = arith.addf %239, %240 : vector<8x10xf32>
    %242 = math.tanh %241 : vector<8x10xf32>
    %243 = arith.mulf %238, %242 : vector<8x10xf32>
    %cst_55 = arith.constant dense<0.000000e+00> : vector<8x40xf32>
    %244 = tpu.matmul %243, %2, %cst_55 {dimension_numbers = #tpu.dot_dimension_numbers<[1], [0], [0], [1], [0, 0, 1, 1], [], []>} : vector<8x10xf32>, vector<10x40xf32>, vector<8x40xf32> -> vector<8x40xf32>
    %cst_56 = arith.constant dense<0.000000e+00> : vector<8x40xf32>
    %245 = tpu.matmul %224, %0, %cst_56 {dimension_numbers = #tpu.dot_dimension_numbers<[1], [0], [0], [1], [0, 0, 1, 1], [], []>} : vector<8x10xf32>, vector<10x40xf32>, vector<8x40xf32> -> vector<8x40xf32>
    %c48_57 = arith.constant 48 : index
    %c0_58 = arith.constant 0 : index
    %246 = vector.load %arg3[%c48_57, %c0_58] : memref<160x40xf32, #tpu.memory_space<vmem>>, vector<8x40xf32>
    %247 = arith.addf %245, %246 : vector<8x40xf32>
    %248 = arith.negf %247 : vector<8x40xf32>
    %249 = math.exp %248 : vector<8x40xf32>
    %cst_59 = arith.constant 1.000000e+00 : f32
    %250 = vector.broadcast %cst_59 : f32 to vector<8x40xf32>
    %251 = arith.addf %250, %249 : vector<8x40xf32>
    %252 = arith.divf %250, %251 : vector<8x40xf32>
    %253 = vector.extract_strided_slice %247 {offsets = [0, 20], sizes = [8, 10], strides = [1, 1]} : vector<8x40xf32> to vector<8x10xf32>
    %254 = math.tanh %253 : vector<8x10xf32>
    %255 = vector.extract_strided_slice %252 {offsets = [0, 0], sizes = [8, 10], strides = [1, 1]} : vector<8x40xf32> to vector<8x10xf32>
    %256 = vector.extract_strided_slice %252 {offsets = [0, 10], sizes = [8, 10], strides = [1, 1]} : vector<8x40xf32> to vector<8x10xf32>
    %257 = vector.extract_strided_slice %252 {offsets = [0, 30], sizes = [8, 10], strides = [1, 1]} : vector<8x40xf32> to vector<8x10xf32>
    %258 = arith.mulf %256, %222 : vector<8x10xf32>
    %259 = arith.mulf %255, %254 : vector<8x10xf32>
    %260 = arith.addf %258, %259 : vector<8x10xf32>
    %261 = math.tanh %260 : vector<8x10xf32>
    %262 = arith.mulf %257, %261 : vector<8x10xf32>
    %cst_60 = arith.constant dense<0.000000e+00> : vector<8x40xf32>
    %263 = tpu.matmul %262, %1, %cst_60 {dimension_numbers = #tpu.dot_dimension_numbers<[1], [0], [0], [1], [0, 0, 1, 1], [], []>} : vector<8x10xf32>, vector<10x40xf32>, vector<8x40xf32> -> vector<8x40xf32>
    %264 = arith.addf %244, %263 : vector<8x40xf32>
    %265 = vector.broadcast %5 : vector<1x40xf32> to vector<8x40xf32>
    %266 = arith.addf %264, %265 : vector<8x40xf32>
    %267 = arith.negf %266 : vector<8x40xf32>
    %268 = math.exp %267 : vector<8x40xf32>
    %cst_61 = arith.constant 1.000000e+00 : f32
    %269 = vector.broadcast %cst_61 : f32 to vector<8x40xf32>
    %270 = arith.addf %269, %268 : vector<8x40xf32>
    %271 = arith.divf %269, %270 : vector<8x40xf32>
    %272 = vector.extract_strided_slice %266 {offsets = [0, 20], sizes = [8, 10], strides = [1, 1]} : vector<8x40xf32> to vector<8x10xf32>
    %273 = math.tanh %272 : vector<8x10xf32>
    %274 = vector.extract_strided_slice %271 {offsets = [0, 0], sizes = [8, 10], strides = [1, 1]} : vector<8x40xf32> to vector<8x10xf32>
    %275 = vector.extract_strided_slice %271 {offsets = [0, 10], sizes = [8, 10], strides = [1, 1]} : vector<8x40xf32> to vector<8x10xf32>
    %276 = vector.extract_strided_slice %271 {offsets = [0, 30], sizes = [8, 10], strides = [1, 1]} : vector<8x40xf32> to vector<8x10xf32>
    %277 = arith.mulf %275, %241 : vector<8x10xf32>
    %278 = arith.mulf %274, %273 : vector<8x10xf32>
    %279 = arith.addf %277, %278 : vector<8x10xf32>
    %280 = math.tanh %279 : vector<8x10xf32>
    %281 = arith.mulf %276, %280 : vector<8x10xf32>
    %cst_62 = arith.constant dense<0.000000e+00> : vector<8x40xf32>
    %282 = tpu.matmul %281, %2, %cst_62 {dimension_numbers = #tpu.dot_dimension_numbers<[1], [0], [0], [1], [0, 0, 1, 1], [], []>} : vector<8x10xf32>, vector<10x40xf32>, vector<8x40xf32> -> vector<8x40xf32>
    %cst_63 = arith.constant dense<0.000000e+00> : vector<8x40xf32>
    %283 = tpu.matmul %262, %0, %cst_63 {dimension_numbers = #tpu.dot_dimension_numbers<[1], [0], [0], [1], [0, 0, 1, 1], [], []>} : vector<8x10xf32>, vector<10x40xf32>, vector<8x40xf32> -> vector<8x40xf32>
    %c56 = arith.constant 56 : index
    %c0_64 = arith.constant 0 : index
    %284 = vector.load %arg3[%c56, %c0_64] : memref<160x40xf32, #tpu.memory_space<vmem>>, vector<8x40xf32>
    %285 = arith.addf %283, %284 : vector<8x40xf32>
    %286 = arith.negf %285 : vector<8x40xf32>
    %287 = math.exp %286 : vector<8x40xf32>
    %cst_65 = arith.constant 1.000000e+00 : f32
    %288 = vector.broadcast %cst_65 : f32 to vector<8x40xf32>
    %289 = arith.addf %288, %287 : vector<8x40xf32>
    %290 = arith.divf %288, %289 : vector<8x40xf32>
    %291 = vector.extract_strided_slice %285 {offsets = [0, 20], sizes = [8, 10], strides = [1, 1]} : vector<8x40xf32> to vector<8x10xf32>
    %292 = math.tanh %291 : vector<8x10xf32>
    %293 = vector.extract_strided_slice %290 {offsets = [0, 0], sizes = [8, 10], strides = [1, 1]} : vector<8x40xf32> to vector<8x10xf32>
    %294 = vector.extract_strided_slice %290 {offsets = [0, 10], sizes = [8, 10], strides = [1, 1]} : vector<8x40xf32> to vector<8x10xf32>
    %295 = vector.extract_strided_slice %290 {offsets = [0, 30], sizes = [8, 10], strides = [1, 1]} : vector<8x40xf32> to vector<8x10xf32>
    %296 = arith.mulf %294, %260 : vector<8x10xf32>
    %297 = arith.mulf %293, %292 : vector<8x10xf32>
    %298 = arith.addf %296, %297 : vector<8x10xf32>
    %299 = math.tanh %298 : vector<8x10xf32>
    %300 = arith.mulf %295, %299 : vector<8x10xf32>
    %cst_66 = arith.constant dense<0.000000e+00> : vector<8x40xf32>
    %301 = tpu.matmul %300, %1, %cst_66 {dimension_numbers = #tpu.dot_dimension_numbers<[1], [0], [0], [1], [0, 0, 1, 1], [], []>} : vector<8x10xf32>, vector<10x40xf32>, vector<8x40xf32> -> vector<8x40xf32>
    %302 = arith.addf %282, %301 : vector<8x40xf32>
    %303 = vector.broadcast %5 : vector<1x40xf32> to vector<8x40xf32>
    %304 = arith.addf %302, %303 : vector<8x40xf32>
    %305 = arith.negf %304 : vector<8x40xf32>
    %306 = math.exp %305 : vector<8x40xf32>
    %cst_67 = arith.constant 1.000000e+00 : f32
    %307 = vector.broadcast %cst_67 : f32 to vector<8x40xf32>
    %308 = arith.addf %307, %306 : vector<8x40xf32>
    %309 = arith.divf %307, %308 : vector<8x40xf32>
    %310 = vector.extract_strided_slice %304 {offsets = [0, 20], sizes = [8, 10], strides = [1, 1]} : vector<8x40xf32> to vector<8x10xf32>
    %311 = math.tanh %310 : vector<8x10xf32>
    %312 = vector.extract_strided_slice %309 {offsets = [0, 0], sizes = [8, 10], strides = [1, 1]} : vector<8x40xf32> to vector<8x10xf32>
    %313 = vector.extract_strided_slice %309 {offsets = [0, 10], sizes = [8, 10], strides = [1, 1]} : vector<8x40xf32> to vector<8x10xf32>
    %314 = vector.extract_strided_slice %309 {offsets = [0, 30], sizes = [8, 10], strides = [1, 1]} : vector<8x40xf32> to vector<8x10xf32>
    %315 = arith.mulf %313, %279 : vector<8x10xf32>
    %316 = arith.mulf %312, %311 : vector<8x10xf32>
    %317 = arith.addf %315, %316 : vector<8x10xf32>
    %318 = math.tanh %317 : vector<8x10xf32>
    %319 = arith.mulf %314, %318 : vector<8x10xf32>
    %cst_68 = arith.constant dense<0.000000e+00> : vector<8x40xf32>
    %320 = tpu.matmul %319, %2, %cst_68 {dimension_numbers = #tpu.dot_dimension_numbers<[1], [0], [0], [1], [0, 0, 1, 1], [], []>} : vector<8x10xf32>, vector<10x40xf32>, vector<8x40xf32> -> vector<8x40xf32>
    %cst_69 = arith.constant dense<0.000000e+00> : vector<8x40xf32>
    %321 = tpu.matmul %300, %0, %cst_69 {dimension_numbers = #tpu.dot_dimension_numbers<[1], [0], [0], [1], [0, 0, 1, 1], [], []>} : vector<8x10xf32>, vector<10x40xf32>, vector<8x40xf32> -> vector<8x40xf32>
    %c64_70 = arith.constant 64 : index
    %c0_71 = arith.constant 0 : index
    %322 = vector.load %arg3[%c64_70, %c0_71] : memref<160x40xf32, #tpu.memory_space<vmem>>, vector<8x40xf32>
    %323 = arith.addf %321, %322 : vector<8x40xf32>
    %324 = arith.negf %323 : vector<8x40xf32>
    %325 = math.exp %324 : vector<8x40xf32>
    %cst_72 = arith.constant 1.000000e+00 : f32
    %326 = vector.broadcast %cst_72 : f32 to vector<8x40xf32>
    %327 = arith.addf %326, %325 : vector<8x40xf32>
    %328 = arith.divf %326, %327 : vector<8x40xf32>
    %329 = vector.extract_strided_slice %323 {offsets = [0, 20], sizes = [8, 10], strides = [1, 1]} : vector<8x40xf32> to vector<8x10xf32>
    %330 = math.tanh %329 : vector<8x10xf32>
    %331 = vector.extract_strided_slice %328 {offsets = [0, 0], sizes = [8, 10], strides = [1, 1]} : vector<8x40xf32> to vector<8x10xf32>
    %332 = vector.extract_strided_slice %328 {offsets = [0, 10], sizes = [8, 10], strides = [1, 1]} : vector<8x40xf32> to vector<8x10xf32>
    %333 = vector.extract_strided_slice %328 {offsets = [0, 30], sizes = [8, 10], strides = [1, 1]} : vector<8x40xf32> to vector<8x10xf32>
    %334 = arith.mulf %332, %298 : vector<8x10xf32>
    %335 = arith.mulf %331, %330 : vector<8x10xf32>
    %336 = arith.addf %334, %335 : vector<8x10xf32>
    %337 = math.tanh %336 : vector<8x10xf32>
    %338 = arith.mulf %333, %337 : vector<8x10xf32>
    %cst_73 = arith.constant dense<0.000000e+00> : vector<8x40xf32>
    %339 = tpu.matmul %338, %1, %cst_73 {dimension_numbers = #tpu.dot_dimension_numbers<[1], [0], [0], [1], [0, 0, 1, 1], [], []>} : vector<8x10xf32>, vector<10x40xf32>, vector<8x40xf32> -> vector<8x40xf32>
    %340 = arith.addf %320, %339 : vector<8x40xf32>
    %341 = vector.broadcast %5 : vector<1x40xf32> to vector<8x40xf32>
    %342 = arith.addf %340, %341 : vector<8x40xf32>
    %343 = arith.negf %342 : vector<8x40xf32>
    %344 = math.exp %343 : vector<8x40xf32>
    %cst_74 = arith.constant 1.000000e+00 : f32
    %345 = vector.broadcast %cst_74 : f32 to vector<8x40xf32>
    %346 = arith.addf %345, %344 : vector<8x40xf32>
    %347 = arith.divf %345, %346 : vector<8x40xf32>
    %348 = vector.extract_strided_slice %342 {offsets = [0, 20], sizes = [8, 10], strides = [1, 1]} : vector<8x40xf32> to vector<8x10xf32>
    %349 = math.tanh %348 : vector<8x10xf32>
    %350 = vector.extract_strided_slice %347 {offsets = [0, 0], sizes = [8, 10], strides = [1, 1]} : vector<8x40xf32> to vector<8x10xf32>
    %351 = vector.extract_strided_slice %347 {offsets = [0, 10], sizes = [8, 10], strides = [1, 1]} : vector<8x40xf32> to vector<8x10xf32>
    %352 = vector.extract_strided_slice %347 {offsets = [0, 30], sizes = [8, 10], strides = [1, 1]} : vector<8x40xf32> to vector<8x10xf32>
    %353 = arith.mulf %351, %317 : vector<8x10xf32>
    %354 = arith.mulf %350, %349 : vector<8x10xf32>
    %355 = arith.addf %353, %354 : vector<8x10xf32>
    %356 = math.tanh %355 : vector<8x10xf32>
    %357 = arith.mulf %352, %356 : vector<8x10xf32>
    %cst_75 = arith.constant dense<0.000000e+00> : vector<8x40xf32>
    %358 = tpu.matmul %357, %2, %cst_75 {dimension_numbers = #tpu.dot_dimension_numbers<[1], [0], [0], [1], [0, 0, 1, 1], [], []>} : vector<8x10xf32>, vector<10x40xf32>, vector<8x40xf32> -> vector<8x40xf32>
    %cst_76 = arith.constant dense<0.000000e+00> : vector<8x40xf32>
    %359 = tpu.matmul %338, %0, %cst_76 {dimension_numbers = #tpu.dot_dimension_numbers<[1], [0], [0], [1], [0, 0, 1, 1], [], []>} : vector<8x10xf32>, vector<10x40xf32>, vector<8x40xf32> -> vector<8x40xf32>
    %c72_77 = arith.constant 72 : index
    %c0_78 = arith.constant 0 : index
    %360 = vector.load %arg3[%c72_77, %c0_78] : memref<160x40xf32, #tpu.memory_space<vmem>>, vector<8x40xf32>
    %361 = arith.addf %359, %360 : vector<8x40xf32>
    %362 = arith.negf %361 : vector<8x40xf32>
    %363 = math.exp %362 : vector<8x40xf32>
    %cst_79 = arith.constant 1.000000e+00 : f32
    %364 = vector.broadcast %cst_79 : f32 to vector<8x40xf32>
    %365 = arith.addf %364, %363 : vector<8x40xf32>
    %366 = arith.divf %364, %365 : vector<8x40xf32>
    %367 = vector.extract_strided_slice %361 {offsets = [0, 20], sizes = [8, 10], strides = [1, 1]} : vector<8x40xf32> to vector<8x10xf32>
    %368 = math.tanh %367 : vector<8x10xf32>
    %369 = vector.extract_strided_slice %366 {offsets = [0, 0], sizes = [8, 10], strides = [1, 1]} : vector<8x40xf32> to vector<8x10xf32>
    %370 = vector.extract_strided_slice %366 {offsets = [0, 10], sizes = [8, 10], strides = [1, 1]} : vector<8x40xf32> to vector<8x10xf32>
    %371 = vector.extract_strided_slice %366 {offsets = [0, 30], sizes = [8, 10], strides = [1, 1]} : vector<8x40xf32> to vector<8x10xf32>
    %372 = arith.mulf %370, %336 : vector<8x10xf32>
    %373 = arith.mulf %369, %368 : vector<8x10xf32>
    %374 = arith.addf %372, %373 : vector<8x10xf32>
    %375 = math.tanh %374 : vector<8x10xf32>
    %376 = arith.mulf %371, %375 : vector<8x10xf32>
    %cst_80 = arith.constant dense<0.000000e+00> : vector<8x40xf32>
    %377 = tpu.matmul %376, %1, %cst_80 {dimension_numbers = #tpu.dot_dimension_numbers<[1], [0], [0], [1], [0, 0, 1, 1], [], []>} : vector<8x10xf32>, vector<10x40xf32>, vector<8x40xf32> -> vector<8x40xf32>
    %378 = arith.addf %358, %377 : vector<8x40xf32>
    %379 = vector.broadcast %5 : vector<1x40xf32> to vector<8x40xf32>
    %380 = arith.addf %378, %379 : vector<8x40xf32>
    %381 = arith.negf %380 : vector<8x40xf32>
    %382 = math.exp %381 : vector<8x40xf32>
    %cst_81 = arith.constant 1.000000e+00 : f32
    %383 = vector.broadcast %cst_81 : f32 to vector<8x40xf32>
    %384 = arith.addf %383, %382 : vector<8x40xf32>
    %385 = arith.divf %383, %384 : vector<8x40xf32>
    %386 = vector.extract_strided_slice %380 {offsets = [0, 20], sizes = [8, 10], strides = [1, 1]} : vector<8x40xf32> to vector<8x10xf32>
    %387 = math.tanh %386 : vector<8x10xf32>
    %388 = vector.extract_strided_slice %385 {offsets = [0, 0], sizes = [8, 10], strides = [1, 1]} : vector<8x40xf32> to vector<8x10xf32>
    %389 = vector.extract_strided_slice %385 {offsets = [0, 10], sizes = [8, 10], strides = [1, 1]} : vector<8x40xf32> to vector<8x10xf32>
    %390 = vector.extract_strided_slice %385 {offsets = [0, 30], sizes = [8, 10], strides = [1, 1]} : vector<8x40xf32> to vector<8x10xf32>
    %391 = arith.mulf %389, %355 : vector<8x10xf32>
    %392 = arith.mulf %388, %387 : vector<8x10xf32>
    %393 = arith.addf %391, %392 : vector<8x10xf32>
    %394 = math.tanh %393 : vector<8x10xf32>
    %395 = arith.mulf %390, %394 : vector<8x10xf32>
    %cst_82 = arith.constant dense<0.000000e+00> : vector<8x40xf32>
    %396 = tpu.matmul %395, %2, %cst_82 {dimension_numbers = #tpu.dot_dimension_numbers<[1], [0], [0], [1], [0, 0, 1, 1], [], []>} : vector<8x10xf32>, vector<10x40xf32>, vector<8x40xf32> -> vector<8x40xf32>
    %cst_83 = arith.constant dense<0.000000e+00> : vector<8x40xf32>
    %397 = tpu.matmul %376, %0, %cst_83 {dimension_numbers = #tpu.dot_dimension_numbers<[1], [0], [0], [1], [0, 0, 1, 1], [], []>} : vector<8x10xf32>, vector<10x40xf32>, vector<8x40xf32> -> vector<8x40xf32>
    %c80 = arith.constant 80 : index
    %c0_84 = arith.constant 0 : index
    %398 = vector.load %arg3[%c80, %c0_84] : memref<160x40xf32, #tpu.memory_space<vmem>>, vector<8x40xf32>
    %399 = arith.addf %397, %398 : vector<8x40xf32>
    %400 = arith.negf %399 : vector<8x40xf32>
    %401 = math.exp %400 : vector<8x40xf32>
    %cst_85 = arith.constant 1.000000e+00 : f32
    %402 = vector.broadcast %cst_85 : f32 to vector<8x40xf32>
    %403 = arith.addf %402, %401 : vector<8x40xf32>
    %404 = arith.divf %402, %403 : vector<8x40xf32>
    %405 = vector.extract_strided_slice %399 {offsets = [0, 20], sizes = [8, 10], strides = [1, 1]} : vector<8x40xf32> to vector<8x10xf32>
    %406 = math.tanh %405 : vector<8x10xf32>
    %407 = vector.extract_strided_slice %404 {offsets = [0, 0], sizes = [8, 10], strides = [1, 1]} : vector<8x40xf32> to vector<8x10xf32>
    %408 = vector.extract_strided_slice %404 {offsets = [0, 10], sizes = [8, 10], strides = [1, 1]} : vector<8x40xf32> to vector<8x10xf32>
    %409 = vector.extract_strided_slice %404 {offsets = [0, 30], sizes = [8, 10], strides = [1, 1]} : vector<8x40xf32> to vector<8x10xf32>
    %410 = arith.mulf %408, %374 : vector<8x10xf32>
    %411 = arith.mulf %407, %406 : vector<8x10xf32>
    %412 = arith.addf %410, %411 : vector<8x10xf32>
    %413 = math.tanh %412 : vector<8x10xf32>
    %414 = arith.mulf %409, %413 : vector<8x10xf32>
    %cst_86 = arith.constant dense<0.000000e+00> : vector<8x40xf32>
    %415 = tpu.matmul %414, %1, %cst_86 {dimension_numbers = #tpu.dot_dimension_numbers<[1], [0], [0], [1], [0, 0, 1, 1], [], []>} : vector<8x10xf32>, vector<10x40xf32>, vector<8x40xf32> -> vector<8x40xf32>
    %416 = arith.addf %396, %415 : vector<8x40xf32>
    %417 = vector.broadcast %5 : vector<1x40xf32> to vector<8x40xf32>
    %418 = arith.addf %416, %417 : vector<8x40xf32>
    %419 = arith.negf %418 : vector<8x40xf32>
    %420 = math.exp %419 : vector<8x40xf32>
    %cst_87 = arith.constant 1.000000e+00 : f32
    %421 = vector.broadcast %cst_87 : f32 to vector<8x40xf32>
    %422 = arith.addf %421, %420 : vector<8x40xf32>
    %423 = arith.divf %421, %422 : vector<8x40xf32>
    %424 = vector.extract_strided_slice %418 {offsets = [0, 20], sizes = [8, 10], strides = [1, 1]} : vector<8x40xf32> to vector<8x10xf32>
    %425 = math.tanh %424 : vector<8x10xf32>
    %426 = vector.extract_strided_slice %423 {offsets = [0, 0], sizes = [8, 10], strides = [1, 1]} : vector<8x40xf32> to vector<8x10xf32>
    %427 = vector.extract_strided_slice %423 {offsets = [0, 10], sizes = [8, 10], strides = [1, 1]} : vector<8x40xf32> to vector<8x10xf32>
    %428 = vector.extract_strided_slice %423 {offsets = [0, 30], sizes = [8, 10], strides = [1, 1]} : vector<8x40xf32> to vector<8x10xf32>
    %429 = arith.mulf %427, %393 : vector<8x10xf32>
    %430 = arith.mulf %426, %425 : vector<8x10xf32>
    %431 = arith.addf %429, %430 : vector<8x10xf32>
    %432 = math.tanh %431 : vector<8x10xf32>
    %433 = arith.mulf %428, %432 : vector<8x10xf32>
    %cst_88 = arith.constant dense<0.000000e+00> : vector<8x40xf32>
    %434 = tpu.matmul %433, %2, %cst_88 {dimension_numbers = #tpu.dot_dimension_numbers<[1], [0], [0], [1], [0, 0, 1, 1], [], []>} : vector<8x10xf32>, vector<10x40xf32>, vector<8x40xf32> -> vector<8x40xf32>
    %cst_89 = arith.constant dense<0.000000e+00> : vector<8x40xf32>
    %435 = tpu.matmul %414, %0, %cst_89 {dimension_numbers = #tpu.dot_dimension_numbers<[1], [0], [0], [1], [0, 0, 1, 1], [], []>} : vector<8x10xf32>, vector<10x40xf32>, vector<8x40xf32> -> vector<8x40xf32>
    %c88 = arith.constant 88 : index
    %c0_90 = arith.constant 0 : index
    %436 = vector.load %arg3[%c88, %c0_90] : memref<160x40xf32, #tpu.memory_space<vmem>>, vector<8x40xf32>
    %437 = arith.addf %435, %436 : vector<8x40xf32>
    %438 = arith.negf %437 : vector<8x40xf32>
    %439 = math.exp %438 : vector<8x40xf32>
    %cst_91 = arith.constant 1.000000e+00 : f32
    %440 = vector.broadcast %cst_91 : f32 to vector<8x40xf32>
    %441 = arith.addf %440, %439 : vector<8x40xf32>
    %442 = arith.divf %440, %441 : vector<8x40xf32>
    %443 = vector.extract_strided_slice %437 {offsets = [0, 20], sizes = [8, 10], strides = [1, 1]} : vector<8x40xf32> to vector<8x10xf32>
    %444 = math.tanh %443 : vector<8x10xf32>
    %445 = vector.extract_strided_slice %442 {offsets = [0, 0], sizes = [8, 10], strides = [1, 1]} : vector<8x40xf32> to vector<8x10xf32>
    %446 = vector.extract_strided_slice %442 {offsets = [0, 10], sizes = [8, 10], strides = [1, 1]} : vector<8x40xf32> to vector<8x10xf32>
    %447 = vector.extract_strided_slice %442 {offsets = [0, 30], sizes = [8, 10], strides = [1, 1]} : vector<8x40xf32> to vector<8x10xf32>
    %448 = arith.mulf %446, %412 : vector<8x10xf32>
    %449 = arith.mulf %445, %444 : vector<8x10xf32>
    %450 = arith.addf %448, %449 : vector<8x10xf32>
    %451 = math.tanh %450 : vector<8x10xf32>
    %452 = arith.mulf %447, %451 : vector<8x10xf32>
    %cst_92 = arith.constant dense<0.000000e+00> : vector<8x40xf32>
    %453 = tpu.matmul %452, %1, %cst_92 {dimension_numbers = #tpu.dot_dimension_numbers<[1], [0], [0], [1], [0, 0, 1, 1], [], []>} : vector<8x10xf32>, vector<10x40xf32>, vector<8x40xf32> -> vector<8x40xf32>
    %454 = arith.addf %434, %453 : vector<8x40xf32>
    %455 = vector.broadcast %5 : vector<1x40xf32> to vector<8x40xf32>
    %456 = arith.addf %454, %455 : vector<8x40xf32>
    %457 = arith.negf %456 : vector<8x40xf32>
    %458 = math.exp %457 : vector<8x40xf32>
    %cst_93 = arith.constant 1.000000e+00 : f32
    %459 = vector.broadcast %cst_93 : f32 to vector<8x40xf32>
    %460 = arith.addf %459, %458 : vector<8x40xf32>
    %461 = arith.divf %459, %460 : vector<8x40xf32>
    %462 = vector.extract_strided_slice %456 {offsets = [0, 20], sizes = [8, 10], strides = [1, 1]} : vector<8x40xf32> to vector<8x10xf32>
    %463 = math.tanh %462 : vector<8x10xf32>
    %464 = vector.extract_strided_slice %461 {offsets = [0, 0], sizes = [8, 10], strides = [1, 1]} : vector<8x40xf32> to vector<8x10xf32>
    %465 = vector.extract_strided_slice %461 {offsets = [0, 10], sizes = [8, 10], strides = [1, 1]} : vector<8x40xf32> to vector<8x10xf32>
    %466 = vector.extract_strided_slice %461 {offsets = [0, 30], sizes = [8, 10], strides = [1, 1]} : vector<8x40xf32> to vector<8x10xf32>
    %467 = arith.mulf %465, %431 : vector<8x10xf32>
    %468 = arith.mulf %464, %463 : vector<8x10xf32>
    %469 = arith.addf %467, %468 : vector<8x10xf32>
    %470 = math.tanh %469 : vector<8x10xf32>
    %471 = arith.mulf %466, %470 : vector<8x10xf32>
    %cst_94 = arith.constant dense<0.000000e+00> : vector<8x40xf32>
    %472 = tpu.matmul %471, %2, %cst_94 {dimension_numbers = #tpu.dot_dimension_numbers<[1], [0], [0], [1], [0, 0, 1, 1], [], []>} : vector<8x10xf32>, vector<10x40xf32>, vector<8x40xf32> -> vector<8x40xf32>
    %cst_95 = arith.constant dense<0.000000e+00> : vector<8x40xf32>
    %473 = tpu.matmul %452, %0, %cst_95 {dimension_numbers = #tpu.dot_dimension_numbers<[1], [0], [0], [1], [0, 0, 1, 1], [], []>} : vector<8x10xf32>, vector<10x40xf32>, vector<8x40xf32> -> vector<8x40xf32>
    %c96 = arith.constant 96 : index
    %c0_96 = arith.constant 0 : index
    %474 = vector.load %arg3[%c96, %c0_96] : memref<160x40xf32, #tpu.memory_space<vmem>>, vector<8x40xf32>
    %475 = arith.addf %473, %474 : vector<8x40xf32>
    %476 = arith.negf %475 : vector<8x40xf32>
    %477 = math.exp %476 : vector<8x40xf32>
    %cst_97 = arith.constant 1.000000e+00 : f32
    %478 = vector.broadcast %cst_97 : f32 to vector<8x40xf32>
    %479 = arith.addf %478, %477 : vector<8x40xf32>
    %480 = arith.divf %478, %479 : vector<8x40xf32>
    %481 = vector.extract_strided_slice %475 {offsets = [0, 20], sizes = [8, 10], strides = [1, 1]} : vector<8x40xf32> to vector<8x10xf32>
    %482 = math.tanh %481 : vector<8x10xf32>
    %483 = vector.extract_strided_slice %480 {offsets = [0, 0], sizes = [8, 10], strides = [1, 1]} : vector<8x40xf32> to vector<8x10xf32>
    %484 = vector.extract_strided_slice %480 {offsets = [0, 10], sizes = [8, 10], strides = [1, 1]} : vector<8x40xf32> to vector<8x10xf32>
    %485 = vector.extract_strided_slice %480 {offsets = [0, 30], sizes = [8, 10], strides = [1, 1]} : vector<8x40xf32> to vector<8x10xf32>
    %486 = arith.mulf %484, %450 : vector<8x10xf32>
    %487 = arith.mulf %483, %482 : vector<8x10xf32>
    %488 = arith.addf %486, %487 : vector<8x10xf32>
    %489 = math.tanh %488 : vector<8x10xf32>
    %490 = arith.mulf %485, %489 : vector<8x10xf32>
    %cst_98 = arith.constant dense<0.000000e+00> : vector<8x40xf32>
    %491 = tpu.matmul %490, %1, %cst_98 {dimension_numbers = #tpu.dot_dimension_numbers<[1], [0], [0], [1], [0, 0, 1, 1], [], []>} : vector<8x10xf32>, vector<10x40xf32>, vector<8x40xf32> -> vector<8x40xf32>
    %492 = arith.addf %472, %491 : vector<8x40xf32>
    %493 = vector.broadcast %5 : vector<1x40xf32> to vector<8x40xf32>
    %494 = arith.addf %492, %493 : vector<8x40xf32>
    %495 = arith.negf %494 : vector<8x40xf32>
    %496 = math.exp %495 : vector<8x40xf32>
    %cst_99 = arith.constant 1.000000e+00 : f32
    %497 = vector.broadcast %cst_99 : f32 to vector<8x40xf32>
    %498 = arith.addf %497, %496 : vector<8x40xf32>
    %499 = arith.divf %497, %498 : vector<8x40xf32>
    %500 = vector.extract_strided_slice %494 {offsets = [0, 20], sizes = [8, 10], strides = [1, 1]} : vector<8x40xf32> to vector<8x10xf32>
    %501 = math.tanh %500 : vector<8x10xf32>
    %502 = vector.extract_strided_slice %499 {offsets = [0, 0], sizes = [8, 10], strides = [1, 1]} : vector<8x40xf32> to vector<8x10xf32>
    %503 = vector.extract_strided_slice %499 {offsets = [0, 10], sizes = [8, 10], strides = [1, 1]} : vector<8x40xf32> to vector<8x10xf32>
    %504 = vector.extract_strided_slice %499 {offsets = [0, 30], sizes = [8, 10], strides = [1, 1]} : vector<8x40xf32> to vector<8x10xf32>
    %505 = arith.mulf %503, %469 : vector<8x10xf32>
    %506 = arith.mulf %502, %501 : vector<8x10xf32>
    %507 = arith.addf %505, %506 : vector<8x10xf32>
    %508 = math.tanh %507 : vector<8x10xf32>
    %509 = arith.mulf %504, %508 : vector<8x10xf32>
    %cst_100 = arith.constant dense<0.000000e+00> : vector<8x40xf32>
    %510 = tpu.matmul %509, %2, %cst_100 {dimension_numbers = #tpu.dot_dimension_numbers<[1], [0], [0], [1], [0, 0, 1, 1], [], []>} : vector<8x10xf32>, vector<10x40xf32>, vector<8x40xf32> -> vector<8x40xf32>
    %cst_101 = arith.constant dense<0.000000e+00> : vector<8x40xf32>
    %511 = tpu.matmul %490, %0, %cst_101 {dimension_numbers = #tpu.dot_dimension_numbers<[1], [0], [0], [1], [0, 0, 1, 1], [], []>} : vector<8x10xf32>, vector<10x40xf32>, vector<8x40xf32> -> vector<8x40xf32>
    %c104 = arith.constant 104 : index
    %c0_102 = arith.constant 0 : index
    %512 = vector.load %arg3[%c104, %c0_102] : memref<160x40xf32, #tpu.memory_space<vmem>>, vector<8x40xf32>
    %513 = arith.addf %511, %512 : vector<8x40xf32>
    %514 = arith.negf %513 : vector<8x40xf32>
    %515 = math.exp %514 : vector<8x40xf32>
    %cst_103 = arith.constant 1.000000e+00 : f32
    %516 = vector.broadcast %cst_103 : f32 to vector<8x40xf32>
    %517 = arith.addf %516, %515 : vector<8x40xf32>
    %518 = arith.divf %516, %517 : vector<8x40xf32>
    %519 = vector.extract_strided_slice %513 {offsets = [0, 20], sizes = [8, 10], strides = [1, 1]} : vector<8x40xf32> to vector<8x10xf32>
    %520 = math.tanh %519 : vector<8x10xf32>
    %521 = vector.extract_strided_slice %518 {offsets = [0, 0], sizes = [8, 10], strides = [1, 1]} : vector<8x40xf32> to vector<8x10xf32>
    %522 = vector.extract_strided_slice %518 {offsets = [0, 10], sizes = [8, 10], strides = [1, 1]} : vector<8x40xf32> to vector<8x10xf32>
    %523 = vector.extract_strided_slice %518 {offsets = [0, 30], sizes = [8, 10], strides = [1, 1]} : vector<8x40xf32> to vector<8x10xf32>
    %524 = arith.mulf %522, %488 : vector<8x10xf32>
    %525 = arith.mulf %521, %520 : vector<8x10xf32>
    %526 = arith.addf %524, %525 : vector<8x10xf32>
    %527 = math.tanh %526 : vector<8x10xf32>
    %528 = arith.mulf %523, %527 : vector<8x10xf32>
    %cst_104 = arith.constant dense<0.000000e+00> : vector<8x40xf32>
    %529 = tpu.matmul %528, %1, %cst_104 {dimension_numbers = #tpu.dot_dimension_numbers<[1], [0], [0], [1], [0, 0, 1, 1], [], []>} : vector<8x10xf32>, vector<10x40xf32>, vector<8x40xf32> -> vector<8x40xf32>
    %530 = arith.addf %510, %529 : vector<8x40xf32>
    %531 = vector.broadcast %5 : vector<1x40xf32> to vector<8x40xf32>
    %532 = arith.addf %530, %531 : vector<8x40xf32>
    %533 = arith.negf %532 : vector<8x40xf32>
    %534 = math.exp %533 : vector<8x40xf32>
    %cst_105 = arith.constant 1.000000e+00 : f32
    %535 = vector.broadcast %cst_105 : f32 to vector<8x40xf32>
    %536 = arith.addf %535, %534 : vector<8x40xf32>
    %537 = arith.divf %535, %536 : vector<8x40xf32>
    %538 = vector.extract_strided_slice %532 {offsets = [0, 20], sizes = [8, 10], strides = [1, 1]} : vector<8x40xf32> to vector<8x10xf32>
    %539 = math.tanh %538 : vector<8x10xf32>
    %540 = vector.extract_strided_slice %537 {offsets = [0, 0], sizes = [8, 10], strides = [1, 1]} : vector<8x40xf32> to vector<8x10xf32>
    %541 = vector.extract_strided_slice %537 {offsets = [0, 10], sizes = [8, 10], strides = [1, 1]} : vector<8x40xf32> to vector<8x10xf32>
    %542 = vector.extract_strided_slice %537 {offsets = [0, 30], sizes = [8, 10], strides = [1, 1]} : vector<8x40xf32> to vector<8x10xf32>
    %543 = arith.mulf %541, %507 : vector<8x10xf32>
    %544 = arith.mulf %540, %539 : vector<8x10xf32>
    %545 = arith.addf %543, %544 : vector<8x10xf32>
    %546 = math.tanh %545 : vector<8x10xf32>
    %547 = arith.mulf %542, %546 : vector<8x10xf32>
    %cst_106 = arith.constant dense<0.000000e+00> : vector<8x40xf32>
    %548 = tpu.matmul %547, %2, %cst_106 {dimension_numbers = #tpu.dot_dimension_numbers<[1], [0], [0], [1], [0, 0, 1, 1], [], []>} : vector<8x10xf32>, vector<10x40xf32>, vector<8x40xf32> -> vector<8x40xf32>
    %cst_107 = arith.constant dense<0.000000e+00> : vector<8x40xf32>
    %549 = tpu.matmul %528, %0, %cst_107 {dimension_numbers = #tpu.dot_dimension_numbers<[1], [0], [0], [1], [0, 0, 1, 1], [], []>} : vector<8x10xf32>, vector<10x40xf32>, vector<8x40xf32> -> vector<8x40xf32>
    %c112 = arith.constant 112 : index
    %c0_108 = arith.constant 0 : index
    %550 = vector.load %arg3[%c112, %c0_108] : memref<160x40xf32, #tpu.memory_space<vmem>>, vector<8x40xf32>
    %551 = arith.addf %549, %550 : vector<8x40xf32>
    %552 = arith.negf %551 : vector<8x40xf32>
    %553 = math.exp %552 : vector<8x40xf32>
    %cst_109 = arith.constant 1.000000e+00 : f32
    %554 = vector.broadcast %cst_109 : f32 to vector<8x40xf32>
    %555 = arith.addf %554, %553 : vector<8x40xf32>
    %556 = arith.divf %554, %555 : vector<8x40xf32>
    %557 = vector.extract_strided_slice %551 {offsets = [0, 20], sizes = [8, 10], strides = [1, 1]} : vector<8x40xf32> to vector<8x10xf32>
    %558 = math.tanh %557 : vector<8x10xf32>
    %559 = vector.extract_strided_slice %556 {offsets = [0, 0], sizes = [8, 10], strides = [1, 1]} : vector<8x40xf32> to vector<8x10xf32>
    %560 = vector.extract_strided_slice %556 {offsets = [0, 10], sizes = [8, 10], strides = [1, 1]} : vector<8x40xf32> to vector<8x10xf32>
    %561 = vector.extract_strided_slice %556 {offsets = [0, 30], sizes = [8, 10], strides = [1, 1]} : vector<8x40xf32> to vector<8x10xf32>
    %562 = arith.mulf %560, %526 : vector<8x10xf32>
    %563 = arith.mulf %559, %558 : vector<8x10xf32>
    %564 = arith.addf %562, %563 : vector<8x10xf32>
    %565 = math.tanh %564 : vector<8x10xf32>
    %566 = arith.mulf %561, %565 : vector<8x10xf32>
    %cst_110 = arith.constant dense<0.000000e+00> : vector<8x40xf32>
    %567 = tpu.matmul %566, %1, %cst_110 {dimension_numbers = #tpu.dot_dimension_numbers<[1], [0], [0], [1], [0, 0, 1, 1], [], []>} : vector<8x10xf32>, vector<10x40xf32>, vector<8x40xf32> -> vector<8x40xf32>
    %568 = arith.addf %548, %567 : vector<8x40xf32>
    %569 = vector.broadcast %5 : vector<1x40xf32> to vector<8x40xf32>
    %570 = arith.addf %568, %569 : vector<8x40xf32>
    %571 = arith.negf %570 : vector<8x40xf32>
    %572 = math.exp %571 : vector<8x40xf32>
    %cst_111 = arith.constant 1.000000e+00 : f32
    %573 = vector.broadcast %cst_111 : f32 to vector<8x40xf32>
    %574 = arith.addf %573, %572 : vector<8x40xf32>
    %575 = arith.divf %573, %574 : vector<8x40xf32>
    %576 = vector.extract_strided_slice %570 {offsets = [0, 20], sizes = [8, 10], strides = [1, 1]} : vector<8x40xf32> to vector<8x10xf32>
    %577 = math.tanh %576 : vector<8x10xf32>
    %578 = vector.extract_strided_slice %575 {offsets = [0, 0], sizes = [8, 10], strides = [1, 1]} : vector<8x40xf32> to vector<8x10xf32>
    %579 = vector.extract_strided_slice %575 {offsets = [0, 10], sizes = [8, 10], strides = [1, 1]} : vector<8x40xf32> to vector<8x10xf32>
    %580 = vector.extract_strided_slice %575 {offsets = [0, 30], sizes = [8, 10], strides = [1, 1]} : vector<8x40xf32> to vector<8x10xf32>
    %581 = arith.mulf %579, %545 : vector<8x10xf32>
    %582 = arith.mulf %578, %577 : vector<8x10xf32>
    %583 = arith.addf %581, %582 : vector<8x10xf32>
    %584 = math.tanh %583 : vector<8x10xf32>
    %585 = arith.mulf %580, %584 : vector<8x10xf32>
    %cst_112 = arith.constant dense<0.000000e+00> : vector<8x40xf32>
    %586 = tpu.matmul %585, %2, %cst_112 {dimension_numbers = #tpu.dot_dimension_numbers<[1], [0], [0], [1], [0, 0, 1, 1], [], []>} : vector<8x10xf32>, vector<10x40xf32>, vector<8x40xf32> -> vector<8x40xf32>
    %cst_113 = arith.constant dense<0.000000e+00> : vector<8x40xf32>
    %587 = tpu.matmul %566, %0, %cst_113 {dimension_numbers = #tpu.dot_dimension_numbers<[1], [0], [0], [1], [0, 0, 1, 1], [], []>} : vector<8x10xf32>, vector<10x40xf32>, vector<8x40xf32> -> vector<8x40xf32>
    %c120 = arith.constant 120 : index
    %c0_114 = arith.constant 0 : index
    %588 = vector.load %arg3[%c120, %c0_114] : memref<160x40xf32, #tpu.memory_space<vmem>>, vector<8x40xf32>
    %589 = arith.addf %587, %588 : vector<8x40xf32>
    %590 = arith.negf %589 : vector<8x40xf32>
    %591 = math.exp %590 : vector<8x40xf32>
    %cst_115 = arith.constant 1.000000e+00 : f32
    %592 = vector.broadcast %cst_115 : f32 to vector<8x40xf32>
    %593 = arith.addf %592, %591 : vector<8x40xf32>
    %594 = arith.divf %592, %593 : vector<8x40xf32>
    %595 = vector.extract_strided_slice %589 {offsets = [0, 20], sizes = [8, 10], strides = [1, 1]} : vector<8x40xf32> to vector<8x10xf32>
    %596 = math.tanh %595 : vector<8x10xf32>
    %597 = vector.extract_strided_slice %594 {offsets = [0, 0], sizes = [8, 10], strides = [1, 1]} : vector<8x40xf32> to vector<8x10xf32>
    %598 = vector.extract_strided_slice %594 {offsets = [0, 10], sizes = [8, 10], strides = [1, 1]} : vector<8x40xf32> to vector<8x10xf32>
    %599 = vector.extract_strided_slice %594 {offsets = [0, 30], sizes = [8, 10], strides = [1, 1]} : vector<8x40xf32> to vector<8x10xf32>
    %600 = arith.mulf %598, %564 : vector<8x10xf32>
    %601 = arith.mulf %597, %596 : vector<8x10xf32>
    %602 = arith.addf %600, %601 : vector<8x10xf32>
    %603 = math.tanh %602 : vector<8x10xf32>
    %604 = arith.mulf %599, %603 : vector<8x10xf32>
    %cst_116 = arith.constant dense<0.000000e+00> : vector<8x40xf32>
    %605 = tpu.matmul %604, %1, %cst_116 {dimension_numbers = #tpu.dot_dimension_numbers<[1], [0], [0], [1], [0, 0, 1, 1], [], []>} : vector<8x10xf32>, vector<10x40xf32>, vector<8x40xf32> -> vector<8x40xf32>
    %606 = arith.addf %586, %605 : vector<8x40xf32>
    %607 = vector.broadcast %5 : vector<1x40xf32> to vector<8x40xf32>
    %608 = arith.addf %606, %607 : vector<8x40xf32>
    %609 = arith.negf %608 : vector<8x40xf32>
    %610 = math.exp %609 : vector<8x40xf32>
    %cst_117 = arith.constant 1.000000e+00 : f32
    %611 = vector.broadcast %cst_117 : f32 to vector<8x40xf32>
    %612 = arith.addf %611, %610 : vector<8x40xf32>
    %613 = arith.divf %611, %612 : vector<8x40xf32>
    %614 = vector.extract_strided_slice %608 {offsets = [0, 20], sizes = [8, 10], strides = [1, 1]} : vector<8x40xf32> to vector<8x10xf32>
    %615 = math.tanh %614 : vector<8x10xf32>
    %616 = vector.extract_strided_slice %613 {offsets = [0, 0], sizes = [8, 10], strides = [1, 1]} : vector<8x40xf32> to vector<8x10xf32>
    %617 = vector.extract_strided_slice %613 {offsets = [0, 10], sizes = [8, 10], strides = [1, 1]} : vector<8x40xf32> to vector<8x10xf32>
    %618 = vector.extract_strided_slice %613 {offsets = [0, 30], sizes = [8, 10], strides = [1, 1]} : vector<8x40xf32> to vector<8x10xf32>
    %619 = arith.mulf %617, %583 : vector<8x10xf32>
    %620 = arith.mulf %616, %615 : vector<8x10xf32>
    %621 = arith.addf %619, %620 : vector<8x10xf32>
    %622 = math.tanh %621 : vector<8x10xf32>
    %623 = arith.mulf %618, %622 : vector<8x10xf32>
    %cst_118 = arith.constant dense<0.000000e+00> : vector<8x40xf32>
    %624 = tpu.matmul %623, %2, %cst_118 {dimension_numbers = #tpu.dot_dimension_numbers<[1], [0], [0], [1], [0, 0, 1, 1], [], []>} : vector<8x10xf32>, vector<10x40xf32>, vector<8x40xf32> -> vector<8x40xf32>
    %cst_119 = arith.constant dense<0.000000e+00> : vector<8x40xf32>
    %625 = tpu.matmul %604, %0, %cst_119 {dimension_numbers = #tpu.dot_dimension_numbers<[1], [0], [0], [1], [0, 0, 1, 1], [], []>} : vector<8x10xf32>, vector<10x40xf32>, vector<8x40xf32> -> vector<8x40xf32>
    %c128 = arith.constant 128 : index
    %c0_120 = arith.constant 0 : index
    %626 = vector.load %arg3[%c128, %c0_120] : memref<160x40xf32, #tpu.memory_space<vmem>>, vector<8x40xf32>
    %627 = arith.addf %625, %626 : vector<8x40xf32>
    %628 = arith.negf %627 : vector<8x40xf32>
    %629 = math.exp %628 : vector<8x40xf32>
    %cst_121 = arith.constant 1.000000e+00 : f32
    %630 = vector.broadcast %cst_121 : f32 to vector<8x40xf32>
    %631 = arith.addf %630, %629 : vector<8x40xf32>
    %632 = arith.divf %630, %631 : vector<8x40xf32>
    %633 = vector.extract_strided_slice %627 {offsets = [0, 20], sizes = [8, 10], strides = [1, 1]} : vector<8x40xf32> to vector<8x10xf32>
    %634 = math.tanh %633 : vector<8x10xf32>
    %635 = vector.extract_strided_slice %632 {offsets = [0, 0], sizes = [8, 10], strides = [1, 1]} : vector<8x40xf32> to vector<8x10xf32>
    %636 = vector.extract_strided_slice %632 {offsets = [0, 10], sizes = [8, 10], strides = [1, 1]} : vector<8x40xf32> to vector<8x10xf32>
    %637 = vector.extract_strided_slice %632 {offsets = [0, 30], sizes = [8, 10], strides = [1, 1]} : vector<8x40xf32> to vector<8x10xf32>
    %638 = arith.mulf %636, %602 : vector<8x10xf32>
    %639 = arith.mulf %635, %634 : vector<8x10xf32>
    %640 = arith.addf %638, %639 : vector<8x10xf32>
    %641 = math.tanh %640 : vector<8x10xf32>
    %642 = arith.mulf %637, %641 : vector<8x10xf32>
    %cst_122 = arith.constant dense<0.000000e+00> : vector<8x40xf32>
    %643 = tpu.matmul %642, %1, %cst_122 {dimension_numbers = #tpu.dot_dimension_numbers<[1], [0], [0], [1], [0, 0, 1, 1], [], []>} : vector<8x10xf32>, vector<10x40xf32>, vector<8x40xf32> -> vector<8x40xf32>
    %644 = arith.addf %624, %643 : vector<8x40xf32>
    %645 = vector.broadcast %5 : vector<1x40xf32> to vector<8x40xf32>
    %646 = arith.addf %644, %645 : vector<8x40xf32>
    %647 = arith.negf %646 : vector<8x40xf32>
    %648 = math.exp %647 : vector<8x40xf32>
    %cst_123 = arith.constant 1.000000e+00 : f32
    %649 = vector.broadcast %cst_123 : f32 to vector<8x40xf32>
    %650 = arith.addf %649, %648 : vector<8x40xf32>
    %651 = arith.divf %649, %650 : vector<8x40xf32>
    %652 = vector.extract_strided_slice %646 {offsets = [0, 20], sizes = [8, 10], strides = [1, 1]} : vector<8x40xf32> to vector<8x10xf32>
    %653 = math.tanh %652 : vector<8x10xf32>
    %654 = vector.extract_strided_slice %651 {offsets = [0, 0], sizes = [8, 10], strides = [1, 1]} : vector<8x40xf32> to vector<8x10xf32>
    %655 = vector.extract_strided_slice %651 {offsets = [0, 10], sizes = [8, 10], strides = [1, 1]} : vector<8x40xf32> to vector<8x10xf32>
    %656 = vector.extract_strided_slice %651 {offsets = [0, 30], sizes = [8, 10], strides = [1, 1]} : vector<8x40xf32> to vector<8x10xf32>
    %657 = arith.mulf %655, %621 : vector<8x10xf32>
    %658 = arith.mulf %654, %653 : vector<8x10xf32>
    %659 = arith.addf %657, %658 : vector<8x10xf32>
    %660 = math.tanh %659 : vector<8x10xf32>
    %661 = arith.mulf %656, %660 : vector<8x10xf32>
    %cst_124 = arith.constant dense<0.000000e+00> : vector<8x40xf32>
    %662 = tpu.matmul %661, %2, %cst_124 {dimension_numbers = #tpu.dot_dimension_numbers<[1], [0], [0], [1], [0, 0, 1, 1], [], []>} : vector<8x10xf32>, vector<10x40xf32>, vector<8x40xf32> -> vector<8x40xf32>
    %cst_125 = arith.constant dense<0.000000e+00> : vector<8x40xf32>
    %663 = tpu.matmul %642, %0, %cst_125 {dimension_numbers = #tpu.dot_dimension_numbers<[1], [0], [0], [1], [0, 0, 1, 1], [], []>} : vector<8x10xf32>, vector<10x40xf32>, vector<8x40xf32> -> vector<8x40xf32>
    %c136 = arith.constant 136 : index
    %c0_126 = arith.constant 0 : index
    %664 = vector.load %arg3[%c136, %c0_126] : memref<160x40xf32, #tpu.memory_space<vmem>>, vector<8x40xf32>
    %665 = arith.addf %663, %664 : vector<8x40xf32>
    %666 = arith.negf %665 : vector<8x40xf32>
    %667 = math.exp %666 : vector<8x40xf32>
    %cst_127 = arith.constant 1.000000e+00 : f32
    %668 = vector.broadcast %cst_127 : f32 to vector<8x40xf32>
    %669 = arith.addf %668, %667 : vector<8x40xf32>
    %670 = arith.divf %668, %669 : vector<8x40xf32>
    %671 = vector.extract_strided_slice %665 {offsets = [0, 20], sizes = [8, 10], strides = [1, 1]} : vector<8x40xf32> to vector<8x10xf32>
    %672 = math.tanh %671 : vector<8x10xf32>
    %673 = vector.extract_strided_slice %670 {offsets = [0, 0], sizes = [8, 10], strides = [1, 1]} : vector<8x40xf32> to vector<8x10xf32>
    %674 = vector.extract_strided_slice %670 {offsets = [0, 10], sizes = [8, 10], strides = [1, 1]} : vector<8x40xf32> to vector<8x10xf32>
    %675 = vector.extract_strided_slice %670 {offsets = [0, 30], sizes = [8, 10], strides = [1, 1]} : vector<8x40xf32> to vector<8x10xf32>
    %676 = arith.mulf %674, %640 : vector<8x10xf32>
    %677 = arith.mulf %673, %672 : vector<8x10xf32>
    %678 = arith.addf %676, %677 : vector<8x10xf32>
    %679 = math.tanh %678 : vector<8x10xf32>
    %680 = arith.mulf %675, %679 : vector<8x10xf32>
    %cst_128 = arith.constant dense<0.000000e+00> : vector<8x40xf32>
    %681 = tpu.matmul %680, %1, %cst_128 {dimension_numbers = #tpu.dot_dimension_numbers<[1], [0], [0], [1], [0, 0, 1, 1], [], []>} : vector<8x10xf32>, vector<10x40xf32>, vector<8x40xf32> -> vector<8x40xf32>
    %682 = arith.addf %662, %681 : vector<8x40xf32>
    %683 = vector.broadcast %5 : vector<1x40xf32> to vector<8x40xf32>
    %684 = arith.addf %682, %683 : vector<8x40xf32>
    %685 = arith.negf %684 : vector<8x40xf32>
    %686 = math.exp %685 : vector<8x40xf32>
    %cst_129 = arith.constant 1.000000e+00 : f32
    %687 = vector.broadcast %cst_129 : f32 to vector<8x40xf32>
    %688 = arith.addf %687, %686 : vector<8x40xf32>
    %689 = arith.divf %687, %688 : vector<8x40xf32>
    %690 = vector.extract_strided_slice %684 {offsets = [0, 20], sizes = [8, 10], strides = [1, 1]} : vector<8x40xf32> to vector<8x10xf32>
    %691 = math.tanh %690 : vector<8x10xf32>
    %692 = vector.extract_strided_slice %689 {offsets = [0, 0], sizes = [8, 10], strides = [1, 1]} : vector<8x40xf32> to vector<8x10xf32>
    %693 = vector.extract_strided_slice %689 {offsets = [0, 10], sizes = [8, 10], strides = [1, 1]} : vector<8x40xf32> to vector<8x10xf32>
    %694 = vector.extract_strided_slice %689 {offsets = [0, 30], sizes = [8, 10], strides = [1, 1]} : vector<8x40xf32> to vector<8x10xf32>
    %695 = arith.mulf %693, %659 : vector<8x10xf32>
    %696 = arith.mulf %692, %691 : vector<8x10xf32>
    %697 = arith.addf %695, %696 : vector<8x10xf32>
    %698 = math.tanh %697 : vector<8x10xf32>
    %699 = arith.mulf %694, %698 : vector<8x10xf32>
    %cst_130 = arith.constant dense<0.000000e+00> : vector<8x40xf32>
    %700 = tpu.matmul %699, %2, %cst_130 {dimension_numbers = #tpu.dot_dimension_numbers<[1], [0], [0], [1], [0, 0, 1, 1], [], []>} : vector<8x10xf32>, vector<10x40xf32>, vector<8x40xf32> -> vector<8x40xf32>
    %cst_131 = arith.constant dense<0.000000e+00> : vector<8x40xf32>
    %701 = tpu.matmul %680, %0, %cst_131 {dimension_numbers = #tpu.dot_dimension_numbers<[1], [0], [0], [1], [0, 0, 1, 1], [], []>} : vector<8x10xf32>, vector<10x40xf32>, vector<8x40xf32> -> vector<8x40xf32>
    %c144 = arith.constant 144 : index
    %c0_132 = arith.constant 0 : index
    %702 = vector.load %arg3[%c144, %c0_132] : memref<160x40xf32, #tpu.memory_space<vmem>>, vector<8x40xf32>
    %703 = arith.addf %701, %702 : vector<8x40xf32>
    %704 = arith.negf %703 : vector<8x40xf32>
    %705 = math.exp %704 : vector<8x40xf32>
    %cst_133 = arith.constant 1.000000e+00 : f32
    %706 = vector.broadcast %cst_133 : f32 to vector<8x40xf32>
    %707 = arith.addf %706, %705 : vector<8x40xf32>
    %708 = arith.divf %706, %707 : vector<8x40xf32>
    %709 = vector.extract_strided_slice %703 {offsets = [0, 20], sizes = [8, 10], strides = [1, 1]} : vector<8x40xf32> to vector<8x10xf32>
    %710 = math.tanh %709 : vector<8x10xf32>
    %711 = vector.extract_strided_slice %708 {offsets = [0, 0], sizes = [8, 10], strides = [1, 1]} : vector<8x40xf32> to vector<8x10xf32>
    %712 = vector.extract_strided_slice %708 {offsets = [0, 10], sizes = [8, 10], strides = [1, 1]} : vector<8x40xf32> to vector<8x10xf32>
    %713 = vector.extract_strided_slice %708 {offsets = [0, 30], sizes = [8, 10], strides = [1, 1]} : vector<8x40xf32> to vector<8x10xf32>
    %714 = arith.mulf %712, %678 : vector<8x10xf32>
    %715 = arith.mulf %711, %710 : vector<8x10xf32>
    %716 = arith.addf %714, %715 : vector<8x10xf32>
    %717 = math.tanh %716 : vector<8x10xf32>
    %718 = arith.mulf %713, %717 : vector<8x10xf32>
    %cst_134 = arith.constant dense<0.000000e+00> : vector<8x40xf32>
    %719 = tpu.matmul %718, %1, %cst_134 {dimension_numbers = #tpu.dot_dimension_numbers<[1], [0], [0], [1], [0, 0, 1, 1], [], []>} : vector<8x10xf32>, vector<10x40xf32>, vector<8x40xf32> -> vector<8x40xf32>
    %720 = arith.addf %700, %719 : vector<8x40xf32>
    %721 = vector.broadcast %5 : vector<1x40xf32> to vector<8x40xf32>
    %722 = arith.addf %720, %721 : vector<8x40xf32>
    %723 = arith.negf %722 : vector<8x40xf32>
    %724 = math.exp %723 : vector<8x40xf32>
    %cst_135 = arith.constant 1.000000e+00 : f32
    %725 = vector.broadcast %cst_135 : f32 to vector<8x40xf32>
    %726 = arith.addf %725, %724 : vector<8x40xf32>
    %727 = arith.divf %725, %726 : vector<8x40xf32>
    %728 = vector.extract_strided_slice %722 {offsets = [0, 20], sizes = [8, 10], strides = [1, 1]} : vector<8x40xf32> to vector<8x10xf32>
    %729 = math.tanh %728 : vector<8x10xf32>
    %730 = vector.extract_strided_slice %727 {offsets = [0, 0], sizes = [8, 10], strides = [1, 1]} : vector<8x40xf32> to vector<8x10xf32>
    %731 = vector.extract_strided_slice %727 {offsets = [0, 10], sizes = [8, 10], strides = [1, 1]} : vector<8x40xf32> to vector<8x10xf32>
    %732 = vector.extract_strided_slice %727 {offsets = [0, 30], sizes = [8, 10], strides = [1, 1]} : vector<8x40xf32> to vector<8x10xf32>
    %733 = arith.mulf %731, %697 : vector<8x10xf32>
    %734 = arith.mulf %730, %729 : vector<8x10xf32>
    %735 = arith.addf %733, %734 : vector<8x10xf32>
    %736 = math.tanh %735 : vector<8x10xf32>
    %737 = arith.mulf %732, %736 : vector<8x10xf32>
    %cst_136 = arith.constant dense<0.000000e+00> : vector<8x40xf32>
    %738 = tpu.matmul %737, %2, %cst_136 {dimension_numbers = #tpu.dot_dimension_numbers<[1], [0], [0], [1], [0, 0, 1, 1], [], []>} : vector<8x10xf32>, vector<10x40xf32>, vector<8x40xf32> -> vector<8x40xf32>
    %cst_137 = arith.constant dense<0.000000e+00> : vector<8x40xf32>
    %739 = tpu.matmul %718, %0, %cst_137 {dimension_numbers = #tpu.dot_dimension_numbers<[1], [0], [0], [1], [0, 0, 1, 1], [], []>} : vector<8x10xf32>, vector<10x40xf32>, vector<8x40xf32> -> vector<8x40xf32>
    %c152 = arith.constant 152 : index
    %c0_138 = arith.constant 0 : index
    %740 = vector.load %arg3[%c152, %c0_138] : memref<160x40xf32, #tpu.memory_space<vmem>>, vector<8x40xf32>
    %741 = arith.addf %739, %740 : vector<8x40xf32>
    %742 = arith.negf %741 : vector<8x40xf32>
    %743 = math.exp %742 : vector<8x40xf32>
    %cst_139 = arith.constant 1.000000e+00 : f32
    %744 = vector.broadcast %cst_139 : f32 to vector<8x40xf32>
    %745 = arith.addf %744, %743 : vector<8x40xf32>
    %746 = arith.divf %744, %745 : vector<8x40xf32>
    %747 = vector.extract_strided_slice %741 {offsets = [0, 20], sizes = [8, 10], strides = [1, 1]} : vector<8x40xf32> to vector<8x10xf32>
    %748 = math.tanh %747 : vector<8x10xf32>
    %749 = vector.extract_strided_slice %746 {offsets = [0, 0], sizes = [8, 10], strides = [1, 1]} : vector<8x40xf32> to vector<8x10xf32>
    %750 = vector.extract_strided_slice %746 {offsets = [0, 10], sizes = [8, 10], strides = [1, 1]} : vector<8x40xf32> to vector<8x10xf32>
    %751 = vector.extract_strided_slice %746 {offsets = [0, 30], sizes = [8, 10], strides = [1, 1]} : vector<8x40xf32> to vector<8x10xf32>
    %752 = arith.mulf %750, %716 : vector<8x10xf32>
    %753 = arith.mulf %749, %748 : vector<8x10xf32>
    %754 = arith.addf %752, %753 : vector<8x10xf32>
    %755 = math.tanh %754 : vector<8x10xf32>
    %756 = arith.mulf %751, %755 : vector<8x10xf32>
    %cst_140 = arith.constant dense<0.000000e+00> : vector<8x40xf32>
    %757 = tpu.matmul %756, %1, %cst_140 {dimension_numbers = #tpu.dot_dimension_numbers<[1], [0], [0], [1], [0, 0, 1, 1], [], []>} : vector<8x10xf32>, vector<10x40xf32>, vector<8x40xf32> -> vector<8x40xf32>
    %758 = arith.addf %738, %757 : vector<8x40xf32>
    %759 = vector.broadcast %5 : vector<1x40xf32> to vector<8x40xf32>
    %760 = arith.addf %758, %759 : vector<8x40xf32>
    %761 = arith.negf %760 : vector<8x40xf32>
    %762 = math.exp %761 : vector<8x40xf32>
    %cst_141 = arith.constant 1.000000e+00 : f32
    %763 = vector.broadcast %cst_141 : f32 to vector<8x40xf32>
    %764 = arith.addf %763, %762 : vector<8x40xf32>
    %765 = arith.divf %763, %764 : vector<8x40xf32>
    %766 = vector.extract_strided_slice %760 {offsets = [0, 20], sizes = [8, 10], strides = [1, 1]} : vector<8x40xf32> to vector<8x10xf32>
    %767 = math.tanh %766 : vector<8x10xf32>
    %768 = vector.extract_strided_slice %765 {offsets = [0, 0], sizes = [8, 10], strides = [1, 1]} : vector<8x40xf32> to vector<8x10xf32>
    %769 = vector.extract_strided_slice %765 {offsets = [0, 10], sizes = [8, 10], strides = [1, 1]} : vector<8x40xf32> to vector<8x10xf32>
    %770 = vector.extract_strided_slice %765 {offsets = [0, 30], sizes = [8, 10], strides = [1, 1]} : vector<8x40xf32> to vector<8x10xf32>
    %771 = arith.mulf %769, %735 : vector<8x10xf32>
    %772 = arith.mulf %768, %767 : vector<8x10xf32>
    %773 = arith.addf %771, %772 : vector<8x10xf32>
    %774 = math.tanh %773 : vector<8x10xf32>
    %775 = arith.mulf %770, %774 : vector<8x10xf32>
    %cst_142 = arith.constant dense<0.000000e+00> : vector<8x10xf32>
    %776 = tpu.matmul %775, %6, %cst_142 {dimension_numbers = #tpu.dot_dimension_numbers<[1], [0], [0], [1], [0, 0, 1, 1], [], []>} : vector<8x10xf32>, vector<10x10xf32>, vector<8x10xf32> -> vector<8x10xf32>
    %777 = vector.broadcast %8 : vector<1x10xf32> to vector<8x10xf32>
    %778 = arith.addf %776, %777 : vector<8x10xf32>
    %cst_143 = arith.constant 0.000000e+00 : f32
    %779 = vector.broadcast %cst_143 : f32 to vector<8x10xf32>
    %780 = arith.maximumf %778, %779 : vector<8x10xf32>
    %cst_144 = arith.constant dense<0.000000e+00> : vector<8x3xf32>
    %781 = tpu.matmul %780, %7, %cst_144 {dimension_numbers = #tpu.dot_dimension_numbers<[1], [0], [0], [1], [0, 0, 1, 1], [], []>} : vector<8x10xf32>, vector<10x3xf32>, vector<8x3xf32> -> vector<8x3xf32>
    %782 = vector.broadcast %9 : vector<1x3xf32> to vector<8x3xf32>
    %783 = arith.addf %781, %782 : vector<8x3xf32>
    %784 = vector.extract_strided_slice %783 {offsets = [0, 0], sizes = [4, 3], strides = [1, 1]} : vector<8x3xf32> to vector<4x3xf32>
    %c0_145 = arith.constant 0 : index
    %c0_146 = arith.constant 0 : index
    %785 = vector.load %arg2[%c0_145, %c0_146] : memref<4x3xf32, #tpu.memory_space<vmem>>, vector<4x3xf32>
    tpu.vector_store %arg2[%c0_145, %c0_146], %784 {strides = array<i32>} : memref<4x3xf32, #tpu.memory_space<vmem>>, vector<4x3xf32>,
    return
  }
}

</mosaic_0001>

<bundles_post_ra>
// kernel: tpu_custom_call.1
= control target key start
LH: loop header
LB: loop body
LE: loop exit
PB: predicated region body
PF: predicated region fallthrough
CT: control target
= control target key end

     0   :  { %vm110_vm0 = vcmask 1042432   ;;  %vm49_vm1 = vcmask 23552   ;;  %vm305_vm2 = vcmask 1041408   ;;  %v7366_v5 = vmov 0.0|0.0   ;;  %s8346_s0 = inlined_call_operand.vmem [shape: f32[160,3], index: 0, kind: input, shape index: {}]   ;;  %s8347_s1 = inlined_call_operand.vmem [shape: f32[80,128], index: 1, kind: input, shape index: {}]   ;;  %s8348_s2 = inlined_call_operand.hbm [shape: f32[4,3], index: 2, kind: output, shape index: {}]  }
   0x1   :  { %v18_v0 = vld [vmem:[%s8347_s1 + $0x40] sm:$0x7]  ;;  %v26_v2 = vld [vmem:[%s8346_s0 + $0x8] sm:$0xff]  ;;  %6757 = vmatprep.subr.bf16.mxu1 %v7366_v5  ;;  %vm7367_vm3 = vmmov 1   ;;  %vm7368_vm5 = vmmov 0   ;;  %v7369_v8 = vmov 0.0  }
   0x2   :  { %v25_v1 = vld [vmem:[%s8346_s0] sm:$0xff]  ;;  %6291 = vmatprep.subr.msk.mxu0 %vm110_vm0, %v18_v0  ;;  %v13_v4 = vld [vmem:[%s8347_s1 + $0x8] sm:$0x3]  ;;  %vm7410_vm4 = vmpackc.low %vm305_vm2, %vm7367_vm3  ;;  %6327 = vmatprep.mubr.msk.f32.mxu1 %vm7368_vm5, %v7369_v8 }
   0x3   :  { %6293 = vmatprep.mubr.msk.f32.mxu0 %vm49_vm1, %v25_v1  ;;  %v12_v3 = vld [vmem:[%s8347_s1] sm:$0xff]  ;;  %6292 = vmatpush3.msk.msra.mxu0 %vm110_vm0, %v18_v0 }
   0x4   :  { %v7408_v6 = vpack.c.bf16 %v13_v4, %v12_v3  ;;  %6294 = vmatmul.mubr.msk.f32.vlgmr.msra.gmra.mrb[0].mxu0 %vm49_vm1, %v26_v2 }
   0x5   :  { %7 = vsyncpa [#allocation4], 0  ;;  %6797 = vmatprep.subr.bf16.mxu0 %v7366_v5  ;;  %v7428_v9 = vld [vmem:[%s8347_s1 + $0x48] ss:$0 sm:$0xff]  ;;  %vm279_vm6 = vcmask 326656   ;;  %s7370_s21 = smov 108  }
   0x6   :  { %6760 = vmatpush3.bf16.msk.msra.mxu1 %vm7410_vm4, %v7408_v6  ;;  %s7371_s22 = smov 10   ;;  %v14_v28 = vld [vmem:[%s8347_s1 + $0x10] sm:$0xff]  ;;  %v15_v29 = vld [vmem:[%s8347_s1 + $0x18] sm:$0x3]  ;;  %s7372_s27 = smov 20   ;;  %v16_v34 = vld [vmem:[%s8347_s1 + $0x20] sm:$0xff] }
   0x7   :  { %6761 = vmatprep.subr.bf16.mxu1 %v7366_v5  ;;  %v7445_v30 = vpack.c.bf16 %v15_v29, %v14_v28  ;;  %s7373_s28 = smov 98   ;;  %v17_v35 = vld [vmem:[%s8347_s1 + $0x28] sm:$0x3]  ;;  %vm301_vm7 = vcmask 80896   ;;  %s7375_s3 = smov [#allocation3]   ;;  %vm5881_vm8 = vcmask 19456  }
   0x8   :  { %v7463_v36 = vpack.c.bf16 %v17_v35, %v16_v34  ;;  %v7489_v40 = vld [vmem:[%s8347_s1 + $0x49] ss:$0 sm:$0xff]  ;;  %s5889_s4 = sshll.u32 %s7375_s3, 4  ;;  %s5890_s4 = int_to_ptr.vmem [resolvable:$true] %s5889_s4 }
   0x9   :  { %6328 = vmatmul.mubr.f32.vlgmr.msra.gmra.mrb[0].mxu1 %v7369_v8  ;;  %6800 = vmatpush3.bf16.msk.msra.mxu0 %vm7410_vm4, %v7445_v30  ;;  %s7342_s5 = scalar_lea.vmem %s5890_s4, 64  ;;  %p7347_p1 = scmp.lt.s32.totalorder %s5890_s4, %s5890_s4 }
   0xa   :  { %6334 = vmatprep.mubr.msk.f32.mxu1 %vm7368_vm5, %v7369_v8  ;;  %6764 = vmatpush3.bf16.msk.msra.mxu1 %vm7410_vm4, %v7445_v30  ;;  %p7343_p0 = scmp.ne.s32.totalorder %s5890_s4, %s7342_s5  ;;  %p7348_p2 = scmp.lt.s32.totalorder %s7342_s5, %s7342_s5 }
   0xb   :  { %6765 = vmatprep.subr.bf16.mxu1 %v7366_v5  ;;  %6805 = vmatprep.subr.bf16.mxu0 %v7366_v5 }
   0xc   :  { %p7349_p3 = por %p7348_p2, %p7347_p1 }
   0xe   :  { %p7350_p4 = pnand %p7349_p3, %p7343_p0 }
  0xd7   :  { %v6295_v10 = vpop.f32.mrb[0].mxu0 }
  0xd8   :  { %v186_v11 = vadd.f32 %v6295_v10, %v7428_v9  ;;  %v180_v12 = vpop.f32.mrb[1].mxu0  ;;  %v27_v10 = vld [vmem:[%s8346_s0 + $0x10] sm:$0xff] }
  0xd9   :  { %v181_v13 = vadd.f32 %v7428_v9, %v180_v12  ;;  %6296 = vmatprep.mubr.msk.f32.mxu0 %vm49_vm1, %v27_v10 }
  0xda   :  { %281 = vst.msk [vmem:[#allocation2 + $0x8] sm:$0xff] %vm279_vm6, %v186_v11  ;;  %v28_v11 = vld [vmem:[%s8346_s0 + $0x18] sm:$0xff] }
  0xdb   :  { %280 = vst.msk [vmem:[#allocation2] sm:$0xff] %vm279_vm6, %v181_v13  ;;  %6297 = vmatmul.mubr.msk.f32.gmra.mrb[2].mxu0 %vm49_vm1, %v28_v11 }
  0xdc   :  { %v375_v14 = vpop.f32.mrb[0].mxu1 }
  0xdd   :  { %v6329_v15 = vpop.f32.mrb[1].mxu1 }
  0xe1   :  { %v583_v45 = vld [vmem:[#allocation2 + $0x8] sm:$0xff] }
  0xe2   :  { %v300_v16 = vld [vmem:[#allocation2] sm:$0xff] }
  0xe3   :  { %v376_v17 = vadd.f32 %v375_v14, %v300_v16 }
  0xe5   :  { %7020 = vtanh.f32 %v376_v17  ;;  %v5920_v19 = vmul.f32 -1.442695, %v376_v17 }
  0xe7   :  { %7022 = vpow2.f32 %v5920_v19 }
  0xef   :  { %v7021_v18 = vpop.eup %7020 }
  0xf0   :  { %388 = vrot.lane.b32.xlu0 %v7021_v18, %s7370_s21 }
  0xf1   :  { %v7023_v20 = vpop.eup %7022 }
  0xf2   :  { %v382_v21 = vadd.f32 1.0, %v7023_v20 }
  0xf4   :  { %7024 = vrcp.f32 %v382_v21 }
  0xfe   :  { %v7025_v22 = vpop.eup %7024 }
  0xff   :  { %v386_v25 = vmul.f32 0.0, %v7025_v22 }
 0x162   :  { %v389_v23 = vpop.permute.xlu0 %388 }
 0x163   :  { %v391_v24 = vmul.f32 %v7025_v22, %v389_v23 }
 0x165   :  { %393 = vrot.lane.b32.xlu0 %v391_v24, %s7371_s22 }
 0x1ae   :  { %v6298_v18 = vpop.f32.mrb[2].mxu0 }
 0x1af   :  { %v196_v19 = vadd.f32 %v6298_v18, %v7428_v9  ;;  %v190_v20 = vpop.f32.mrb[3].mxu0 }
 0x1b0   :  { %v191_v21 = vadd.f32 %v7428_v9, %v190_v20 }
 0x1b1   :  { %283 = vst.msk [vmem:[#allocation2 + $0x18] sm:$0xff] %vm279_vm6, %v196_v19 }
 0x1b2   :  { %282 = vst.msk [vmem:[#allocation2 + $0x10] sm:$0xff] %vm279_vm6, %v191_v21 }
 0x1b9   :  { %v853_v29 = vld [vmem:[#allocation2 + $0x10] sm:$0xff] }
 0x1d7   :  { %v394_v26 = vpop.permute.xlu0 %393 }
 0x1d8   :  { %v7436_v27 = vadd.f32 %v394_v26, %v386_v25 }
 0x1da   :  { %7026 = vtanh.f32 %v7436_v27 }
 0x1e4   :  { %v7027_v31 = vpop.eup %7026 }
 0x1e5   :  { %399 = vrot.lane.b32.xlu1 %v7027_v31, %s7372_s27 }
 0x257   :  { %v400_v32 = vpop.permute.xlu1 %399 }
 0x258   :  { %v402_v33 = vmul.f32 %v7025_v22, %v400_v32 }
 0x25a   :  { %404 = vrot.lane.b32.xlu1 %v402_v33, %s7373_s28 }
 0x2cc   :  { %v405_v37 = vpop.permute.xlu1 %404 }
 0x2cd   :  { %6335 = vmatmul.mubr.msk.f32.vlgmr.msra.gmra.mrb[2].mxu1 %vm301_vm7, %v405_v37 }
 0x2ce   :  { %6768 = vmatpush3.bf16.msk.msra.mxu1 %vm7410_vm4, %v7463_v36  ;;  %6341 = vmatprep.mubr.msk.f32.mxu1 %vm7368_vm5, %v7369_v8 }
 0x2cf   :  { %6769 = vmatprep.subr.bf16.mxu1 %v7366_v5 }
 0x2d1   :  { %6342 = vmatmul.mubr.f32.vlgmr.msra.gmra.mrb[4].mxu1 %v7369_v8 }
 0x2d2   :  { %6772 = vmatpush3.bf16.msk.msra.mxu1 %vm7410_vm4, %v7408_v6  ;;  %6348 = vmatprep.mubr.msk.f32.mxu1 %vm7368_vm5, %v7369_v8 }
 0x2d3   :  { %6773 = vmatprep.subr.bf16.mxu1 %v7366_v5 }
 0x2d5   :  { %6349 = vmatmul.mubr.msk.f32.vlgmr.msra.gmra.mrb[6].mxu1 %vm301_vm7, %v405_v37 }
 0x2d6   :  { %6776 = vmatpush3.bf16.msk.msra.mxu1 %vm7410_vm4, %v7445_v30  ;;  %6355 = vmatprep.mubr.msk.f32.mxu1 %vm7368_vm5, %v7369_v8 }
 0x2d7   :  { %6777 = vmatprep.subr.bf16.mxu1 %v7366_v5 }
 0x3a0   :  { %v477_v38 = vpop.f32.mrb[2].mxu1 }
 0x3a1   :  { %v6336_v39 = vpop.f32.mrb[3].mxu1 }
 0x3a4   :  { %v550_v41 = vpop.f32.mrb[4].mxu1 }
 0x3a5   :  { %v551_v42 = vadd.f32 %v550_v41, %v477_v38  ;;  %v6343_v43 = vpop.f32.mrb[5].mxu1 }
 0x3a7   :  { %v558_v44 = vadd.f32 %v7489_v40, %v551_v42 }
 0x3a8   :  { %v650_v46 = vpop.f32.mrb[6].mxu1 }
 0x3a9   :  { %7028 = vtanh.f32 %v558_v44  ;;  %v651_v47 = vadd.f32 %v650_v46, %v583_v45  ;;  %v6350_v48 = vpop.f32.mrb[7].mxu1  ;;  %v5925_v51 = vmul.f32 -1.442695, %v558_v44 }
 0x3ab   :  { %7030 = vtanh.f32 %v651_v47  ;;  %v5928_v52 = vmul.f32 -1.442695, %v651_v47 }
 0x3ac   :  { %7032 = vpow2.f32 %v5925_v51 }
 0x3ad   :  { %7034 = vpow2.f32 %v5928_v52 }
 0x3b3   :  { %v7029_v49 = vpop.eup %7028 }
 0x3b4   :  { %568 = vrot.lane.b32.xlu1 %v7029_v49, %s7370_s21 }
 0x3b5   :  { %v7031_v50 = vpop.eup %7030 }
 0x3b6   :  { %663 = vrot.lane.b32.xlu0 %v7031_v50, %s7370_s21  ;;  %v7033_v53 = vpop.eup %7032 }
 0x3b7   :  { %v7035_v54 = vpop.eup %7034  ;;  %v562_v55 = vadd.f32 1.0, %v7033_v53 }
 0x3b8   :  { %v657_v56 = vadd.f32 1.0, %v7035_v54 }
 0x3b9   :  { %7036 = vrcp.f32 %v562_v55 }
 0x3ba   :  { %7038 = vrcp.f32 %v657_v56 }
 0x3c3   :  { %v7037_v57 = vpop.eup %7036 }
 0x3c4   :  { %v7039_v60 = vpop.eup %7038  ;;  %v566_v63 = vmul.f32 0.0, %v7037_v57 }
 0x3c5   :  { %v661_v2 = vmul.f32 %v7039_v60, %v7436_v27 }
 0x426   :  { %v569_v58 = vpop.permute.xlu1 %568 }
 0x427   :  { %v571_v59 = vmul.f32 %v7037_v57, %v569_v58 }
 0x428   :  { %v664_v61 = vpop.permute.xlu0 %663 }
 0x429   :  { %573 = vrot.lane.b32.xlu1 %v571_v59, %s7371_s22  ;;  %v666_v62 = vmul.f32 %v7039_v60, %v664_v61 }
 0x42b   :  { %668 = vrot.lane.b32.xlu0 %v666_v62, %s7371_s22 }
 0x49b   :  { %v574_v0 = vpop.permute.xlu1 %573 }
 0x49c   :  { %v7496_v1 = vadd.f32 %v574_v0, %v566_v63 }
 0x49d   :  { %v669_v3 = vpop.permute.xlu0 %668 }
 0x49e   :  { %7040 = vtanh.f32 %v7496_v1  ;;  %v7500_v4 = vadd.f32 %v669_v3, %v661_v2 }
 0x4a0   :  { %7042 = vtanh.f32 %v7500_v4 }
 0x4a8   :  { %v7041_v12 = vpop.eup %7040 }
 0x4a9   :  { %579 = vrot.lane.b32.xlu1 %v7041_v12, %s7372_s27  ;;  %v1123_v12 = vld [vmem:[#allocation2 + $0x18] sm:$0xff] }
 0x4aa   :  { %v7043_v13 = vpop.eup %7042 }
 0x4ab   :  { %674 = vrot.lane.b32.xlu0 %v7043_v13, %s7372_s27 }
 0x51b   :  { %v580_v14 = vpop.permute.xlu1 %579 }
 0x51c   :  { %v582_v15 = vmul.f32 %v7037_v57, %v580_v14 }
 0x51d   :  { %v675_v16 = vpop.permute.xlu0 %674 }
 0x51e   :  { %754 = vrot.lane.b32.xlu1 %v582_v15, %s7373_s28  ;;  %v677_v17 = vmul.f32 %v7039_v60, %v675_v16 }
 0x520   :  { %679 = vrot.lane.b32.xlu0 %v677_v17, %s7373_s28 }
 0x590   :  { %v755_v23 = vpop.permute.xlu1 %754 }
 0x592   :  { %v680_v22 = vpop.permute.xlu0 %679 }
 0x593   :  { %6356 = vmatmul.mubr.msk.f32.vlgmr.msra.gmra.mrb[8].mxu1 %vm301_vm7, %v680_v22 }
 0x594   :  { %6780 = vmatpush3.bf16.msk.msra.mxu1 %vm7410_vm4, %v7463_v36  ;;  %6362 = vmatprep.mubr.msk.f32.mxu1 %vm7368_vm5, %v7369_v8 }
 0x595   :  { %6781 = vmatprep.subr.bf16.mxu1 %v7366_v5 }
 0x597   :  { %6363 = vmatmul.mubr.msk.f32.vlgmr.msra.gmra.mrb[10].mxu1 %vm301_vm7, %v755_v23 }
 0x598   :  { %6784 = vmatpush3.bf16.msk.msra.mxu1 %vm7410_vm4, %v7408_v6  ;;  %6369 = vmatprep.mubr.msk.f32.mxu1 %vm7368_vm5, %v7369_v8 }
 0x599   :  { %6785 = vmatprep.subr.bf16.mxu1 %v7366_v5 }
 0x59b   :  { %6370 = vmatmul.mubr.msk.f32.vlgmr.msra.gmra.mrb[12].mxu1 %vm301_vm7, %v680_v22 }
 0x59c   :  { %6788 = vmatpush3.bf16.msk.msra.mxu1 %vm7410_vm4, %v7445_v30  ;;  %6376 = vmatprep.mubr.msk.f32.mxu1 %vm7368_vm5, %v7369_v8 }
 0x59d   :  { %6789 = vmatprep.subr.bf16.mxu1 %v7366_v5 }
 0x666   :  { %v749_v24 = vpop.f32.mrb[8].mxu1 }
 0x667   :  { %v6357_v25 = vpop.f32.mrb[9].mxu1 }
 0x66a   :  { %v824_v26 = vpop.f32.mrb[10].mxu1 }
 0x66b   :  { %v825_v27 = vadd.f32 %v824_v26, %v749_v24  ;;  %v6364_v28 = vpop.f32.mrb[11].mxu1 }
 0x66d   :  { %v828_v31 = vadd.f32 %v7489_v40, %v825_v27 }
 0x66e   :  { %v920_v32 = vpop.f32.mrb[12].mxu1 }
 0x66f   :  { %7044 = vtanh.f32 %v828_v31  ;;  %v921_v33 = vadd.f32 %v920_v32, %v853_v29  ;;  %v6371_v34 = vpop.f32.mrb[13].mxu1  ;;  %v5933_v38 = vmul.f32 -1.442695, %v828_v31 }
 0x671   :  { %7046 = vtanh.f32 %v921_v33  ;;  %v5936_v39 = vmul.f32 -1.442695, %v921_v33 }
 0x672   :  { %7048 = vpow2.f32 %v5933_v38  ;;  %v29_v38 = vld [vmem:[%s8346_s0 + $0x20] sm:$0xff] }
 0x673   :  { %7050 = vpow2.f32 %v5936_v39  ;;  %v30_v39 = vld [vmem:[%s8346_s0 + $0x28] sm:$0xff]  ;;  %6299 = vmatprep.mubr.msk.f32.mxu0 %vm49_vm1, %v29_v38 }
 0x674   :  { %6300 = vmatmul.mubr.msk.f32.gmra.mrb[4].mxu0 %vm49_vm1, %v30_v39 }
 0x679   :  { %v7045_v35 = vpop.eup %7044 }
 0x67a   :  { %838 = vrot.lane.b32.xlu1 %v7045_v35, %s7370_s21 }
 0x67b   :  { %v7047_v37 = vpop.eup %7046 }
 0x67c   :  { %933 = vrot.lane.b32.xlu0 %v7047_v37, %s7370_s21  ;;  %v7049_v41 = vpop.eup %7048 }
 0x67d   :  { %v7051_v42 = vpop.eup %7050  ;;  %v832_v43 = vadd.f32 1.0, %v7049_v41  ;;  %v31_v41 = vld [vmem:[%s8346_s0 + $0x30] sm:$0xff] }
 0x67e   :  { %v927_v44 = vadd.f32 1.0, %v7051_v42  ;;  %6302 = vmatprep.mubr.msk.f32.mxu0 %vm49_vm1, %v31_v41  ;;  %v32_v42 = vld [vmem:[%s8346_s0 + $0x38] sm:$0xff] }
 0x67f   :  { %7052 = vrcp.f32 %v832_v43  ;;  %v33_v43 = vld [vmem:[%s8346_s0 + $0x40] sm:$0xff]  ;;  %6303 = vmatmul.mubr.msk.f32.gmra.mrb[6].mxu0 %vm49_vm1, %v32_v42 }
 0x680   :  { %7054 = vrcp.f32 %v927_v44  ;;  %6305 = vmatprep.mubr.msk.f32.mxu0 %vm49_vm1, %v33_v43 }
 0x689   :  { %v7053_v45 = vpop.eup %7052 }
 0x68a   :  { %v7055_v48 = vpop.eup %7054  ;;  %v836_v51 = vmul.f32 %v7053_v45, %v7496_v1 }
 0x68b   :  { %v931_v54 = vmul.f32 %v7055_v48, %v7500_v4 }
 0x6ec   :  { %v839_v46 = vpop.permute.xlu1 %838 }
 0x6ed   :  { %v841_v47 = vmul.f32 %v7053_v45, %v839_v46  ;;  %v35_v46 = vld [vmem:[%s8346_s0 + $0x50] sm:$0xff] }
 0x6ee   :  { %v934_v49 = vpop.permute.xlu0 %933 }
 0x6ef   :  { %843 = vrot.lane.b32.xlu1 %v841_v47, %s7371_s22  ;;  %v936_v50 = vmul.f32 %v7055_v48, %v934_v49  ;;  %v37_v49 = vld [vmem:[%s8346_s0 + $0x60] sm:$0xff] }
 0x6f1   :  { %938 = vrot.lane.b32.xlu0 %v936_v50, %s7371_s22  ;;  %v38_v50 = vld [vmem:[%s8346_s0 + $0x68] sm:$0xff] }
 0x761   :  { %v844_v52 = vpop.permute.xlu1 %843 }
 0x762   :  { %v7546_v53 = vadd.f32 %v844_v52, %v836_v51  ;;  %v39_v51 = vld [vmem:[%s8346_s0 + $0x70] sm:$0xff]  ;;  %v40_v52 = vld [vmem:[%s8346_s0 + $0x78] sm:$0xff] }
 0x763   :  { %v939_v55 = vpop.permute.xlu0 %938 }
 0x764   :  { %7056 = vtanh.f32 %v7546_v53  ;;  %v7550_v56 = vadd.f32 %v939_v55, %v931_v54  ;;  %v42_v54 = vld [vmem:[%s8346_s0 + $0x88] sm:$0xff]  ;;  %v43_v55 = vld [vmem:[%s8346_s0 + $0x90] sm:$0xff] }
 0x766   :  { %7058 = vtanh.f32 %v7550_v56 }
 0x76e   :  { %v7057_v57 = vpop.eup %7056 }
 0x76f   :  { %849 = vrot.lane.b32.xlu1 %v7057_v57, %s7372_s27 }
 0x770   :  { %v7059_v58 = vpop.eup %7058 }
 0x771   :  { %944 = vrot.lane.b32.xlu0 %v7059_v58, %s7372_s27 }
 0x7e1   :  { %v850_v59 = vpop.permute.xlu1 %849 }
 0x7e2   :  { %v852_v60 = vmul.f32 %v7053_v45, %v850_v59  ;;  %v34_v45 = vld [vmem:[%s8346_s0 + $0x48] sm:$0xff] }
 0x7e3   :  { %v945_v61 = vpop.permute.xlu0 %944  ;;  %6306 = vmatmul.mubr.msk.f32.gmra.mrb[8].mxu0 %vm49_vm1, %v34_v45 }
 0x7e4   :  { %1024 = vrot.lane.b32.xlu1 %v852_v60, %s7373_s28  ;;  %v947_v62 = vmul.f32 %v7055_v48, %v945_v61  ;;  %6308 = vmatprep.mubr.msk.f32.mxu0 %vm49_vm1, %v35_v46  ;;  %v36_v48 = vld [vmem:[%s8346_s0 + $0x58] sm:$0xff]  ;;  %v6301_v61 = vpop.f32.mrb[4].mxu0 }
 0x7e6   :  { %949 = vrot.lane.b32.xlu0 %v947_v62, %s7373_s28  ;;  %v206_v62 = vadd.f32 %v6301_v61, %v7428_v9 }
 0x7e7   :  { %6309 = vmatmul.mubr.msk.f32.gmra.mrb[10].mxu0 %vm49_vm1, %v36_v48 }
 0x7e8   :  { %6311 = vmatprep.mubr.msk.f32.mxu0 %vm49_vm1, %v37_v49  ;;  %285 = vst.msk [vmem:[#allocation2 + $0x28] sm:$0xff] %vm279_vm6, %v206_v62 }
 0x7eb   :  { %6312 = vmatmul.mubr.msk.f32.gmra.mrb[12].mxu0 %vm49_vm1, %v38_v50 }
 0x7ec   :  { %6314 = vmatprep.mubr.msk.f32.mxu0 %vm49_vm1, %v39_v51 }
 0x7ef   :  { %6315 = vmatmul.mubr.msk.f32.gmra.mrb[14].mxu0 %vm49_vm1, %v40_v52 }
 0x856   :  { %v1025_v0 = vpop.permute.xlu1 %1024 }
 0x858   :  { %v950_v63 = vpop.permute.xlu0 %949 }
 0x859   :  { %6377 = vmatmul.mubr.msk.f32.vlgmr.msra.gmra.mrb[14].mxu1 %vm301_vm7, %v950_v63 }
 0x85a   :  { %6792 = vmatpush3.bf16.msk.msra.mxu1 %vm7410_vm4, %v7463_v36  ;;  %6383 = vmatprep.mubr.msk.f32.mxu1 %vm7368_vm5, %v7369_v8 }
 0x85b   :  { %6793 = vmatprep.subr.bf16.mxu1 %v7366_v5 }
 0x85d   :  { %6384 = vmatmul.mubr.msk.f32.vlgmr.msra.gmra.mrb[16].mxu1 %vm301_vm7, %v1025_v0 }
 0x85e   :  { %6796 = vmatpush3.bf16.msk.msra.mxu1 %vm7410_vm4, %v7408_v6  ;;  %6390 = vmatprep.mubr.msk.f32.mxu1 %vm7368_vm5, %v7369_v8 }
 0x85f   :  { %6801 = vmatprep.subr.bf16.mxu1 %v7366_v5 }
 0x861   :  { %6391 = vmatmul.mubr.msk.f32.vlgmr.msra.gmra.mrb[18].mxu1 %vm301_vm7, %v950_v63  ;;  %v200_v63 = vpop.f32.mrb[5].mxu0 }
 0x862   :  { %6804 = vmatpush3.bf16.msk.msra.mxu1 %vm7410_vm4, %v7463_v36  ;;  %6404 = vmatprep.mubr.msk.f32.mxu1 %vm7368_vm5, %v7369_v8  ;;  %v201_v0 = vadd.f32 %v7428_v9, %v200_v63 }
 0x863   :  { %6809 = vmatprep.subr.bf16.mxu1 %v7366_v5 }
 0x864   :  { %284 = vst.msk [vmem:[#allocation2 + $0x20] sm:$0xff] %vm279_vm6, %v201_v0 }
 0x86b   :  { %v1393_v46 = vld [vmem:[#allocation2 + $0x20] sm:$0xff] }
 0x92c   :  { %v1019_v1 = vpop.f32.mrb[14].mxu1 }
 0x92d   :  { %v6378_v2 = vpop.f32.mrb[15].mxu1 }
 0x930   :  { %v1094_v3 = vpop.f32.mrb[16].mxu1 }
 0x931   :  { %v1095_v4 = vadd.f32 %v1094_v3, %v1019_v1  ;;  %v6385_v10 = vpop.f32.mrb[17].mxu1  ;;  %v6304_v1 = vpop.f32.mrb[6].mxu0 }
 0x932   :  { %v216_v2 = vadd.f32 %v6304_v1, %v7428_v9  ;;  %v210_v3 = vpop.f32.mrb[7].mxu0 }
 0x933   :  { %v1098_v11 = vadd.f32 %v7489_v40, %v1095_v4  ;;  %v211_v4 = vadd.f32 %v7428_v9, %v210_v3  ;;  %v6307_v10 = vpop.f32.mrb[8].mxu0 }
 0x934   :  { %v1190_v13 = vpop.f32.mrb[18].mxu1  ;;  %287 = vst.msk [vmem:[#allocation2 + $0x38] sm:$0xff] %vm279_vm6, %v216_v2 }
 0x935   :  { %7060 = vtanh.f32 %v1098_v11  ;;  %v1191_v14 = vadd.f32 %v1190_v13, %v1123_v12  ;;  %v6392_v15 = vpop.f32.mrb[19].mxu1  ;;  %v5941_v18 = vmul.f32 -1.442695, %v1098_v11  ;;  %286 = vst.msk [vmem:[#allocation2 + $0x30] sm:$0xff] %vm279_vm6, %v211_v4  ;;  %v226_v11 = vadd.f32 %v6307_v10, %v7428_v9  ;;  %v220_v12 = vpop.f32.mrb[9].mxu0 }
 0x936   :  { %v221_v13 = vadd.f32 %v7428_v9, %v220_v12 }
 0x937   :  { %7062 = vtanh.f32 %v1191_v14  ;;  %v5944_v19 = vmul.f32 -1.442695, %v1191_v14  ;;  %289 = vst.msk [vmem:[#allocation2 + $0x48] sm:$0xff] %vm279_vm6, %v226_v11  ;;  %v6310_v14 = vpop.f32.mrb[10].mxu0 }
 0x938   :  { %7064 = vpow2.f32 %v5941_v18  ;;  %288 = vst.msk [vmem:[#allocation2 + $0x40] sm:$0xff] %vm279_vm6, %v221_v13  ;;  %v236_v15 = vadd.f32 %v6310_v14, %v7428_v9 }
 0x939   :  { %7066 = vpow2.f32 %v5944_v19 }
 0x93a   :  { %291 = vst.msk [vmem:[#allocation2 + $0x58] sm:$0xff] %vm279_vm6, %v236_v15 }
 0x93f   :  { %v7061_v16 = vpop.eup %7060 }
 0x940   :  { %1108 = vrot.lane.b32.xlu1 %v7061_v16, %s7370_s21  ;;  %v230_v16 = vpop.f32.mrb[11].mxu0 }
 0x941   :  { %v7063_v17 = vpop.eup %7062  ;;  %v6313_v18 = vpop.f32.mrb[12].mxu0 }
 0x942   :  { %1203 = vrot.lane.b32.xlu0 %v7063_v17, %s7370_s21  ;;  %v7065_v20 = vpop.eup %7064  ;;  %v231_v17 = vadd.f32 %v7428_v9, %v230_v16  ;;  %v246_v19 = vadd.f32 %v6313_v18, %v7428_v9 }
 0x943   :  { %v7067_v21 = vpop.eup %7066  ;;  %v1102_v22 = vadd.f32 1.0, %v7065_v20  ;;  %v240_v20 = vpop.f32.mrb[13].mxu0 }
 0x944   :  { %v1197_v23 = vadd.f32 1.0, %v7067_v21  ;;  %290 = vst.msk [vmem:[#allocation2 + $0x50] sm:$0xff] %vm279_vm6, %v231_v17  ;;  %v241_v21 = vadd.f32 %v7428_v9, %v240_v20  ;;  %293 = vst.msk [vmem:[#allocation2 + $0x68] sm:$0xff] %vm279_vm6, %v246_v19 }
 0x945   :  { %7068 = vrcp.f32 %v1102_v22  ;;  %v6316_v22 = vpop.f32.mrb[14].mxu0 }
 0x946   :  { %7070 = vrcp.f32 %v1197_v23  ;;  %292 = vst.msk [vmem:[#allocation2 + $0x60] sm:$0xff] %vm279_vm6, %v241_v21  ;;  %v256_v23 = vadd.f32 %v6316_v22, %v7428_v9 }
 0x948   :  { %295 = vst.msk [vmem:[#allocation2 + $0x78] sm:$0xff] %vm279_vm6, %v256_v23  ;;  %v1663_v23 = vld [vmem:[#allocation2 + $0x28] sm:$0xff] }
 0x94f   :  { %v7069_v24 = vpop.eup %7068 }
 0x950   :  { %v7071_v27 = vpop.eup %7070  ;;  %v1106_v31 = vmul.f32 %v7069_v24, %v7546_v53  ;;  %v41_v53 = vld [vmem:[%s8346_s0 + $0x80] sm:$0xff] }
 0x951   :  { %v1201_v34 = vmul.f32 %v7071_v27, %v7550_v56  ;;  %6317 = vmatprep.mubr.msk.f32.mxu0 %vm49_vm1, %v41_v53  ;;  %v44_v56 = vld [vmem:[%s8346_s0 + $0x98] sm:$0xff] }
 0x952   :  { %6318 = vmatmul.mubr.msk.f32.gmra.mrb[16].mxu0 %vm49_vm1, %v42_v54 }
 0x953   :  { %6320 = vmatprep.mubr.msk.f32.mxu0 %vm49_vm1, %v43_v55 }
 0x956   :  { %6321 = vmatmul.mubr.msk.f32.gmra.mrb[18].mxu0 %vm49_vm1, %v44_v56 }
 0x957   :  { %6397 = vmatprep.mubr.msk.f32.mxu0 %vm7368_vm5, %v7369_v8 }
 0x9b2   :  { %v1109_v25 = vpop.permute.xlu1 %1108 }
 0x9b3   :  { %v1111_v26 = vmul.f32 %v7069_v24, %v1109_v25 }
 0x9b4   :  { %v1204_v28 = vpop.permute.xlu0 %1203 }
 0x9b5   :  { %1113 = vrot.lane.b32.xlu1 %v1111_v26, %s7371_s22  ;;  %v1206_v29 = vmul.f32 %v7071_v27, %v1204_v28 }
 0x9b7   :  { %1208 = vrot.lane.b32.xlu0 %v1206_v29, %s7371_s22 }
 0xa27   :  { %v1114_v32 = vpop.permute.xlu1 %1113 }
 0xa28   :  { %v7584_v33 = vadd.f32 %v1114_v32, %v1106_v31 }
 0xa29   :  { %v1209_v35 = vpop.permute.xlu0 %1208 }
 0xa2a   :  { %7072 = vtanh.f32 %v7584_v33  ;;  %v7588_v37 = vadd.f32 %v1209_v35, %v1201_v34 }
 0xa2c   :  { %7074 = vtanh.f32 %v7588_v37 }
 0xa34   :  { %v7073_v44 = vpop.eup %7072 }
 0xa35   :  { %1119 = vrot.lane.b32.xlu1 %v7073_v44, %s7372_s27 }
 0xa36   :  { %v7075_v47 = vpop.eup %7074 }
 0xa37   :  { %1214 = vrot.lane.b32.xlu0 %v7075_v47, %s7372_s27 }
 0xaa7   :  { %v1120_v57 = vpop.permute.xlu1 %1119 }
 0xaa8   :  { %v1122_v58 = vmul.f32 %v7069_v24, %v1120_v57  ;;  %v250_v24 = vpop.f32.mrb[15].mxu0 }
 0xaa9   :  { %v1215_v59 = vpop.permute.xlu0 %1214  ;;  %v251_v25 = vadd.f32 %v7428_v9, %v250_v24  ;;  %v6319_v26 = vpop.f32.mrb[16].mxu0 }
 0xaaa   :  { %1294 = vrot.lane.b32.xlu1 %v1122_v58, %s7373_s28  ;;  %v1217_v60 = vmul.f32 %v7071_v27, %v1215_v59  ;;  %v266_v27 = vadd.f32 %v6319_v26, %v7428_v9  ;;  %v260_v28 = vpop.f32.mrb[17].mxu0 }
 0xaab   :  { %294 = vst.msk [vmem:[#allocation2 + $0x70] sm:$0xff] %vm279_vm6, %v251_v25  ;;  %v261_v31 = vadd.f32 %v7428_v9, %v260_v28  ;;  %v6322_v32 = vpop.f32.mrb[18].mxu0 }
 0xaac   :  { %1219 = vrot.lane.b32.xlu0 %v1217_v60, %s7373_s28  ;;  %297 = vst.msk [vmem:[#allocation2 + $0x88] sm:$0xff] %vm279_vm6, %v266_v27  ;;  %v276_v35 = vadd.f32 %v6322_v32, %v7428_v9  ;;  %v270_v38 = vpop.f32.mrb[19].mxu0 }
 0xaad   :  { %296 = vst.msk [vmem:[#allocation2 + $0x80] sm:$0xff] %vm279_vm6, %v261_v31  ;;  %v271_v39 = vadd.f32 %v7428_v9, %v270_v38 }
 0xaae   :  { %299 = vst.msk [vmem:[#allocation2 + $0x98] sm:$0xff] %vm279_vm6, %v276_v35 }
 0xaaf   :  { %298 = vst.msk [vmem:[#allocation2 + $0x90] sm:$0xff] %vm279_vm6, %v271_v39 }
 0xb1c   :  { %v1295_v29 = vpop.permute.xlu1 %1294 }
 0xb1d   :  { %6405 = vmatmul.mubr.msk.f32.vlgmr.msra.gmra.mrb[20].mxu1 %vm301_vm7, %v1295_v29 }
 0xb1e   :  { %6812 = vmatpush3.bf16.msk.msra.mxu1 %vm7410_vm4, %v7445_v30  ;;  %6418 = vmatprep.mubr.msk.f32.mxu1 %vm7368_vm5, %v7369_v8  ;;  %v1220_v34 = vpop.permute.xlu0 %1219 }
 0xb1f   :  { %6817 = vmatprep.subr.bf16.mxu1 %v7366_v5  ;;  %6398 = vmatmul.mubr.msk.f32.vlgmr.msra.gmra.mrb[20].mxu0 %vm301_vm7, %v1220_v34 }
 0xb20   :  { %6808 = vmatpush3.bf16.msk.msra.mxu0 %vm7410_vm4, %v7408_v6  ;;  %6411 = vmatprep.mubr.msk.f32.mxu0 %vm7368_vm5, %v7369_v8 }
 0xb21   :  { %6813 = vmatprep.subr.bf16.mxu0 %v7366_v5 }
 0xb23   :  { %6412 = vmatmul.mubr.msk.f32.vlgmr.msra.gmra.mrb[22].mxu0 %vm301_vm7, %v1220_v34 }
 0xb24   :  { %6816 = vmatpush3.bf16.msk.msra.mxu0 %vm7410_vm4, %v7463_v36  ;;  %6425 = vmatprep.mubr.msk.f32.mxu0 %vm7368_vm5, %v7369_v8 }
 0xb25   :  { %6821 = vmatprep.subr.bf16.mxu0 %v7366_v5 }
 0xbf0   :  { %v1364_v9 = vpop.f32.mrb[20].mxu1 }
 0xbf1   :  { %v6406_v41 = vpop.f32.mrb[21].mxu1 }
 0xbf2   :  { %v1289_v42 = vpop.f32.mrb[20].mxu0 }
 0xbf3   :  { %v1365_v43 = vadd.f32 %v1364_v9, %v1289_v42  ;;  %v6399_v44 = vpop.f32.mrb[21].mxu0 }
 0xbf5   :  { %v1368_v45 = vadd.f32 %v7489_v40, %v1365_v43 }
 0xbf6   :  { %v1460_v47 = vpop.f32.mrb[22].mxu0 }
 0xbf7   :  { %7076 = vtanh.f32 %v1368_v45  ;;  %v1461_v48 = vadd.f32 %v1460_v47, %v1393_v46  ;;  %v6413_v49 = vpop.f32.mrb[23].mxu0  ;;  %v5949_v52 = vmul.f32 -1.442695, %v1368_v45 }
 0xbf9   :  { %7078 = vtanh.f32 %v1461_v48  ;;  %v5952_v53 = vmul.f32 -1.442695, %v1461_v48 }
 0xbfa   :  { %7080 = vpow2.f32 %v5949_v52 }
 0xbfb   :  { %7082 = vpow2.f32 %v5952_v53 }
 0xc01   :  { %v7077_v50 = vpop.eup %7076 }
 0xc02   :  { %1378 = vrot.lane.b32.xlu1 %v7077_v50, %s7370_s21 }
 0xc03   :  { %v7079_v51 = vpop.eup %7078 }
 0xc04   :  { %1473 = vrot.lane.b32.xlu0 %v7079_v51, %s7370_s21  ;;  %v7081_v54 = vpop.eup %7080 }
 0xc05   :  { %v7083_v55 = vpop.eup %7082  ;;  %v1372_v56 = vadd.f32 1.0, %v7081_v54 }
 0xc06   :  { %v1467_v57 = vadd.f32 1.0, %v7083_v55 }
 0xc07   :  { %7084 = vrcp.f32 %v1372_v56 }
 0xc08   :  { %7086 = vrcp.f32 %v1467_v57 }
 0xc11   :  { %v7085_v58 = vpop.eup %7084 }
 0xc12   :  { %v7087_v61 = vpop.eup %7086  ;;  %v1376_v0 = vmul.f32 %v7085_v58, %v7584_v33 }
 0xc13   :  { %v1471_v3 = vmul.f32 %v7087_v61, %v7588_v37 }
 0xc74   :  { %v1379_v59 = vpop.permute.xlu1 %1378 }
 0xc75   :  { %v1381_v60 = vmul.f32 %v7085_v58, %v1379_v59 }
 0xc76   :  { %v1474_v62 = vpop.permute.xlu0 %1473 }
 0xc77   :  { %1383 = vrot.lane.b32.xlu1 %v1381_v60, %s7371_s22  ;;  %v1476_v63 = vmul.f32 %v7087_v61, %v1474_v62 }
 0xc79   :  { %1478 = vrot.lane.b32.xlu0 %v1476_v63, %s7371_s22 }
 0xce9   :  { %v1384_v1 = vpop.permute.xlu1 %1383 }
 0xcea   :  { %v7720_v2 = vadd.f32 %v1384_v1, %v1376_v0  ;;  %v1933_v1 = vld [vmem:[#allocation2 + $0x30] sm:$0xff] }
 0xceb   :  { %v1479_v4 = vpop.permute.xlu0 %1478 }
 0xcec   :  { %7088 = vtanh.f32 %v7720_v2  ;;  %v7724_v10 = vadd.f32 %v1479_v4, %v1471_v3 }
 0xcee   :  { %7090 = vtanh.f32 %v7724_v10 }
 0xcf6   :  { %v7089_v11 = vpop.eup %7088 }
 0xcf7   :  { %1389 = vrot.lane.b32.xlu1 %v7089_v11, %s7372_s27 }
 0xcf8   :  { %v7091_v12 = vpop.eup %7090 }
 0xcf9   :  { %1484 = vrot.lane.b32.xlu0 %v7091_v12, %s7372_s27 }
 0xd69   :  { %v1390_v13 = vpop.permute.xlu1 %1389 }
 0xd6a   :  { %v1392_v33 = vmul.f32 %v7085_v58, %v1390_v13 }
 0xd6b   :  { %v1485_v14 = vpop.permute.xlu0 %1484 }
 0xd6c   :  { %1564 = vrot.lane.b32.xlu1 %v1392_v33, %s7373_s28  ;;  %v1487_v15 = vmul.f32 %v7087_v61, %v1485_v14 }
 0xd6e   :  { %1489 = vrot.lane.b32.xlu0 %v1487_v15, %s7373_s28 }
 0xdde   :  { %v1565_v37 = vpop.permute.xlu1 %1564 }
 0xddf   :  { %6426 = vmatmul.mubr.msk.f32.vlgmr.msra.gmra.mrb[24].mxu0 %vm301_vm7, %v1565_v37 }
 0xde0   :  { %6824 = vmatpush3.bf16.msk.msra.mxu0 %vm7410_vm4, %v7445_v30  ;;  %6439 = vmatprep.mubr.msk.f32.mxu0 %vm7368_vm5, %v7369_v8  ;;  %v1490_v16 = vpop.permute.xlu0 %1489 }
 0xde1   :  { %6829 = vmatprep.subr.bf16.mxu0 %v7366_v5  ;;  %6419 = vmatmul.mubr.msk.f32.vlgmr.msra.gmra.mrb[22].mxu1 %vm301_vm7, %v1490_v16 }
 0xde2   :  { %6820 = vmatpush3.bf16.msk.msra.mxu1 %vm7410_vm4, %v7408_v6  ;;  %6432 = vmatprep.mubr.msk.f32.mxu1 %vm7368_vm5, %v7369_v8 }
 0xde3   :  { %6825 = vmatprep.subr.bf16.mxu1 %v7366_v5 }
 0xde5   :  { %6433 = vmatmul.mubr.msk.f32.vlgmr.msra.gmra.mrb[24].mxu1 %vm301_vm7, %v1490_v16 }
 0xde6   :  { %6828 = vmatpush3.bf16.msk.msra.mxu1 %vm7410_vm4, %v7463_v36  ;;  %6446 = vmatprep.mubr.msk.f32.mxu1 %vm7368_vm5, %v7369_v8 }
 0xde7   :  { %6833 = vmatprep.subr.bf16.mxu1 %v7366_v5 }
 0xeb2   :  { %v1634_v17 = vpop.f32.mrb[24].mxu0 }
 0xeb3   :  { %v6427_v18 = vpop.f32.mrb[25].mxu0 }
 0xeb4   :  { %v1559_v19 = vpop.f32.mrb[22].mxu1 }
 0xeb5   :  { %v1635_v20 = vadd.f32 %v1634_v17, %v1559_v19  ;;  %v6420_v21 = vpop.f32.mrb[23].mxu1 }
 0xeb7   :  { %v1638_v22 = vadd.f32 %v7489_v40, %v1635_v20 }
 0xeb8   :  { %v1730_v24 = vpop.f32.mrb[24].mxu1 }
 0xeb9   :  { %7092 = vtanh.f32 %v1638_v22  ;;  %v1731_v25 = vadd.f32 %v1730_v24, %v1663_v23  ;;  %v6434_v26 = vpop.f32.mrb[25].mxu1  ;;  %v5957_v29 = vmul.f32 -1.442695, %v1638_v22 }
 0xebb   :  { %7094 = vtanh.f32 %v1731_v25  ;;  %v5960_v31 = vmul.f32 -1.442695, %v1731_v25 }
 0xebc   :  { %7096 = vpow2.f32 %v5957_v29 }
 0xebd   :  { %7098 = vpow2.f32 %v5960_v31 }
 0xec3   :  { %v7093_v27 = vpop.eup %7092 }
 0xec4   :  { %1648 = vrot.lane.b32.xlu1 %v7093_v27, %s7370_s21 }
 0xec5   :  { %v7095_v28 = vpop.eup %7094 }
 0xec6   :  { %1743 = vrot.lane.b32.xlu0 %v7095_v28, %s7370_s21  ;;  %v7097_v32 = vpop.eup %7096 }
 0xec7   :  { %v7099_v34 = vpop.eup %7098  ;;  %v1642_v35 = vadd.f32 1.0, %v7097_v32 }
 0xec8   :  { %v1737_v38 = vadd.f32 1.0, %v7099_v34 }
 0xec9   :  { %7100 = vrcp.f32 %v1642_v35 }
 0xeca   :  { %7102 = vrcp.f32 %v1737_v38 }
 0xed3   :  { %v7101_v39 = vpop.eup %7100 }
 0xed4   :  { %v7103_v42 = vpop.eup %7102  ;;  %v1646_v45 = vmul.f32 %v7101_v39, %v7720_v2 }
 0xed5   :  { %v1741_v48 = vmul.f32 %v7103_v42, %v7724_v10 }
 0xf36   :  { %v1649_v9 = vpop.permute.xlu1 %1648 }
 0xf37   :  { %v1651_v41 = vmul.f32 %v7101_v39, %v1649_v9 }
 0xf38   :  { %v1744_v43 = vpop.permute.xlu0 %1743 }
 0xf39   :  { %1653 = vrot.lane.b32.xlu1 %v1651_v41, %s7371_s22  ;;  %v1746_v44 = vmul.f32 %v7103_v42, %v1744_v43 }
 0xf3b   :  { %1748 = vrot.lane.b32.xlu0 %v1746_v44, %s7371_s22 }
 0xfab   :  { %v1654_v46 = vpop.permute.xlu1 %1653 }
 0xfac   :  { %v7758_v47 = vadd.f32 %v1654_v46, %v1646_v45  ;;  %v2203_v46 = vld [vmem:[#allocation2 + $0x38] sm:$0xff] }
 0xfad   :  { %v1749_v49 = vpop.permute.xlu0 %1748 }
 0xfae   :  { %7104 = vtanh.f32 %v7758_v47  ;;  %v7762_v50 = vadd.f32 %v1749_v49, %v1741_v48 }
 0xfb0   :  { %7106 = vtanh.f32 %v7762_v50 }
 0xfb8   :  { %v7105_v51 = vpop.eup %7104 }
 0xfb9   :  { %1659 = vrot.lane.b32.xlu1 %v7105_v51, %s7372_s27 }
 0xfba   :  { %v7107_v52 = vpop.eup %7106 }
 0xfbb   :  { %1754 = vrot.lane.b32.xlu0 %v7107_v52, %s7372_s27 }
0x102b   :  { %v1660_v53 = vpop.permute.xlu1 %1659 }
0x102c   :  { %v1662_v54 = vmul.f32 %v7101_v39, %v1660_v53 }
0x102d   :  { %v1755_v55 = vpop.permute.xlu0 %1754 }
0x102e   :  { %1834 = vrot.lane.b32.xlu1 %v1662_v54, %s7373_s28  ;;  %v1757_v56 = vmul.f32 %v7103_v42, %v1755_v55 }
0x1030   :  { %1759 = vrot.lane.b32.xlu0 %v1757_v56, %s7373_s28 }
0x10a0   :  { %v1835_v57 = vpop.permute.xlu1 %1834 }
0x10a1   :  { %6447 = vmatmul.mubr.msk.f32.vlgmr.msra.gmra.mrb[26].mxu1 %vm301_vm7, %v1835_v57 }
0x10a2   :  { %6836 = vmatpush3.bf16.msk.msra.mxu1 %vm7410_vm4, %v7445_v30  ;;  %6460 = vmatprep.mubr.msk.f32.mxu1 %vm7368_vm5, %v7369_v8  ;;  %v1760_v58 = vpop.permute.xlu0 %1759 }
0x10a3   :  { %6841 = vmatprep.subr.bf16.mxu1 %v7366_v5  ;;  %6440 = vmatmul.mubr.msk.f32.vlgmr.msra.gmra.mrb[26].mxu0 %vm301_vm7, %v1760_v58 }
0x10a4   :  { %6832 = vmatpush3.bf16.msk.msra.mxu0 %vm7410_vm4, %v7408_v6  ;;  %6453 = vmatprep.mubr.msk.f32.mxu0 %vm7368_vm5, %v7369_v8 }
0x10a5   :  { %6837 = vmatprep.subr.bf16.mxu0 %v7366_v5 }
0x10a7   :  { %6454 = vmatmul.mubr.msk.f32.vlgmr.msra.gmra.mrb[28].mxu0 %vm301_vm7, %v1760_v58 }
0x10a8   :  { %6840 = vmatpush3.bf16.msk.msra.mxu0 %vm7410_vm4, %v7463_v36  ;;  %6467 = vmatprep.mubr.msk.f32.mxu0 %vm7368_vm5, %v7369_v8 }
0x10a9   :  { %6845 = vmatprep.subr.bf16.mxu0 %v7366_v5 }
0x1174   :  { %v1904_v59 = vpop.f32.mrb[26].mxu1 }
0x1175   :  { %v6448_v60 = vpop.f32.mrb[27].mxu1 }
0x1176   :  { %v1829_v61 = vpop.f32.mrb[26].mxu0 }
0x1177   :  { %v1905_v62 = vadd.f32 %v1904_v59, %v1829_v61  ;;  %v6441_v63 = vpop.f32.mrb[27].mxu0 }
0x1179   :  { %v1908_v0 = vadd.f32 %v7489_v40, %v1905_v62 }
0x117a   :  { %v2000_v2 = vpop.f32.mrb[28].mxu0 }
0x117b   :  { %7108 = vtanh.f32 %v1908_v0  ;;  %v2001_v3 = vadd.f32 %v2000_v2, %v1933_v1  ;;  %v6455_v4 = vpop.f32.mrb[29].mxu0  ;;  %v5965_v12 = vmul.f32 -1.442695, %v1908_v0 }
0x117d   :  { %7110 = vtanh.f32 %v2001_v3  ;;  %v5968_v13 = vmul.f32 -1.442695, %v2001_v3 }
0x117e   :  { %7112 = vpow2.f32 %v5965_v12 }
0x117f   :  { %7114 = vpow2.f32 %v5968_v13 }
0x1185   :  { %v7109_v10 = vpop.eup %7108 }
0x1186   :  { %1918 = vrot.lane.b32.xlu1 %v7109_v10, %s7370_s21 }
0x1187   :  { %v7111_v11 = vpop.eup %7110 }
0x1188   :  { %2013 = vrot.lane.b32.xlu0 %v7111_v11, %s7370_s21  ;;  %v7113_v33 = vpop.eup %7112 }
0x1189   :  { %v7115_v14 = vpop.eup %7114  ;;  %v1912_v15 = vadd.f32 1.0, %v7113_v33 }
0x118a   :  { %v2007_v37 = vadd.f32 1.0, %v7115_v14 }
0x118b   :  { %7116 = vrcp.f32 %v1912_v15 }
0x118c   :  { %7118 = vrcp.f32 %v2007_v37 }
0x1195   :  { %v7117_v16 = vpop.eup %7116 }
0x1196   :  { %v7119_v19 = vpop.eup %7118  ;;  %v1916_v22 = vmul.f32 %v7117_v16, %v7758_v47 }
0x1197   :  { %v2011_v25 = vmul.f32 %v7119_v19, %v7762_v50 }
0x11f8   :  { %v1919_v17 = vpop.permute.xlu1 %1918 }
0x11f9   :  { %v1921_v18 = vmul.f32 %v7117_v16, %v1919_v17 }
0x11fa   :  { %v2014_v20 = vpop.permute.xlu0 %2013 }
0x11fb   :  { %1923 = vrot.lane.b32.xlu1 %v1921_v18, %s7371_s22  ;;  %v2016_v21 = vmul.f32 %v7119_v19, %v2014_v20 }
0x11fd   :  { %2018 = vrot.lane.b32.xlu0 %v2016_v21, %s7371_s22  ;;  %v7869_v21 = vld [vmem:[%s8347_s1 + $0x49] ss:$0 sm:$0xff] }
0x126d   :  { %v1924_v23 = vpop.permute.xlu1 %1923 }
0x126e   :  { %v7796_v24 = vadd.f32 %v1924_v23, %v1916_v22  ;;  %v2473_v23 = vld [vmem:[#allocation2 + $0x40] sm:$0xff] }
0x126f   :  { %v2019_v26 = vpop.permute.xlu0 %2018 }
0x1270   :  { %7120 = vtanh.f32 %v7796_v24  ;;  %v7800_v27 = vadd.f32 %v2019_v26, %v2011_v25 }
0x1272   :  { %7122 = vtanh.f32 %v7800_v27 }
0x127a   :  { %v7121_v28 = vpop.eup %7120 }
0x127b   :  { %1929 = vrot.lane.b32.xlu1 %v7121_v28, %s7372_s27 }
0x127c   :  { %v7123_v29 = vpop.eup %7122 }
0x127d   :  { %2024 = vrot.lane.b32.xlu0 %v7123_v29, %s7372_s27 }
0x12ed   :  { %v1930_v31 = vpop.permute.xlu1 %1929 }
0x12ee   :  { %v1932_v32 = vmul.f32 %v7117_v16, %v1930_v31 }
0x12ef   :  { %v2025_v34 = vpop.permute.xlu0 %2024 }
0x12f0   :  { %2104 = vrot.lane.b32.xlu1 %v1932_v32, %s7373_s28  ;;  %v2027_v35 = vmul.f32 %v7119_v19, %v2025_v34 }
0x12f2   :  { %2029 = vrot.lane.b32.xlu0 %v2027_v35, %s7373_s28 }
0x1362   :  { %v2105_v38 = vpop.permute.xlu1 %2104 }
0x1363   :  { %6468 = vmatmul.mubr.msk.f32.vlgmr.msra.gmra.mrb[30].mxu0 %vm301_vm7, %v2105_v38 }
0x1364   :  { %6848 = vmatpush3.bf16.msk.msra.mxu0 %vm7410_vm4, %v7445_v30  ;;  %6481 = vmatprep.mubr.msk.f32.mxu0 %vm7368_vm5, %v7369_v8  ;;  %v2030_v39 = vpop.permute.xlu0 %2029 }
0x1365   :  { %6853 = vmatprep.subr.bf16.mxu0 %v7366_v5  ;;  %6461 = vmatmul.mubr.msk.f32.vlgmr.msra.gmra.mrb[28].mxu1 %vm301_vm7, %v2030_v39 }
0x1366   :  { %6844 = vmatpush3.bf16.msk.msra.mxu1 %vm7410_vm4, %v7408_v6  ;;  %6474 = vmatprep.mubr.msk.f32.mxu1 %vm7368_vm5, %v7369_v8 }
0x1367   :  { %6849 = vmatprep.subr.bf16.mxu1 %v7366_v5 }
0x1369   :  { %6475 = vmatmul.mubr.msk.f32.vlgmr.msra.gmra.mrb[30].mxu1 %vm301_vm7, %v2030_v39 }
0x136a   :  { %6852 = vmatpush3.bf16.msk.msra.mxu1 %vm7410_vm4, %v7463_v36  ;;  %6488 = vmatprep.mubr.msk.f32.mxu1 %vm7368_vm5, %v7369_v8 }
0x136b   :  { %6857 = vmatprep.subr.bf16.mxu1 %v7366_v5 }
0x1436   :  { %v2174_v9 = vpop.f32.mrb[30].mxu0 }
0x1437   :  { %v6469_v41 = vpop.f32.mrb[31].mxu0 }
0x1438   :  { %v2099_v42 = vpop.f32.mrb[28].mxu1 }
0x1439   :  { %v2175_v43 = vadd.f32 %v2174_v9, %v2099_v42  ;;  %v6462_v44 = vpop.f32.mrb[29].mxu1 }
0x143b   :  { %v2178_v45 = vadd.f32 %v7489_v40, %v2175_v43 }
0x143c   :  { %v2270_v47 = vpop.f32.mrb[30].mxu1 }
0x143d   :  { %7124 = vtanh.f32 %v2178_v45  ;;  %v2271_v48 = vadd.f32 %v2270_v47, %v2203_v46  ;;  %v6476_v49 = vpop.f32.mrb[31].mxu1  ;;  %v5973_v52 = vmul.f32 -1.442695, %v2178_v45 }
0x143f   :  { %7126 = vtanh.f32 %v2271_v48  ;;  %v5976_v53 = vmul.f32 -1.442695, %v2271_v48 }
0x1440   :  { %7128 = vpow2.f32 %v5973_v52 }
0x1441   :  { %7130 = vpow2.f32 %v5976_v53 }
0x1447   :  { %v7125_v50 = vpop.eup %7124 }
0x1448   :  { %2188 = vrot.lane.b32.xlu1 %v7125_v50, %s7370_s21 }
0x1449   :  { %v7127_v51 = vpop.eup %7126 }
0x144a   :  { %2283 = vrot.lane.b32.xlu0 %v7127_v51, %s7370_s21  ;;  %v7129_v54 = vpop.eup %7128 }
0x144b   :  { %v7131_v55 = vpop.eup %7130  ;;  %v2182_v56 = vadd.f32 1.0, %v7129_v54 }
0x144c   :  { %v2277_v40 = vadd.f32 1.0, %v7131_v55 }
0x144d   :  { %7132 = vrcp.f32 %v2182_v56 }
0x144e   :  { %7134 = vrcp.f32 %v2277_v40 }
0x1457   :  { %v7133_v57 = vpop.eup %7132 }
0x1458   :  { %v7135_v60 = vpop.eup %7134  ;;  %v2186_v63 = vmul.f32 %v7133_v57, %v7796_v24 }
0x1459   :  { %v2281_v2 = vmul.f32 %v7135_v60, %v7800_v27 }
0x14ba   :  { %v2189_v58 = vpop.permute.xlu1 %2188 }
0x14bb   :  { %v2191_v59 = vmul.f32 %v7133_v57, %v2189_v58 }
0x14bc   :  { %v2284_v61 = vpop.permute.xlu0 %2283 }
0x14bd   :  { %2193 = vrot.lane.b32.xlu1 %v2191_v59, %s7371_s22  ;;  %v2286_v62 = vmul.f32 %v7135_v60, %v2284_v61 }
0x14bf   :  { %2288 = vrot.lane.b32.xlu0 %v2286_v62, %s7371_s22 }
0x152f   :  { %v2194_v0 = vpop.permute.xlu1 %2193 }
0x1530   :  { %v7834_v1 = vadd.f32 %v2194_v0, %v2186_v63  ;;  %v2743_v0 = vld [vmem:[#allocation2 + $0x48] sm:$0xff] }
0x1531   :  { %v2289_v3 = vpop.permute.xlu0 %2288 }
0x1532   :  { %7136 = vtanh.f32 %v7834_v1  ;;  %v7838_v4 = vadd.f32 %v2289_v3, %v2281_v2 }
0x1534   :  { %7138 = vtanh.f32 %v7838_v4 }
0x153c   :  { %v7137_v10 = vpop.eup %7136 }
0x153d   :  { %2199 = vrot.lane.b32.xlu1 %v7137_v10, %s7372_s27 }
0x153e   :  { %v7139_v11 = vpop.eup %7138 }
0x153f   :  { %2294 = vrot.lane.b32.xlu0 %v7139_v11, %s7372_s27 }
0x15af   :  { %v2200_v12 = vpop.permute.xlu1 %2199 }
0x15b0   :  { %v2202_v13 = vmul.f32 %v7133_v57, %v2200_v12 }
0x15b1   :  { %v2295_v33 = vpop.permute.xlu0 %2294 }
0x15b2   :  { %2374 = vrot.lane.b32.xlu1 %v2202_v13, %s7373_s28  ;;  %v2297_v14 = vmul.f32 %v7135_v60, %v2295_v33 }
0x15b4   :  { %2299 = vrot.lane.b32.xlu0 %v2297_v14, %s7373_s28 }
0x1624   :  { %v2375_v15 = vpop.permute.xlu1 %2374 }
0x1625   :  { %6489 = vmatmul.mubr.msk.f32.vlgmr.msra.gmra.mrb[32].mxu1 %vm301_vm7, %v2375_v15 }
0x1626   :  { %6860 = vmatpush3.bf16.msk.msra.mxu1 %vm7410_vm4, %v7445_v30  ;;  %6502 = vmatprep.mubr.msk.f32.mxu1 %vm7368_vm5, %v7369_v8  ;;  %v2300_v37 = vpop.permute.xlu0 %2299 }
0x1627   :  { %6865 = vmatprep.subr.bf16.mxu1 %v7366_v5  ;;  %6482 = vmatmul.mubr.msk.f32.vlgmr.msra.gmra.mrb[32].mxu0 %vm301_vm7, %v2300_v37 }
0x1628   :  { %6856 = vmatpush3.bf16.msk.msra.mxu0 %vm7410_vm4, %v7408_v6  ;;  %6495 = vmatprep.mubr.msk.f32.mxu0 %vm7368_vm5, %v7369_v8 }
0x1629   :  { %6861 = vmatprep.subr.bf16.mxu0 %v7366_v5 }
0x162b   :  { %6496 = vmatmul.mubr.msk.f32.vlgmr.msra.gmra.mrb[34].mxu0 %vm301_vm7, %v2300_v37 }
0x162c   :  { %6864 = vmatpush3.bf16.msk.msra.mxu0 %vm7410_vm4, %v7463_v36  ;;  %6509 = vmatprep.mubr.msk.f32.mxu0 %vm7368_vm5, %v7369_v8 }
0x162d   :  { %6869 = vmatprep.subr.bf16.mxu0 %v7366_v5 }
0x16f8   :  { %v2444_v16 = vpop.f32.mrb[32].mxu1 }
0x16f9   :  { %v6490_v17 = vpop.f32.mrb[33].mxu1 }
0x16fa   :  { %v2369_v18 = vpop.f32.mrb[32].mxu0 }
0x16fb   :  { %v2445_v19 = vadd.f32 %v2444_v16, %v2369_v18  ;;  %v6483_v20 = vpop.f32.mrb[33].mxu0 }
0x16fd   :  { %v2448_v22 = vadd.f32 %v7869_v21, %v2445_v19 }
0x16fe   :  { %v2540_v24 = vpop.f32.mrb[34].mxu0 }
0x16ff   :  { %7140 = vtanh.f32 %v2448_v22  ;;  %v2541_v25 = vadd.f32 %v2540_v24, %v2473_v23  ;;  %v6497_v26 = vpop.f32.mrb[35].mxu0  ;;  %v5981_v29 = vmul.f32 -1.442695, %v2448_v22 }
0x1701   :  { %7142 = vtanh.f32 %v2541_v25  ;;  %v5984_v31 = vmul.f32 -1.442695, %v2541_v25 }
0x1702   :  { %7144 = vpow2.f32 %v5981_v29 }
0x1703   :  { %7146 = vpow2.f32 %v5984_v31 }
0x1709   :  { %v7141_v27 = vpop.eup %7140 }
0x170a   :  { %2458 = vrot.lane.b32.xlu1 %v7141_v27, %s7370_s21 }
0x170b   :  { %v7143_v28 = vpop.eup %7142 }
0x170c   :  { %2553 = vrot.lane.b32.xlu0 %v7143_v28, %s7370_s21  ;;  %v7145_v32 = vpop.eup %7144 }
0x170d   :  { %v7147_v34 = vpop.eup %7146  ;;  %v2452_v35 = vadd.f32 1.0, %v7145_v32 }
0x170e   :  { %v2547_v38 = vadd.f32 1.0, %v7147_v34 }
0x170f   :  { %7148 = vrcp.f32 %v2452_v35 }
0x1710   :  { %7150 = vrcp.f32 %v2547_v38 }
0x1719   :  { %v7149_v39 = vpop.eup %7148 }
0x171a   :  { %v7151_v42 = vpop.eup %7150  ;;  %v2456_v45 = vmul.f32 %v7149_v39, %v7834_v1 }
0x171b   :  { %v2551_v48 = vmul.f32 %v7151_v42, %v7838_v4 }
0x177c   :  { %v2459_v9 = vpop.permute.xlu1 %2458 }
0x177d   :  { %v2461_v41 = vmul.f32 %v7149_v39, %v2459_v9 }
0x177e   :  { %v2554_v43 = vpop.permute.xlu0 %2553 }
0x177f   :  { %2463 = vrot.lane.b32.xlu1 %v2461_v41, %s7371_s22  ;;  %v2556_v44 = vmul.f32 %v7151_v42, %v2554_v43 }
0x1781   :  { %2558 = vrot.lane.b32.xlu0 %v2556_v44, %s7371_s22 }
0x17f1   :  { %v2464_v46 = vpop.permute.xlu1 %2463 }
0x17f2   :  { %v7877_v47 = vadd.f32 %v2464_v46, %v2456_v45  ;;  %v3013_v46 = vld [vmem:[#allocation2 + $0x50] sm:$0xff] }
0x17f3   :  { %v2559_v49 = vpop.permute.xlu0 %2558 }
0x17f4   :  { %7152 = vtanh.f32 %v7877_v47  ;;  %v7881_v50 = vadd.f32 %v2559_v49, %v2551_v48 }
0x17f6   :  { %7154 = vtanh.f32 %v7881_v50 }
0x17fe   :  { %v7153_v51 = vpop.eup %7152 }
0x17ff   :  { %2469 = vrot.lane.b32.xlu1 %v7153_v51, %s7372_s27 }
0x1800   :  { %v7155_v52 = vpop.eup %7154 }
0x1801   :  { %2564 = vrot.lane.b32.xlu0 %v7155_v52, %s7372_s27 }
0x1871   :  { %v2470_v53 = vpop.permute.xlu1 %2469 }
0x1872   :  { %v2472_v54 = vmul.f32 %v7149_v39, %v2470_v53 }
0x1873   :  { %v2565_v55 = vpop.permute.xlu0 %2564 }
0x1874   :  { %2644 = vrot.lane.b32.xlu1 %v2472_v54, %s7373_s28  ;;  %v2567_v56 = vmul.f32 %v7151_v42, %v2565_v55 }
0x1876   :  { %2569 = vrot.lane.b32.xlu0 %v2567_v56, %s7373_s28 }
0x18e6   :  { %v2645_v40 = vpop.permute.xlu1 %2644 }
0x18e7   :  { %6510 = vmatmul.mubr.msk.f32.vlgmr.msra.gmra.mrb[36].mxu0 %vm301_vm7, %v2645_v40 }
0x18e8   :  { %6872 = vmatpush3.bf16.msk.msra.mxu0 %vm7410_vm4, %v7445_v30  ;;  %6523 = vmatprep.mubr.msk.f32.mxu0 %vm7368_vm5, %v7369_v8  ;;  %v2570_v57 = vpop.permute.xlu0 %2569 }
0x18e9   :  { %6877 = vmatprep.subr.bf16.mxu0 %v7366_v5  ;;  %6503 = vmatmul.mubr.msk.f32.vlgmr.msra.gmra.mrb[34].mxu1 %vm301_vm7, %v2570_v57 }
0x18ea   :  { %6868 = vmatpush3.bf16.msk.msra.mxu1 %vm7410_vm4, %v7408_v6  ;;  %6516 = vmatprep.mubr.msk.f32.mxu1 %vm7368_vm5, %v7369_v8 }
0x18eb   :  { %6873 = vmatprep.subr.bf16.mxu1 %v7366_v5 }
0x18ed   :  { %6517 = vmatmul.mubr.msk.f32.vlgmr.msra.gmra.mrb[36].mxu1 %vm301_vm7, %v2570_v57 }
0x18ee   :  { %6876 = vmatpush3.bf16.msk.msra.mxu1 %vm7410_vm4, %v7463_v36  ;;  %6530 = vmatprep.mubr.msk.f32.mxu1 %vm7368_vm5, %v7369_v8 }
0x18ef   :  { %6881 = vmatprep.subr.bf16.mxu1 %v7366_v5 }
0x19ba   :  { %v2714_v58 = vpop.f32.mrb[36].mxu0 }
0x19bb   :  { %v6511_v59 = vpop.f32.mrb[37].mxu0 }
0x19bc   :  { %v2639_v60 = vpop.f32.mrb[34].mxu1 }
0x19bd   :  { %v2715_v61 = vadd.f32 %v2714_v58, %v2639_v60  ;;  %v6504_v62 = vpop.f32.mrb[35].mxu1 }
0x19bf   :  { %v2718_v63 = vadd.f32 %v7869_v21, %v2715_v61 }
0x19c0   :  { %v2810_v1 = vpop.f32.mrb[36].mxu1 }
0x19c1   :  { %7156 = vtanh.f32 %v2718_v63  ;;  %v2811_v2 = vadd.f32 %v2810_v1, %v2743_v0  ;;  %v6518_v3 = vpop.f32.mrb[37].mxu1  ;;  %v5989_v11 = vmul.f32 -1.442695, %v2718_v63 }
0x19c3   :  { %7158 = vtanh.f32 %v2811_v2  ;;  %v5992_v12 = vmul.f32 -1.442695, %v2811_v2 }
0x19c4   :  { %7160 = vpow2.f32 %v5989_v11 }
0x19c5   :  { %7162 = vpow2.f32 %v5992_v12 }
0x19cb   :  { %v7157_v4 = vpop.eup %7156 }
0x19cc   :  { %2728 = vrot.lane.b32.xlu1 %v7157_v4, %s7370_s21 }
0x19cd   :  { %v7159_v10 = vpop.eup %7158 }
0x19ce   :  { %2823 = vrot.lane.b32.xlu0 %v7159_v10, %s7370_s21  ;;  %v7161_v13 = vpop.eup %7160 }
0x19cf   :  { %v7163_v33 = vpop.eup %7162  ;;  %v2722_v14 = vadd.f32 1.0, %v7161_v13 }
0x19d0   :  { %v2817_v15 = vadd.f32 1.0, %v7163_v33 }
0x19d1   :  { %7164 = vrcp.f32 %v2722_v14 }
0x19d2   :  { %7166 = vrcp.f32 %v2817_v15 }
0x19db   :  { %v7165_v37 = vpop.eup %7164 }
0x19dc   :  { %v7167_v18 = vpop.eup %7166  ;;  %v2726_v22 = vmul.f32 %v7165_v37, %v7877_v47 }
0x19dd   :  { %v2821_v25 = vmul.f32 %v7167_v18, %v7881_v50 }
0x1a3e   :  { %v2729_v16 = vpop.permute.xlu1 %2728 }
0x1a3f   :  { %v2731_v17 = vmul.f32 %v7165_v37, %v2729_v16 }
0x1a40   :  { %v2824_v19 = vpop.permute.xlu0 %2823 }
0x1a41   :  { %2733 = vrot.lane.b32.xlu1 %v2731_v17, %s7371_s22  ;;  %v2826_v20 = vmul.f32 %v7167_v18, %v2824_v19 }
0x1a43   :  { %2828 = vrot.lane.b32.xlu0 %v2826_v20, %s7371_s22 }
0x1ab3   :  { %v2734_v23 = vpop.permute.xlu1 %2733 }
0x1ab4   :  { %v7915_v24 = vadd.f32 %v2734_v23, %v2726_v22  ;;  %v3283_v23 = vld [vmem:[#allocation2 + $0x58] sm:$0xff] }
0x1ab5   :  { %v2829_v26 = vpop.permute.xlu0 %2828 }
0x1ab6   :  { %7168 = vtanh.f32 %v7915_v24  ;;  %v7919_v27 = vadd.f32 %v2829_v26, %v2821_v25 }
0x1ab8   :  { %7170 = vtanh.f32 %v7919_v27 }
0x1ac0   :  { %v7169_v28 = vpop.eup %7168 }
0x1ac1   :  { %2739 = vrot.lane.b32.xlu1 %v7169_v28, %s7372_s27 }
0x1ac2   :  { %v7171_v29 = vpop.eup %7170 }
0x1ac3   :  { %2834 = vrot.lane.b32.xlu0 %v7171_v29, %s7372_s27 }
0x1b33   :  { %v2740_v31 = vpop.permute.xlu1 %2739 }
0x1b34   :  { %v2742_v32 = vmul.f32 %v7165_v37, %v2740_v31 }
0x1b35   :  { %v2835_v34 = vpop.permute.xlu0 %2834 }
0x1b36   :  { %2914 = vrot.lane.b32.xlu1 %v2742_v32, %s7373_s28  ;;  %v2837_v35 = vmul.f32 %v7167_v18, %v2835_v34 }
0x1b38   :  { %2839 = vrot.lane.b32.xlu0 %v2837_v35, %s7373_s28 }
0x1ba8   :  { %v2915_v38 = vpop.permute.xlu1 %2914 }
0x1ba9   :  { %6531 = vmatmul.mubr.msk.f32.vlgmr.msra.gmra.mrb[38].mxu1 %vm301_vm7, %v2915_v38 }
0x1baa   :  { %6884 = vmatpush3.bf16.msk.msra.mxu1 %vm7410_vm4, %v7445_v30  ;;  %6544 = vmatprep.mubr.msk.f32.mxu1 %vm7368_vm5, %v7369_v8  ;;  %v2840_v39 = vpop.permute.xlu0 %2839 }
0x1bab   :  { %6889 = vmatprep.subr.bf16.mxu1 %v7366_v5  ;;  %6524 = vmatmul.mubr.msk.f32.vlgmr.msra.gmra.mrb[38].mxu0 %vm301_vm7, %v2840_v39 }
0x1bac   :  { %6880 = vmatpush3.bf16.msk.msra.mxu0 %vm7410_vm4, %v7408_v6  ;;  %6537 = vmatprep.mubr.msk.f32.mxu0 %vm7368_vm5, %v7369_v8 }
0x1bad   :  { %6885 = vmatprep.subr.bf16.mxu0 %v7366_v5 }
0x1baf   :  { %6538 = vmatmul.mubr.msk.f32.vlgmr.msra.gmra.mrb[40].mxu0 %vm301_vm7, %v2840_v39 }
0x1bb0   :  { %6888 = vmatpush3.bf16.msk.msra.mxu0 %vm7410_vm4, %v7463_v36  ;;  %6551 = vmatprep.mubr.msk.f32.mxu0 %vm7368_vm5, %v7369_v8 }
0x1bb1   :  { %6893 = vmatprep.subr.bf16.mxu0 %v7366_v5 }
0x1c7c   :  { %v2984_v9 = vpop.f32.mrb[38].mxu1 }
0x1c7d   :  { %v6532_v41 = vpop.f32.mrb[39].mxu1 }
0x1c7e   :  { %v2909_v42 = vpop.f32.mrb[38].mxu0 }
0x1c7f   :  { %v2985_v43 = vadd.f32 %v2984_v9, %v2909_v42  ;;  %v6525_v44 = vpop.f32.mrb[39].mxu0 }
0x1c81   :  { %v2988_v45 = vadd.f32 %v7869_v21, %v2985_v43 }
0x1c82   :  { %v3080_v47 = vpop.f32.mrb[40].mxu0 }
0x1c83   :  { %7172 = vtanh.f32 %v2988_v45  ;;  %v3081_v48 = vadd.f32 %v3080_v47, %v3013_v46  ;;  %v6539_v49 = vpop.f32.mrb[41].mxu0  ;;  %v5997_v52 = vmul.f32 -1.442695, %v2988_v45 }
0x1c85   :  { %7174 = vtanh.f32 %v3081_v48  ;;  %v6000_v53 = vmul.f32 -1.442695, %v3081_v48 }
0x1c86   :  { %7176 = vpow2.f32 %v5997_v52 }
0x1c87   :  { %7178 = vpow2.f32 %v6000_v53 }
0x1c8d   :  { %v7173_v50 = vpop.eup %7172 }
0x1c8e   :  { %2998 = vrot.lane.b32.xlu1 %v7173_v50, %s7370_s21 }
0x1c8f   :  { %v7175_v51 = vpop.eup %7174 }
0x1c90   :  { %3093 = vrot.lane.b32.xlu0 %v7175_v51, %s7370_s21  ;;  %v7177_v54 = vpop.eup %7176 }
0x1c91   :  { %v7179_v55 = vpop.eup %7178  ;;  %v2992_v56 = vadd.f32 1.0, %v7177_v54 }
0x1c92   :  { %v3087_v40 = vadd.f32 1.0, %v7179_v55 }
0x1c93   :  { %7180 = vrcp.f32 %v2992_v56 }
0x1c94   :  { %7182 = vrcp.f32 %v3087_v40 }
0x1c9d   :  { %v7181_v57 = vpop.eup %7180 }
0x1c9e   :  { %v7183_v60 = vpop.eup %7182  ;;  %v2996_v63 = vmul.f32 %v7181_v57, %v7915_v24 }
0x1c9f   :  { %v3091_v2 = vmul.f32 %v7183_v60, %v7919_v27 }
0x1d00   :  { %v2999_v58 = vpop.permute.xlu1 %2998 }
0x1d01   :  { %v3001_v59 = vmul.f32 %v7181_v57, %v2999_v58 }
0x1d02   :  { %v3094_v61 = vpop.permute.xlu0 %3093 }
0x1d03   :  { %3003 = vrot.lane.b32.xlu1 %v3001_v59, %s7371_s22  ;;  %v3096_v62 = vmul.f32 %v7183_v60, %v3094_v61 }
0x1d05   :  { %3098 = vrot.lane.b32.xlu0 %v3096_v62, %s7371_s22 }
0x1d75   :  { %v3004_v0 = vpop.permute.xlu1 %3003 }
0x1d76   :  { %v7953_v1 = vadd.f32 %v3004_v0, %v2996_v63  ;;  %v3553_v0 = vld [vmem:[#allocation2 + $0x60] sm:$0xff] }
0x1d77   :  { %v3099_v3 = vpop.permute.xlu0 %3098 }
0x1d78   :  { %7184 = vtanh.f32 %v7953_v1  ;;  %v7957_v4 = vadd.f32 %v3099_v3, %v3091_v2 }
0x1d7a   :  { %7186 = vtanh.f32 %v7957_v4 }
0x1d82   :  { %v7185_v10 = vpop.eup %7184 }
0x1d83   :  { %3009 = vrot.lane.b32.xlu1 %v7185_v10, %s7372_s27 }
0x1d84   :  { %v7187_v11 = vpop.eup %7186 }
0x1d85   :  { %3104 = vrot.lane.b32.xlu0 %v7187_v11, %s7372_s27 }
0x1df5   :  { %v3010_v12 = vpop.permute.xlu1 %3009 }
0x1df6   :  { %v3012_v13 = vmul.f32 %v7181_v57, %v3010_v12 }
0x1df7   :  { %v3105_v33 = vpop.permute.xlu0 %3104 }
0x1df8   :  { %3184 = vrot.lane.b32.xlu1 %v3012_v13, %s7373_s28  ;;  %v3107_v14 = vmul.f32 %v7183_v60, %v3105_v33 }
0x1dfa   :  { %3109 = vrot.lane.b32.xlu0 %v3107_v14, %s7373_s28 }
0x1e6a   :  { %v3185_v15 = vpop.permute.xlu1 %3184 }
0x1e6b   :  { %6552 = vmatmul.mubr.msk.f32.vlgmr.msra.gmra.mrb[42].mxu0 %vm301_vm7, %v3185_v15 }
0x1e6c   :  { %6896 = vmatpush3.bf16.msk.msra.mxu0 %vm7410_vm4, %v7445_v30  ;;  %6565 = vmatprep.mubr.msk.f32.mxu0 %vm7368_vm5, %v7369_v8  ;;  %v3110_v37 = vpop.permute.xlu0 %3109 }
0x1e6d   :  { %6901 = vmatprep.subr.bf16.mxu0 %v7366_v5  ;;  %6545 = vmatmul.mubr.msk.f32.vlgmr.msra.gmra.mrb[40].mxu1 %vm301_vm7, %v3110_v37 }
0x1e6e   :  { %6892 = vmatpush3.bf16.msk.msra.mxu1 %vm7410_vm4, %v7408_v6  ;;  %6558 = vmatprep.mubr.msk.f32.mxu1 %vm7368_vm5, %v7369_v8 }
0x1e6f   :  { %6897 = vmatprep.subr.bf16.mxu1 %v7366_v5 }
0x1e71   :  { %6559 = vmatmul.mubr.msk.f32.vlgmr.msra.gmra.mrb[42].mxu1 %vm301_vm7, %v3110_v37 }
0x1e72   :  { %6900 = vmatpush3.bf16.msk.msra.mxu1 %vm7410_vm4, %v7463_v36  ;;  %6572 = vmatprep.mubr.msk.f32.mxu1 %vm7368_vm5, %v7369_v8 }
0x1e73   :  { %6905 = vmatprep.subr.bf16.mxu1 %v7366_v5 }
0x1f3e   :  { %v3254_v16 = vpop.f32.mrb[42].mxu0 }
0x1f3f   :  { %v6553_v17 = vpop.f32.mrb[43].mxu0 }
0x1f40   :  { %v3179_v18 = vpop.f32.mrb[40].mxu1 }
0x1f41   :  { %v3255_v19 = vadd.f32 %v3254_v16, %v3179_v18  ;;  %v6546_v20 = vpop.f32.mrb[41].mxu1 }
0x1f43   :  { %v3258_v22 = vadd.f32 %v7869_v21, %v3255_v19 }
0x1f44   :  { %v3350_v24 = vpop.f32.mrb[42].mxu1 }
0x1f45   :  { %7188 = vtanh.f32 %v3258_v22  ;;  %v3351_v25 = vadd.f32 %v3350_v24, %v3283_v23  ;;  %v6560_v26 = vpop.f32.mrb[43].mxu1  ;;  %v6005_v29 = vmul.f32 -1.442695, %v3258_v22 }
0x1f47   :  { %7190 = vtanh.f32 %v3351_v25  ;;  %v6008_v31 = vmul.f32 -1.442695, %v3351_v25 }
0x1f48   :  { %7192 = vpow2.f32 %v6005_v29 }
0x1f49   :  { %7194 = vpow2.f32 %v6008_v31 }
0x1f4f   :  { %v7189_v27 = vpop.eup %7188 }
0x1f50   :  { %3268 = vrot.lane.b32.xlu1 %v7189_v27, %s7370_s21 }
0x1f51   :  { %v7191_v28 = vpop.eup %7190 }
0x1f52   :  { %3363 = vrot.lane.b32.xlu0 %v7191_v28, %s7370_s21  ;;  %v7193_v32 = vpop.eup %7192 }
0x1f53   :  { %v7195_v34 = vpop.eup %7194  ;;  %v3262_v35 = vadd.f32 1.0, %v7193_v32 }
0x1f54   :  { %v3357_v38 = vadd.f32 1.0, %v7195_v34 }
0x1f55   :  { %7196 = vrcp.f32 %v3262_v35 }
0x1f56   :  { %7198 = vrcp.f32 %v3357_v38 }
0x1f5f   :  { %v7197_v39 = vpop.eup %7196 }
0x1f60   :  { %v7199_v42 = vpop.eup %7198  ;;  %v3266_v45 = vmul.f32 %v7197_v39, %v7953_v1 }
0x1f61   :  { %v3361_v48 = vmul.f32 %v7199_v42, %v7957_v4 }
0x1fc2   :  { %v3269_v9 = vpop.permute.xlu1 %3268 }
0x1fc3   :  { %v3271_v41 = vmul.f32 %v7197_v39, %v3269_v9 }
0x1fc4   :  { %v3364_v43 = vpop.permute.xlu0 %3363 }
0x1fc5   :  { %3273 = vrot.lane.b32.xlu1 %v3271_v41, %s7371_s22  ;;  %v3366_v44 = vmul.f32 %v7199_v42, %v3364_v43 }
0x1fc7   :  { %3368 = vrot.lane.b32.xlu0 %v3366_v44, %s7371_s22 }
0x2037   :  { %v3274_v46 = vpop.permute.xlu1 %3273 }
0x2038   :  { %v7991_v47 = vadd.f32 %v3274_v46, %v3266_v45  ;;  %v3823_v46 = vld [vmem:[#allocation2 + $0x68] sm:$0xff] }
0x2039   :  { %v3369_v49 = vpop.permute.xlu0 %3368 }
0x203a   :  { %7200 = vtanh.f32 %v7991_v47  ;;  %v7995_v50 = vadd.f32 %v3369_v49, %v3361_v48 }
0x203c   :  { %7202 = vtanh.f32 %v7995_v50 }
0x2044   :  { %v7201_v51 = vpop.eup %7200 }
0x2045   :  { %3279 = vrot.lane.b32.xlu1 %v7201_v51, %s7372_s27 }
0x2046   :  { %v7203_v52 = vpop.eup %7202 }
0x2047   :  { %3374 = vrot.lane.b32.xlu0 %v7203_v52, %s7372_s27 }
0x20b7   :  { %v3280_v53 = vpop.permute.xlu1 %3279 }
0x20b8   :  { %v3282_v54 = vmul.f32 %v7197_v39, %v3280_v53 }
0x20b9   :  { %v3375_v55 = vpop.permute.xlu0 %3374 }
0x20ba   :  { %3454 = vrot.lane.b32.xlu1 %v3282_v54, %s7373_s28  ;;  %v3377_v56 = vmul.f32 %v7199_v42, %v3375_v55 }
0x20bc   :  { %3379 = vrot.lane.b32.xlu0 %v3377_v56, %s7373_s28 }
0x212c   :  { %v3455_v40 = vpop.permute.xlu1 %3454 }
0x212d   :  { %6573 = vmatmul.mubr.msk.f32.vlgmr.msra.gmra.mrb[44].mxu1 %vm301_vm7, %v3455_v40 }
0x212e   :  { %6908 = vmatpush3.bf16.msk.msra.mxu1 %vm7410_vm4, %v7445_v30  ;;  %6586 = vmatprep.mubr.msk.f32.mxu1 %vm7368_vm5, %v7369_v8  ;;  %v3380_v57 = vpop.permute.xlu0 %3379 }
0x212f   :  { %6913 = vmatprep.subr.bf16.mxu1 %v7366_v5  ;;  %6566 = vmatmul.mubr.msk.f32.vlgmr.msra.gmra.mrb[44].mxu0 %vm301_vm7, %v3380_v57 }
0x2130   :  { %6904 = vmatpush3.bf16.msk.msra.mxu0 %vm7410_vm4, %v7408_v6  ;;  %6579 = vmatprep.mubr.msk.f32.mxu0 %vm7368_vm5, %v7369_v8 }
0x2131   :  { %6909 = vmatprep.subr.bf16.mxu0 %v7366_v5 }
0x2133   :  { %6580 = vmatmul.mubr.msk.f32.vlgmr.msra.gmra.mrb[46].mxu0 %vm301_vm7, %v3380_v57 }
0x2134   :  { %6912 = vmatpush3.bf16.msk.msra.mxu0 %vm7410_vm4, %v7463_v36  ;;  %6593 = vmatprep.mubr.msk.f32.mxu0 %vm7368_vm5, %v7369_v8 }
0x2135   :  { %6917 = vmatprep.subr.bf16.mxu0 %v7366_v5 }
0x2200   :  { %v3524_v58 = vpop.f32.mrb[44].mxu1 }
0x2201   :  { %v6574_v59 = vpop.f32.mrb[45].mxu1 }
0x2202   :  { %v3449_v60 = vpop.f32.mrb[44].mxu0 }
0x2203   :  { %v3525_v61 = vadd.f32 %v3524_v58, %v3449_v60  ;;  %v6567_v62 = vpop.f32.mrb[45].mxu0 }
0x2205   :  { %v3528_v63 = vadd.f32 %v7869_v21, %v3525_v61 }
0x2206   :  { %v3620_v1 = vpop.f32.mrb[46].mxu0 }
0x2207   :  { %7204 = vtanh.f32 %v3528_v63  ;;  %v3621_v2 = vadd.f32 %v3620_v1, %v3553_v0  ;;  %v6581_v3 = vpop.f32.mrb[47].mxu0  ;;  %v6013_v11 = vmul.f32 -1.442695, %v3528_v63 }
0x2209   :  { %7206 = vtanh.f32 %v3621_v2  ;;  %v6016_v12 = vmul.f32 -1.442695, %v3621_v2 }
0x220a   :  { %7208 = vpow2.f32 %v6013_v11 }
0x220b   :  { %7210 = vpow2.f32 %v6016_v12 }
0x2211   :  { %v7205_v4 = vpop.eup %7204 }
0x2212   :  { %3538 = vrot.lane.b32.xlu1 %v7205_v4, %s7370_s21 }
0x2213   :  { %v7207_v10 = vpop.eup %7206 }
0x2214   :  { %3633 = vrot.lane.b32.xlu0 %v7207_v10, %s7370_s21  ;;  %v7209_v13 = vpop.eup %7208 }
0x2215   :  { %v7211_v33 = vpop.eup %7210  ;;  %v3532_v14 = vadd.f32 1.0, %v7209_v13 }
0x2216   :  { %v3627_v15 = vadd.f32 1.0, %v7211_v33 }
0x2217   :  { %7212 = vrcp.f32 %v3532_v14 }
0x2218   :  { %7214 = vrcp.f32 %v3627_v15 }
0x2221   :  { %v7213_v37 = vpop.eup %7212 }
0x2222   :  { %v7215_v18 = vpop.eup %7214  ;;  %v3536_v22 = vmul.f32 %v7213_v37, %v7991_v47 }
0x2223   :  { %v3631_v25 = vmul.f32 %v7215_v18, %v7995_v50 }
0x2284   :  { %v3539_v16 = vpop.permute.xlu1 %3538 }
0x2285   :  { %v3541_v17 = vmul.f32 %v7213_v37, %v3539_v16 }
0x2286   :  { %v3634_v19 = vpop.permute.xlu0 %3633 }
0x2287   :  { %3543 = vrot.lane.b32.xlu1 %v3541_v17, %s7371_s22  ;;  %v3636_v20 = vmul.f32 %v7215_v18, %v3634_v19 }
0x2289   :  { %3638 = vrot.lane.b32.xlu0 %v3636_v20, %s7371_s22 }
0x22f9   :  { %v3544_v23 = vpop.permute.xlu1 %3543 }
0x22fa   :  { %v8029_v24 = vadd.f32 %v3544_v23, %v3536_v22  ;;  %v4093_v23 = vld [vmem:[#allocation2 + $0x70] sm:$0xff] }
0x22fb   :  { %v3639_v26 = vpop.permute.xlu0 %3638 }
0x22fc   :  { %7216 = vtanh.f32 %v8029_v24  ;;  %v8033_v27 = vadd.f32 %v3639_v26, %v3631_v25 }
0x22fe   :  { %7218 = vtanh.f32 %v8033_v27 }
0x2306   :  { %v7217_v28 = vpop.eup %7216 }
0x2307   :  { %3549 = vrot.lane.b32.xlu1 %v7217_v28, %s7372_s27 }
0x2308   :  { %v7219_v29 = vpop.eup %7218 }
0x2309   :  { %3644 = vrot.lane.b32.xlu0 %v7219_v29, %s7372_s27 }
0x2379   :  { %v3550_v31 = vpop.permute.xlu1 %3549 }
0x237a   :  { %v3552_v32 = vmul.f32 %v7213_v37, %v3550_v31 }
0x237b   :  { %v3645_v34 = vpop.permute.xlu0 %3644 }
0x237c   :  { %3724 = vrot.lane.b32.xlu1 %v3552_v32, %s7373_s28  ;;  %v3647_v35 = vmul.f32 %v7215_v18, %v3645_v34 }
0x237e   :  { %3649 = vrot.lane.b32.xlu0 %v3647_v35, %s7373_s28 }
0x23ee   :  { %v3725_v38 = vpop.permute.xlu1 %3724 }
0x23ef   :  { %6594 = vmatmul.mubr.msk.f32.vlgmr.msra.gmra.mrb[48].mxu0 %vm301_vm7, %v3725_v38 }
0x23f0   :  { %6920 = vmatpush3.bf16.msk.msra.mxu0 %vm7410_vm4, %v7445_v30  ;;  %6607 = vmatprep.mubr.msk.f32.mxu0 %vm7368_vm5, %v7369_v8  ;;  %v3650_v39 = vpop.permute.xlu0 %3649 }
0x23f1   :  { %6925 = vmatprep.subr.bf16.mxu0 %v7366_v5  ;;  %6587 = vmatmul.mubr.msk.f32.vlgmr.msra.gmra.mrb[46].mxu1 %vm301_vm7, %v3650_v39 }
0x23f2   :  { %6916 = vmatpush3.bf16.msk.msra.mxu1 %vm7410_vm4, %v7408_v6  ;;  %6600 = vmatprep.mubr.msk.f32.mxu1 %vm7368_vm5, %v7369_v8 }
0x23f3   :  { %6921 = vmatprep.subr.bf16.mxu1 %v7366_v5 }
0x23f5   :  { %6601 = vmatmul.mubr.msk.f32.vlgmr.msra.gmra.mrb[48].mxu1 %vm301_vm7, %v3650_v39 }
0x23f6   :  { %6924 = vmatpush3.bf16.msk.msra.mxu1 %vm7410_vm4, %v7463_v36  ;;  %6614 = vmatprep.mubr.msk.f32.mxu1 %vm7368_vm5, %v7369_v8 }
0x23f7   :  { %6929 = vmatprep.subr.bf16.mxu1 %v7366_v5 }
0x24c2   :  { %v3794_v9 = vpop.f32.mrb[48].mxu0 }
0x24c3   :  { %v6595_v41 = vpop.f32.mrb[49].mxu0 }
0x24c4   :  { %v3719_v42 = vpop.f32.mrb[46].mxu1 }
0x24c5   :  { %v3795_v43 = vadd.f32 %v3794_v9, %v3719_v42  ;;  %v6588_v44 = vpop.f32.mrb[47].mxu1 }
0x24c7   :  { %v3798_v45 = vadd.f32 %v7869_v21, %v3795_v43 }
0x24c8   :  { %v3890_v47 = vpop.f32.mrb[48].mxu1 }
0x24c9   :  { %7220 = vtanh.f32 %v3798_v45  ;;  %v3891_v48 = vadd.f32 %v3890_v47, %v3823_v46  ;;  %v6602_v49 = vpop.f32.mrb[49].mxu1  ;;  %v6021_v52 = vmul.f32 -1.442695, %v3798_v45 }
0x24cb   :  { %7222 = vtanh.f32 %v3891_v48  ;;  %v6024_v53 = vmul.f32 -1.442695, %v3891_v48 }
0x24cc   :  { %7224 = vpow2.f32 %v6021_v52 }
0x24cd   :  { %7226 = vpow2.f32 %v6024_v53 }
0x24d3   :  { %v7221_v50 = vpop.eup %7220 }
0x24d4   :  { %3808 = vrot.lane.b32.xlu1 %v7221_v50, %s7370_s21 }
0x24d5   :  { %v7223_v51 = vpop.eup %7222 }
0x24d6   :  { %3903 = vrot.lane.b32.xlu0 %v7223_v51, %s7370_s21  ;;  %v7225_v54 = vpop.eup %7224 }
0x24d7   :  { %v7227_v55 = vpop.eup %7226  ;;  %v3802_v56 = vadd.f32 1.0, %v7225_v54 }
0x24d8   :  { %v3897_v40 = vadd.f32 1.0, %v7227_v55 }
0x24d9   :  { %7228 = vrcp.f32 %v3802_v56 }
0x24da   :  { %7230 = vrcp.f32 %v3897_v40 }
0x24e3   :  { %v7229_v57 = vpop.eup %7228 }
0x24e4   :  { %v7231_v60 = vpop.eup %7230  ;;  %v3806_v63 = vmul.f32 %v7229_v57, %v8029_v24 }
0x24e5   :  { %v3901_v2 = vmul.f32 %v7231_v60, %v8033_v27 }
0x2546   :  { %v3809_v58 = vpop.permute.xlu1 %3808 }
0x2547   :  { %v3811_v59 = vmul.f32 %v7229_v57, %v3809_v58 }
0x2548   :  { %v3904_v61 = vpop.permute.xlu0 %3903 }
0x2549   :  { %3813 = vrot.lane.b32.xlu1 %v3811_v59, %s7371_s22  ;;  %v3906_v62 = vmul.f32 %v7231_v60, %v3904_v61 }
0x254b   :  { %3908 = vrot.lane.b32.xlu0 %v3906_v62, %s7371_s22 }
0x25bb   :  { %v3814_v0 = vpop.permute.xlu1 %3813 }
0x25bc   :  { %v8067_v1 = vadd.f32 %v3814_v0, %v3806_v63  ;;  %v4363_v0 = vld [vmem:[#allocation2 + $0x78] sm:$0xff] }
0x25bd   :  { %v3909_v3 = vpop.permute.xlu0 %3908 }
0x25be   :  { %7232 = vtanh.f32 %v8067_v1  ;;  %v8071_v4 = vadd.f32 %v3909_v3, %v3901_v2 }
0x25c0   :  { %7234 = vtanh.f32 %v8071_v4 }
0x25c8   :  { %v7233_v10 = vpop.eup %7232 }
0x25c9   :  { %3819 = vrot.lane.b32.xlu1 %v7233_v10, %s7372_s27 }
0x25ca   :  { %v7235_v11 = vpop.eup %7234 }
0x25cb   :  { %3914 = vrot.lane.b32.xlu0 %v7235_v11, %s7372_s27 }
0x263b   :  { %v3820_v12 = vpop.permute.xlu1 %3819 }
0x263c   :  { %v3822_v13 = vmul.f32 %v7229_v57, %v3820_v12 }
0x263d   :  { %v3915_v33 = vpop.permute.xlu0 %3914 }
0x263e   :  { %3994 = vrot.lane.b32.xlu1 %v3822_v13, %s7373_s28  ;;  %v3917_v14 = vmul.f32 %v7231_v60, %v3915_v33 }
0x2640   :  { %3919 = vrot.lane.b32.xlu0 %v3917_v14, %s7373_s28 }
0x26b0   :  { %v3995_v15 = vpop.permute.xlu1 %3994 }
0x26b1   :  { %6615 = vmatmul.mubr.msk.f32.vlgmr.msra.gmra.mrb[50].mxu1 %vm301_vm7, %v3995_v15 }
0x26b2   :  { %6932 = vmatpush3.bf16.msk.msra.mxu1 %vm7410_vm4, %v7445_v30  ;;  %6628 = vmatprep.mubr.msk.f32.mxu1 %vm7368_vm5, %v7369_v8  ;;  %v3920_v37 = vpop.permute.xlu0 %3919 }
0x26b3   :  { %6937 = vmatprep.subr.bf16.mxu1 %v7366_v5  ;;  %6608 = vmatmul.mubr.msk.f32.vlgmr.msra.gmra.mrb[50].mxu0 %vm301_vm7, %v3920_v37 }
0x26b4   :  { %6928 = vmatpush3.bf16.msk.msra.mxu0 %vm7410_vm4, %v7408_v6  ;;  %6621 = vmatprep.mubr.msk.f32.mxu0 %vm7368_vm5, %v7369_v8 }
0x26b5   :  { %6933 = vmatprep.subr.bf16.mxu0 %v7366_v5 }
0x26b7   :  { %6622 = vmatmul.mubr.msk.f32.vlgmr.msra.gmra.mrb[52].mxu0 %vm301_vm7, %v3920_v37 }
0x26b8   :  { %6936 = vmatpush3.bf16.msk.msra.mxu0 %vm7410_vm4, %v7463_v36  ;;  %6635 = vmatprep.mubr.msk.f32.mxu0 %vm7368_vm5, %v7369_v8 }
0x26b9   :  { %6941 = vmatprep.subr.bf16.mxu0 %v7366_v5 }
0x2784   :  { %v4064_v16 = vpop.f32.mrb[50].mxu1 }
0x2785   :  { %v6616_v17 = vpop.f32.mrb[51].mxu1 }
0x2786   :  { %v3989_v18 = vpop.f32.mrb[50].mxu0 }
0x2787   :  { %v4065_v19 = vadd.f32 %v4064_v16, %v3989_v18  ;;  %v6609_v20 = vpop.f32.mrb[51].mxu0 }
0x2789   :  { %v4068_v22 = vadd.f32 %v7869_v21, %v4065_v19 }
0x278a   :  { %v4160_v24 = vpop.f32.mrb[52].mxu0 }
0x278b   :  { %7236 = vtanh.f32 %v4068_v22  ;;  %v4161_v25 = vadd.f32 %v4160_v24, %v4093_v23  ;;  %v6623_v26 = vpop.f32.mrb[53].mxu0  ;;  %v6029_v29 = vmul.f32 -1.442695, %v4068_v22 }
0x278d   :  { %7238 = vtanh.f32 %v4161_v25  ;;  %v6032_v31 = vmul.f32 -1.442695, %v4161_v25 }
0x278e   :  { %7240 = vpow2.f32 %v6029_v29 }
0x278f   :  { %7242 = vpow2.f32 %v6032_v31 }
0x2795   :  { %v7237_v27 = vpop.eup %7236 }
0x2796   :  { %4078 = vrot.lane.b32.xlu1 %v7237_v27, %s7370_s21 }
0x2797   :  { %v7239_v28 = vpop.eup %7238 }
0x2798   :  { %4173 = vrot.lane.b32.xlu0 %v7239_v28, %s7370_s21  ;;  %v7241_v32 = vpop.eup %7240 }
0x2799   :  { %v7243_v34 = vpop.eup %7242  ;;  %v4072_v35 = vadd.f32 1.0, %v7241_v32 }
0x279a   :  { %v4167_v38 = vadd.f32 1.0, %v7243_v34 }
0x279b   :  { %7244 = vrcp.f32 %v4072_v35 }
0x279c   :  { %7246 = vrcp.f32 %v4167_v38 }
0x27a5   :  { %v7245_v39 = vpop.eup %7244 }
0x27a6   :  { %v7247_v42 = vpop.eup %7246  ;;  %v4076_v45 = vmul.f32 %v7245_v39, %v8067_v1 }
0x27a7   :  { %v4171_v48 = vmul.f32 %v7247_v42, %v8071_v4 }
0x2808   :  { %v4079_v9 = vpop.permute.xlu1 %4078 }
0x2809   :  { %v4081_v41 = vmul.f32 %v7245_v39, %v4079_v9 }
0x280a   :  { %v4174_v43 = vpop.permute.xlu0 %4173 }
0x280b   :  { %4083 = vrot.lane.b32.xlu1 %v4081_v41, %s7371_s22  ;;  %v4176_v44 = vmul.f32 %v7247_v42, %v4174_v43 }
0x280d   :  { %4178 = vrot.lane.b32.xlu0 %v4176_v44, %s7371_s22  ;;  %v8178_v44 = vld [vmem:[%s8347_s1 + $0x49] ss:$0 sm:$0xff] }
0x287d   :  { %v4084_v46 = vpop.permute.xlu1 %4083 }
0x287e   :  { %v8105_v47 = vadd.f32 %v4084_v46, %v4076_v45  ;;  %v4633_v46 = vld [vmem:[#allocation2 + $0x80] sm:$0xff] }
0x287f   :  { %v4179_v49 = vpop.permute.xlu0 %4178 }
0x2880   :  { %7248 = vtanh.f32 %v8105_v47  ;;  %v8109_v50 = vadd.f32 %v4179_v49, %v4171_v48 }
0x2882   :  { %7250 = vtanh.f32 %v8109_v50 }
0x288a   :  { %v7249_v51 = vpop.eup %7248 }
0x288b   :  { %4089 = vrot.lane.b32.xlu1 %v7249_v51, %s7372_s27 }
0x288c   :  { %v7251_v52 = vpop.eup %7250 }
0x288d   :  { %4184 = vrot.lane.b32.xlu0 %v7251_v52, %s7372_s27 }
0x28fd   :  { %v4090_v53 = vpop.permute.xlu1 %4089 }
0x28fe   :  { %v4092_v54 = vmul.f32 %v7245_v39, %v4090_v53 }
0x28ff   :  { %v4185_v55 = vpop.permute.xlu0 %4184 }
0x2900   :  { %4264 = vrot.lane.b32.xlu1 %v4092_v54, %s7373_s28  ;;  %v4187_v56 = vmul.f32 %v7247_v42, %v4185_v55 }
0x2902   :  { %4189 = vrot.lane.b32.xlu0 %v4187_v56, %s7373_s28 }
0x2972   :  { %v4265_v40 = vpop.permute.xlu1 %4264 }
0x2973   :  { %6636 = vmatmul.mubr.msk.f32.vlgmr.msra.gmra.mrb[54].mxu0 %vm301_vm7, %v4265_v40 }
0x2974   :  { %6944 = vmatpush3.bf16.msk.msra.mxu0 %vm7410_vm4, %v7445_v30  ;;  %6649 = vmatprep.mubr.msk.f32.mxu0 %vm7368_vm5, %v7369_v8  ;;  %v4190_v57 = vpop.permute.xlu0 %4189 }
0x2975   :  { %6949 = vmatprep.subr.bf16.mxu0 %v7366_v5  ;;  %6629 = vmatmul.mubr.msk.f32.vlgmr.msra.gmra.mrb[52].mxu1 %vm301_vm7, %v4190_v57 }
0x2976   :  { %6940 = vmatpush3.bf16.msk.msra.mxu1 %vm7410_vm4, %v7408_v6  ;;  %6642 = vmatprep.mubr.msk.f32.mxu1 %vm7368_vm5, %v7369_v8 }
0x2977   :  { %6945 = vmatprep.subr.bf16.mxu1 %v7366_v5 }
0x2979   :  { %6643 = vmatmul.mubr.msk.f32.vlgmr.msra.gmra.mrb[54].mxu1 %vm301_vm7, %v4190_v57 }
0x297a   :  { %6948 = vmatpush3.bf16.msk.msra.mxu1 %vm7410_vm4, %v7463_v36  ;;  %6656 = vmatprep.mubr.msk.f32.mxu1 %vm7368_vm5, %v7369_v8 }
0x297b   :  { %6953 = vmatprep.subr.bf16.mxu1 %v7366_v5 }
0x2a46   :  { %v4334_v58 = vpop.f32.mrb[54].mxu0 }
0x2a47   :  { %v6637_v59 = vpop.f32.mrb[55].mxu0 }
0x2a48   :  { %v4259_v60 = vpop.f32.mrb[52].mxu1 }
0x2a49   :  { %v4335_v61 = vadd.f32 %v4334_v58, %v4259_v60  ;;  %v6630_v62 = vpop.f32.mrb[53].mxu1 }
0x2a4b   :  { %v4338_v63 = vadd.f32 %v7869_v21, %v4335_v61 }
0x2a4c   :  { %v4430_v1 = vpop.f32.mrb[54].mxu1 }
0x2a4d   :  { %7252 = vtanh.f32 %v4338_v63  ;;  %v4431_v2 = vadd.f32 %v4430_v1, %v4363_v0  ;;  %v6644_v3 = vpop.f32.mrb[55].mxu1  ;;  %v6037_v11 = vmul.f32 -1.442695, %v4338_v63 }
0x2a4f   :  { %7254 = vtanh.f32 %v4431_v2  ;;  %v6040_v12 = vmul.f32 -1.442695, %v4431_v2 }
0x2a50   :  { %7256 = vpow2.f32 %v6037_v11 }
0x2a51   :  { %7258 = vpow2.f32 %v6040_v12 }
0x2a57   :  { %v7253_v4 = vpop.eup %7252 }
0x2a58   :  { %4348 = vrot.lane.b32.xlu1 %v7253_v4, %s7370_s21 }
0x2a59   :  { %v7255_v10 = vpop.eup %7254 }
0x2a5a   :  { %4443 = vrot.lane.b32.xlu0 %v7255_v10, %s7370_s21  ;;  %v7257_v13 = vpop.eup %7256 }
0x2a5b   :  { %v7259_v33 = vpop.eup %7258  ;;  %v4342_v14 = vadd.f32 1.0, %v7257_v13 }
0x2a5c   :  { %v4437_v21 = vadd.f32 1.0, %v7259_v33 }
0x2a5d   :  { %7260 = vrcp.f32 %v4342_v14 }
0x2a5e   :  { %7262 = vrcp.f32 %v4437_v21 }
0x2a67   :  { %v7261_v15 = vpop.eup %7260 }
0x2a68   :  { %v7263_v17 = vpop.eup %7262  ;;  %v4346_v20 = vmul.f32 %v7261_v15, %v8105_v47 }
0x2a69   :  { %v4441_v24 = vmul.f32 %v7263_v17, %v8109_v50 }
0x2aca   :  { %v4349_v37 = vpop.permute.xlu1 %4348 }
0x2acb   :  { %v4351_v16 = vmul.f32 %v7261_v15, %v4349_v37 }
0x2acc   :  { %v4444_v18 = vpop.permute.xlu0 %4443 }
0x2acd   :  { %4353 = vrot.lane.b32.xlu1 %v4351_v16, %s7371_s22  ;;  %v4446_v19 = vmul.f32 %v7263_v17, %v4444_v18 }
0x2acf   :  { %4448 = vrot.lane.b32.xlu0 %v4446_v19, %s7371_s22 }
0x2b3f   :  { %v4354_v22 = vpop.permute.xlu1 %4353 }
0x2b40   :  { %v8143_v23 = vadd.f32 %v4354_v22, %v4346_v20  ;;  %v4903_v22 = vld [vmem:[#allocation2 + $0x88] sm:$0xff] }
0x2b41   :  { %v4449_v25 = vpop.permute.xlu0 %4448 }
0x2b42   :  { %7264 = vtanh.f32 %v8143_v23  ;;  %v8147_v26 = vadd.f32 %v4449_v25, %v4441_v24 }
0x2b44   :  { %7266 = vtanh.f32 %v8147_v26 }
0x2b4c   :  { %v7265_v27 = vpop.eup %7264 }
0x2b4d   :  { %4359 = vrot.lane.b32.xlu1 %v7265_v27, %s7372_s27 }
0x2b4e   :  { %v7267_v28 = vpop.eup %7266 }
0x2b4f   :  { %4454 = vrot.lane.b32.xlu0 %v7267_v28, %s7372_s27 }
0x2bbf   :  { %v4360_v29 = vpop.permute.xlu1 %4359 }
0x2bc0   :  { %v4362_v31 = vmul.f32 %v7261_v15, %v4360_v29 }
0x2bc1   :  { %v4455_v32 = vpop.permute.xlu0 %4454 }
0x2bc2   :  { %4534 = vrot.lane.b32.xlu1 %v4362_v31, %s7373_s28  ;;  %v4457_v34 = vmul.f32 %v7263_v17, %v4455_v32 }
0x2bc4   :  { %4459 = vrot.lane.b32.xlu0 %v4457_v34, %s7373_s28 }
0x2c34   :  { %v4535_v35 = vpop.permute.xlu1 %4534 }
0x2c35   :  { %6657 = vmatmul.mubr.msk.f32.vlgmr.msra.gmra.mrb[56].mxu1 %vm301_vm7, %v4535_v35 }
0x2c36   :  { %6956 = vmatpush3.bf16.msk.msra.mxu1 %vm7410_vm4, %v7445_v30  ;;  %6670 = vmatprep.mubr.msk.f32.mxu1 %vm7368_vm5, %v7369_v8  ;;  %v4460_v38 = vpop.permute.xlu0 %4459 }
0x2c37   :  { %6961 = vmatprep.subr.bf16.mxu1 %v7366_v5  ;;  %6650 = vmatmul.mubr.msk.f32.vlgmr.msra.gmra.mrb[56].mxu0 %vm301_vm7, %v4460_v38 }
0x2c38   :  { %6952 = vmatpush3.bf16.msk.msra.mxu0 %vm7410_vm4, %v7408_v6  ;;  %6663 = vmatprep.mubr.msk.f32.mxu0 %vm7368_vm5, %v7369_v8 }
0x2c39   :  { %6957 = vmatprep.subr.bf16.mxu0 %v7366_v5 }
0x2c3b   :  { %6664 = vmatmul.mubr.msk.f32.vlgmr.msra.gmra.mrb[58].mxu0 %vm301_vm7, %v4460_v38 }
0x2c3c   :  { %6960 = vmatpush3.bf16.msk.msra.mxu0 %vm7410_vm4, %v7463_v36  ;;  %6677 = vmatprep.mubr.msk.f32.mxu0 %vm7368_vm5, %v7369_v8 }
0x2c3d   :  { %6965 = vmatprep.subr.bf16.mxu0 %v7366_v5 }
0x2d08   :  { %v4604_v39 = vpop.f32.mrb[56].mxu1 }
0x2d09   :  { %v6658_v9 = vpop.f32.mrb[57].mxu1 }
0x2d0a   :  { %v4529_v41 = vpop.f32.mrb[56].mxu0 }
0x2d0b   :  { %v4605_v42 = vadd.f32 %v4604_v39, %v4529_v41  ;;  %v6651_v43 = vpop.f32.mrb[57].mxu0 }
0x2d0d   :  { %v4608_v45 = vadd.f32 %v8178_v44, %v4605_v42 }
0x2d0e   :  { %v4700_v47 = vpop.f32.mrb[58].mxu0 }
0x2d0f   :  { %7268 = vtanh.f32 %v4608_v45  ;;  %v4701_v48 = vadd.f32 %v4700_v47, %v4633_v46  ;;  %v6665_v49 = vpop.f32.mrb[59].mxu0  ;;  %v6045_v52 = vmul.f32 -1.442695, %v4608_v45 }
0x2d11   :  { %7270 = vtanh.f32 %v4701_v48  ;;  %v6048_v53 = vmul.f32 -1.442695, %v4701_v48 }
0x2d12   :  { %7272 = vpow2.f32 %v6045_v52 }
0x2d13   :  { %7274 = vpow2.f32 %v6048_v53 }
0x2d19   :  { %v7269_v50 = vpop.eup %7268 }
0x2d1a   :  { %4618 = vrot.lane.b32.xlu1 %v7269_v50, %s7370_s21 }
0x2d1b   :  { %v7271_v51 = vpop.eup %7270 }
0x2d1c   :  { %4713 = vrot.lane.b32.xlu0 %v7271_v51, %s7370_s21  ;;  %v7273_v54 = vpop.eup %7272 }
0x2d1d   :  { %v7275_v55 = vpop.eup %7274  ;;  %v4612_v56 = vadd.f32 1.0, %v7273_v54 }
0x2d1e   :  { %v4707_v40 = vadd.f32 1.0, %v7275_v55 }
0x2d1f   :  { %7276 = vrcp.f32 %v4612_v56 }
0x2d20   :  { %7278 = vrcp.f32 %v4707_v40 }
0x2d29   :  { %v7277_v57 = vpop.eup %7276 }
0x2d2a   :  { %v7279_v60 = vpop.eup %7278  ;;  %v4616_v63 = vmul.f32 %v7277_v57, %v8143_v23 }
0x2d2b   :  { %v4711_v2 = vmul.f32 %v7279_v60, %v8147_v26 }
0x2d8c   :  { %v4619_v58 = vpop.permute.xlu1 %4618 }
0x2d8d   :  { %v4621_v59 = vmul.f32 %v7277_v57, %v4619_v58 }
0x2d8e   :  { %v4714_v61 = vpop.permute.xlu0 %4713 }
0x2d8f   :  { %4623 = vrot.lane.b32.xlu1 %v4621_v59, %s7371_s22  ;;  %v4716_v62 = vmul.f32 %v7279_v60, %v4714_v61 }
0x2d91   :  { %4718 = vrot.lane.b32.xlu0 %v4716_v62, %s7371_s22 }
0x2e01   :  { %v4624_v0 = vpop.permute.xlu1 %4623 }
0x2e02   :  { %v8186_v1 = vadd.f32 %v4624_v0, %v4616_v63  ;;  %v5173_v0 = vld [vmem:[#allocation2 + $0x90] sm:$0xff] }
0x2e03   :  { %v4719_v3 = vpop.permute.xlu0 %4718 }
0x2e04   :  { %7280 = vtanh.f32 %v8186_v1  ;;  %v8190_v4 = vadd.f32 %v4719_v3, %v4711_v2 }
0x2e06   :  { %7282 = vtanh.f32 %v8190_v4 }
0x2e0e   :  { %v7281_v10 = vpop.eup %7280 }
0x2e0f   :  { %4629 = vrot.lane.b32.xlu1 %v7281_v10, %s7372_s27 }
0x2e10   :  { %v7283_v11 = vpop.eup %7282 }
0x2e11   :  { %4724 = vrot.lane.b32.xlu0 %v7283_v11, %s7372_s27 }
0x2e81   :  { %v4630_v12 = vpop.permute.xlu1 %4629 }
0x2e82   :  { %v4632_v13 = vmul.f32 %v7277_v57, %v4630_v12 }
0x2e83   :  { %v4725_v33 = vpop.permute.xlu0 %4724 }
0x2e84   :  { %4804 = vrot.lane.b32.xlu1 %v4632_v13, %s7373_s28  ;;  %v4727_v14 = vmul.f32 %v7279_v60, %v4725_v33 }
0x2e86   :  { %4729 = vrot.lane.b32.xlu0 %v4727_v14, %s7373_s28 }
0x2ef6   :  { %v4805_v21 = vpop.permute.xlu1 %4804 }
0x2ef7   :  { %6678 = vmatmul.mubr.msk.f32.vlgmr.msra.gmra.mrb[60].mxu0 %vm301_vm7, %v4805_v21 }
0x2ef8   :  { %6968 = vmatpush3.bf16.msk.msra.mxu0 %vm7410_vm4, %v7445_v30  ;;  %6691 = vmatprep.mubr.msk.f32.mxu0 %vm7368_vm5, %v7369_v8  ;;  %v4730_v15 = vpop.permute.xlu0 %4729 }
0x2ef9   :  { %6973 = vmatprep.subr.bf16.mxu0 %v7366_v5  ;;  %6671 = vmatmul.mubr.msk.f32.vlgmr.msra.gmra.mrb[58].mxu1 %vm301_vm7, %v4730_v15 }
0x2efa   :  { %6964 = vmatpush3.bf16.msk.msra.mxu1 %vm7410_vm4, %v7408_v6  ;;  %6684 = vmatprep.mubr.msk.f32.mxu1 %vm7368_vm5, %v7369_v8 }
0x2efb   :  { %6969 = vmatprep.subr.bf16.mxu1 %v7366_v5 }
0x2efd   :  { %6685 = vmatmul.mubr.msk.f32.vlgmr.msra.gmra.mrb[60].mxu1 %vm301_vm7, %v4730_v15 }
0x2efe   :  { %6972 = vmatpush3.bf16.msk.msra.mxu1 %vm7410_vm4, %v7463_v36  ;;  %6698 = vmatprep.mubr.msk.f32.mxu1 %vm7368_vm5, %v7369_v8 }
0x2eff   :  { %6977 = vmatprep.subr.bf16.mxu1 %v7366_v5 }
0x2fca   :  { %v4874_v37 = vpop.f32.mrb[60].mxu0 }
0x2fcb   :  { %v6679_v16 = vpop.f32.mrb[61].mxu0 }
0x2fcc   :  { %v4799_v17 = vpop.f32.mrb[58].mxu1 }
0x2fcd   :  { %v4875_v18 = vadd.f32 %v4874_v37, %v4799_v17  ;;  %v6672_v19 = vpop.f32.mrb[59].mxu1 }
0x2fcf   :  { %v4878_v20 = vadd.f32 %v8178_v44, %v4875_v18 }
0x2fd0   :  { %v4970_v23 = vpop.f32.mrb[60].mxu1 }
0x2fd1   :  { %7284 = vtanh.f32 %v4878_v20  ;;  %v4971_v24 = vadd.f32 %v4970_v23, %v4903_v22  ;;  %v6686_v25 = vpop.f32.mrb[61].mxu1  ;;  %v6053_v28 = vmul.f32 -1.442695, %v4878_v20 }
0x2fd3   :  { %7286 = vtanh.f32 %v4971_v24  ;;  %v6056_v29 = vmul.f32 -1.442695, %v4971_v24 }
0x2fd4   :  { %7288 = vpow2.f32 %v6053_v28 }
0x2fd5   :  { %7290 = vpow2.f32 %v6056_v29 }
0x2fdb   :  { %v7285_v26 = vpop.eup %7284 }
0x2fdc   :  { %4888 = vrot.lane.b32.xlu1 %v7285_v26, %s7370_s21 }
0x2fdd   :  { %v7287_v27 = vpop.eup %7286 }
0x2fde   :  { %4983 = vrot.lane.b32.xlu0 %v7287_v27, %s7370_s21  ;;  %v7289_v31 = vpop.eup %7288 }
0x2fdf   :  { %v7291_v32 = vpop.eup %7290  ;;  %v4882_v34 = vadd.f32 1.0, %v7289_v31 }
0x2fe0   :  { %v4977_v35 = vadd.f32 1.0, %v7291_v32 }
0x2fe1   :  { %7292 = vrcp.f32 %v4882_v34 }
0x2fe2   :  { %7294 = vrcp.f32 %v4977_v35 }
0x2feb   :  { %v7293_v38 = vpop.eup %7292 }
0x2fec   :  { %v7295_v41 = vpop.eup %7294  ;;  %v4886_v45 = vmul.f32 %v7293_v38, %v8186_v1 }
0x2fed   :  { %v4981_v48 = vmul.f32 %v7295_v41, %v8190_v4 }
0x304e   :  { %v4889_v39 = vpop.permute.xlu1 %4888 }
0x304f   :  { %v4891_v9 = vmul.f32 %v7293_v38, %v4889_v39 }
0x3050   :  { %v4984_v42 = vpop.permute.xlu0 %4983 }
0x3051   :  { %4893 = vrot.lane.b32.xlu1 %v4891_v9, %s7371_s22  ;;  %v4986_v43 = vmul.f32 %v7295_v41, %v4984_v42 }
0x3053   :  { %4988 = vrot.lane.b32.xlu0 %v4986_v43, %s7371_s22  ;;  %v5443_v43 = vld [vmem:[#allocation2 + $0x98] sm:$0xff] }
0x30c3   :  { %v4894_v46 = vpop.permute.xlu1 %4893 }
0x30c4   :  { %v8224_v47 = vadd.f32 %v4894_v46, %v4886_v45 }
0x30c5   :  { %v4989_v49 = vpop.permute.xlu0 %4988 }
0x30c6   :  { %7296 = vtanh.f32 %v8224_v47  ;;  %v8228_v50 = vadd.f32 %v4989_v49, %v4981_v48 }
0x30c8   :  { %7298 = vtanh.f32 %v8228_v50 }
0x30d0   :  { %v7297_v51 = vpop.eup %7296 }
0x30d1   :  { %4899 = vrot.lane.b32.xlu1 %v7297_v51, %s7372_s27 }
0x30d2   :  { %v7299_v52 = vpop.eup %7298 }
0x30d3   :  { %4994 = vrot.lane.b32.xlu0 %v7299_v52, %s7372_s27 }
0x3143   :  { %v4900_v53 = vpop.permute.xlu1 %4899 }
0x3144   :  { %v4902_v54 = vmul.f32 %v7293_v38, %v4900_v53 }
0x3145   :  { %v4995_v55 = vpop.permute.xlu0 %4994 }
0x3146   :  { %5074 = vrot.lane.b32.xlu1 %v4902_v54, %s7373_s28  ;;  %v4997_v56 = vmul.f32 %v7295_v41, %v4995_v55 }
0x3148   :  { %4999 = vrot.lane.b32.xlu0 %v4997_v56, %s7373_s28 }
0x31b8   :  { %v5075_v40 = vpop.permute.xlu1 %5074 }
0x31b9   :  { %6699 = vmatmul.mubr.msk.f32.vlgmr.msra.gmra.mrb[62].mxu1 %vm301_vm7, %v5075_v40 }
0x31ba   :  { %6980 = vmatpush3.bf16.msk.msra.mxu1 %vm7410_vm4, %v7445_v30  ;;  %6712 = vmatprep.mubr.msk.f32.mxu1 %vm7368_vm5, %v7369_v8  ;;  %v5000_v57 = vpop.permute.xlu0 %4999 }
0x31bb   :  { %6985 = vmatprep.subr.bf16.mxu1 %v7366_v5  ;;  %6692 = vmatmul.mubr.msk.f32.vlgmr.msra.gmra.mrb[62].mxu0 %vm301_vm7, %v5000_v57 }
0x31bc   :  { %6976 = vmatpush3.bf16.msk.msra.mxu0 %vm7410_vm4, %v7408_v6  ;;  %6705 = vmatprep.mubr.msk.f32.mxu0 %vm7368_vm5, %v7369_v8 }
0x31bd   :  { %6981 = vmatprep.subr.bf16.mxu0 %v7366_v5 }
0x31bf   :  { %6706 = vmatmul.mubr.msk.f32.vlgmr.msra.gmra.mrb[64].mxu0 %vm301_vm7, %v5000_v57 }
0x31c0   :  { %6984 = vmatpush3.bf16.msk.msra.mxu0 %vm7410_vm4, %v7463_v36  ;;  %6719 = vmatprep.mubr.msk.f32.mxu0 %vm7368_vm5, %v7369_v8 }
0x31c1   :  { %6989 = vmatprep.subr.bf16.mxu0 %v7366_v5 }
0x328c   :  { %v5144_v58 = vpop.f32.mrb[62].mxu1 }
0x328d   :  { %v6700_v59 = vpop.f32.mrb[63].mxu1 }
0x328e   :  { %v5069_v60 = vpop.f32.mrb[62].mxu0 }
0x328f   :  { %v5145_v61 = vadd.f32 %v5144_v58, %v5069_v60  ;;  %v6693_v62 = vpop.f32.mrb[63].mxu0 }
0x3291   :  { %v5148_v63 = vadd.f32 %v8178_v44, %v5145_v61 }
0x3292   :  { %v5240_v1 = vpop.f32.mrb[64].mxu0 }
0x3293   :  { %7300 = vtanh.f32 %v5148_v63  ;;  %v5241_v2 = vadd.f32 %v5240_v1, %v5173_v0  ;;  %v6707_v3 = vpop.f32.mrb[65].mxu0  ;;  %v6061_v11 = vmul.f32 -1.442695, %v5148_v63 }
0x3295   :  { %7302 = vtanh.f32 %v5241_v2  ;;  %v6064_v12 = vmul.f32 -1.442695, %v5241_v2 }
0x3296   :  { %7304 = vpow2.f32 %v6061_v11 }
0x3297   :  { %7306 = vpow2.f32 %v6064_v12 }
0x329d   :  { %v7301_v4 = vpop.eup %7300 }
0x329e   :  { %5158 = vrot.lane.b32.xlu1 %v7301_v4, %s7370_s21 }
0x329f   :  { %v7303_v10 = vpop.eup %7302 }
0x32a0   :  { %5253 = vrot.lane.b32.xlu0 %v7303_v10, %s7370_s21  ;;  %v7305_v13 = vpop.eup %7304 }
0x32a1   :  { %v7307_v33 = vpop.eup %7306  ;;  %v5152_v14 = vadd.f32 1.0, %v7305_v13 }
0x32a2   :  { %v5247_v21 = vadd.f32 1.0, %v7307_v33 }
0x32a3   :  { %7308 = vrcp.f32 %v5152_v14 }
0x32a4   :  { %7310 = vrcp.f32 %v5247_v21 }
0x32ad   :  { %v7309_v15 = vpop.eup %7308 }
0x32ae   :  { %v7311_v17 = vpop.eup %7310  ;;  %v5156_v20 = vmul.f32 %v7309_v15, %v8224_v47 }
0x32af   :  { %v5251_v24 = vmul.f32 %v7311_v17, %v8228_v50 }
0x3310   :  { %v5159_v37 = vpop.permute.xlu1 %5158 }
0x3311   :  { %v5161_v16 = vmul.f32 %v7309_v15, %v5159_v37 }
0x3312   :  { %v5254_v18 = vpop.permute.xlu0 %5253 }
0x3313   :  { %5163 = vrot.lane.b32.xlu1 %v5161_v16, %s7371_s22  ;;  %v5256_v19 = vmul.f32 %v7311_v17, %v5254_v18 }
0x3315   :  { %5258 = vrot.lane.b32.xlu0 %v5256_v19, %s7371_s22 }
0x3385   :  { %v5164_v22 = vpop.permute.xlu1 %5163 }
0x3386   :  { %v8262_v23 = vadd.f32 %v5164_v22, %v5156_v20 }
0x3387   :  { %v5259_v25 = vpop.permute.xlu0 %5258 }
0x3388   :  { %7312 = vtanh.f32 %v8262_v23  ;;  %v8266_v26 = vadd.f32 %v5259_v25, %v5251_v24 }
0x338a   :  { %7314 = vtanh.f32 %v8266_v26 }
0x3392   :  { %v7313_v27 = vpop.eup %7312 }
0x3393   :  { %5169 = vrot.lane.b32.xlu1 %v7313_v27, %s7372_s27  ;;  %v22_v27 = vld [vmem:[%s8347_s1 + $0x38] sm:$0x3] }
0x3394   :  { %v7315_v28 = vpop.eup %7314 }
0x3395   :  { %5264 = vrot.lane.b32.xlu0 %v7315_v28, %s7372_s27 }
0x3405   :  { %v5170_v29 = vpop.permute.xlu1 %5169 }
0x3406   :  { %v5172_v31 = vmul.f32 %v7309_v15, %v5170_v29 }
0x3407   :  { %v5265_v32 = vpop.permute.xlu0 %5264 }
0x3408   :  { %5344 = vrot.lane.b32.xlu1 %v5172_v31, %s7373_s28  ;;  %v5267_v34 = vmul.f32 %v7311_v17, %v5265_v32 }
0x340a   :  { %5269 = vrot.lane.b32.xlu0 %v5267_v34, %s7373_s28 }
0x347a   :  { %v5345_v35 = vpop.permute.xlu1 %5344 }
0x347b   :  { %6720 = vmatmul.mubr.msk.f32.vlgmr.msra.gmra.mrb[66].mxu0 %vm301_vm7, %v5345_v35 }
0x347c   :  { %6992 = vmatpush3.bf16.msk.msra.mxu0 %vm7410_vm4, %v7445_v30  ;;  %6733 = vmatprep.mubr.msk.f32.mxu0 %vm7368_vm5, %v7369_v8  ;;  %v5270_v38 = vpop.permute.xlu0 %5269 }
0x347d   :  { %6997 = vmatprep.subr.bf16.mxu0 %v7366_v5  ;;  %6713 = vmatmul.mubr.msk.f32.vlgmr.msra.gmra.mrb[64].mxu1 %vm301_vm7, %v5270_v38 }
0x347e   :  { %6988 = vmatpush3.bf16.msk.msra.mxu1 %vm7410_vm4, %v7408_v6  ;;  %6726 = vmatprep.mubr.msk.f32.mxu1 %vm7368_vm5, %v7369_v8 }
0x347f   :  { %6993 = vmatprep.subr.bf16.mxu1 %v7366_v5 }
0x3481   :  { %6727 = vmatmul.mubr.msk.f32.vlgmr.msra.gmra.mrb[66].mxu1 %vm301_vm7, %v5270_v38 }
0x3482   :  { %6996 = vmatpush3.bf16.msk.msra.mxu1 %vm7410_vm4, %v7463_v36  ;;  %6740 = vmatprep.mubr.msk.f32.mxu1 %vm7368_vm5, %v7369_v8 }
0x3483   :  { %7001 = vmatprep.subr.bf16.mxu1 %v7366_v5 }
0x354e   :  { %v5414_v30 = vpop.f32.mrb[66].mxu0 }
0x354f   :  { %v6721_v39 = vpop.f32.mrb[67].mxu0 }
0x3550   :  { %v5339_v9 = vpop.f32.mrb[64].mxu1 }
0x3551   :  { %v5415_v6 = vadd.f32 %v5414_v30, %v5339_v9  ;;  %v6714_v41 = vpop.f32.mrb[65].mxu1 }
0x3553   :  { %v5418_v42 = vadd.f32 %v8178_v44, %v5415_v6  ;;  %v6078_v6 = vld [vmem:[%s8347_s1 + $0x4a] ss:$0 sm:$0xff] }
0x3554   :  { %v5510_v45 = vpop.f32.mrb[66].mxu1 }
0x3555   :  { %7316 = vtanh.f32 %v5418_v42  ;;  %v5511_v46 = vadd.f32 %v5510_v45, %v5443_v43  ;;  %v6728_v47 = vpop.f32.mrb[67].mxu1  ;;  %v6069_v5 = vmul.f32 -1.442695, %v5418_v42 }
0x3557   :  { %7318 = vtanh.f32 %v5511_v46  ;;  %v6072_v49 = vmul.f32 -1.442695, %v5511_v46  ;;  %v6081_v46 = vld [vmem:[%s8347_s1 + $0x4b] ss:$0 sm:$0xff] }
0x3558   :  { %7320 = vpow2.f32 %v6069_v5 }
0x3559   :  { %7322 = vpow2.f32 %v6072_v49 }
0x355f   :  { %v7317_v48 = vpop.eup %7316 }
0x3560   :  { %5428 = vrot.lane.b32.xlu0 %v7317_v48, %s7370_s21 }
0x3561   :  { %v7319_v36 = vpop.eup %7318 }
0x3562   :  { %5523 = vrot.lane.b32.xlu1 %v7319_v36, %s7370_s21  ;;  %v7321_v50 = vpop.eup %7320 }
0x3563   :  { %v7323_v51 = vpop.eup %7322  ;;  %v5422_v52 = vadd.f32 1.0, %v7321_v50 }
0x3564   :  { %v5517_v53 = vadd.f32 1.0, %v7323_v51 }
0x3565   :  { %7324 = vrcp.f32 %v5422_v52 }
0x3566   :  { %7326 = vrcp.f32 %v5517_v53 }
0x356f   :  { %v7325_v54 = vpop.eup %7324 }
0x3570   :  { %v7327_v40 = vpop.eup %7326  ;;  %v5426_v59 = vmul.f32 %v7325_v54, %v8262_v23 }
0x3571   :  { %v5521_v62 = vmul.f32 %v7327_v40, %v8266_v26 }
0x35d2   :  { %v5429_v55 = vpop.permute.xlu0 %5428 }
0x35d3   :  { %v5431_v56 = vmul.f32 %v7325_v54, %v5429_v55 }
0x35d4   :  { %v5524_v57 = vpop.permute.xlu1 %5523 }
0x35d5   :  { %5433 = vrot.lane.b32.xlu0 %v5431_v56, %s7371_s22  ;;  %v5526_v58 = vmul.f32 %v7327_v40, %v5524_v57 }
0x35d7   :  { %5528 = vrot.lane.b32.xlu1 %v5526_v58, %s7371_s22 }
0x3647   :  { %v5434_v60 = vpop.permute.xlu0 %5433 }
0x3648   :  { %v5436_v61 = vadd.f32 %v5434_v60, %v5426_v59 }
0x3649   :  { %v5529_v63 = vpop.permute.xlu1 %5528 }
0x364a   :  { %7328 = vtanh.f32 %v5436_v61  ;;  %v5531_v0 = vadd.f32 %v5529_v63, %v5521_v62 }
0x364c   :  { %7330 = vtanh.f32 %v5531_v0 }
0x3654   :  { %v7329_v1 = vpop.eup %7328 }
0x3655   :  { %5439 = vrot.lane.b32.xlu0 %v7329_v1, %s7372_s27 }
0x3656   :  { %v7331_v2 = vpop.eup %7330 }
0x3657   :  { %5534 = vrot.lane.b32.xlu1 %v7331_v2, %s7372_s27 }
0x36c7   :  { %v5440_v3 = vpop.permute.xlu0 %5439 }
0x36c8   :  { %v5442_v4 = vmul.f32 %v7325_v54, %v5440_v3 }
0x36c9   :  { %v5535_v10 = vpop.permute.xlu1 %5534 }
0x36ca   :  { %5614 = vrot.lane.b32.xlu1 %v5442_v4, %s7373_s28  ;;  %v5537_v11 = vmul.f32 %v7327_v40, %v5535_v10 }
0x36cc   :  { %5539 = vrot.lane.b32.xlu0 %v5537_v11, %s7373_s28 }
0x373c   :  { %v5615_v12 = vpop.permute.xlu1 %5614 }
0x373d   :  { %6741 = vmatmul.mubr.msk.f32.vlgmr.msra.gmra.mrb[68].mxu1 %vm301_vm7, %v5615_v12 }
0x373e   :  { %6754 = vmatprep.mubr.msk.f32.mxu1 %vm7368_vm5, %v7369_v8  ;;  %v5540_v13 = vpop.permute.xlu0 %5539 }
0x373f   :  { %6734 = vmatmul.mubr.msk.f32.vlgmr.msra.gmra.mrb[68].mxu0 %vm301_vm7, %v5540_v13 }
0x3740   :  { %6747 = vmatprep.mubr.msk.f32.mxu0 %vm7368_vm5, %v7369_v8 }
0x3810   :  { %v5684_v33 = vpop.f32.mrb[68].mxu1 }
0x3811   :  { %v6742_v14 = vpop.f32.mrb[69].mxu1 }
0x3812   :  { %v5609_v21 = vpop.f32.mrb[68].mxu0 }
0x3813   :  { %v5685_v15 = vadd.f32 %v5684_v33, %v5609_v21  ;;  %v6735_v37 = vpop.f32.mrb[69].mxu0 }
0x3815   :  { %v5688_v16 = vadd.f32 %v8178_v44, %v5685_v15  ;;  %v21_v44 = vld [vmem:[%s8347_s1 + $0x30] sm:$0xff] }
0x3816   :  { %v6998_v28 = vpack.c.bf16 %v22_v27, %v21_v44  ;;  %v7015_v31 = vpack.i.bf16 %v22_v27, %v21_v44 }
0x3817   :  { %7332 = vtanh.f32 %v5688_v16  ;;  %v6077_v18 = vmul.f32 -1.442695, %v5688_v16 }
0x3818   :  { %7000 = vmatpush3.bf16.msk.msra.mxu0 %vm7410_vm4, %v6998_v28 }
0x3819   :  { %7334 = vpow2.f32 %v6077_v18 }
0x3821   :  { %v7333_v17 = vpop.eup %7332 }
0x3822   :  { %5698 = vrot.lane.b32.xlu0 %v7333_v17, %s7370_s21 }
0x3823   :  { %v7335_v19 = vpop.eup %7334 }
0x3824   :  { %v5692_v20 = vadd.f32 1.0, %v7335_v19 }
0x3826   :  { %7336 = vrcp.f32 %v5692_v20 }
0x3830   :  { %v7337_v22 = vpop.eup %7336 }
0x3831   :  { %v5696_v8 = vmul.f32 %v7337_v22, %v5436_v61 }
0x3894   :  { %v5699_v23 = vpop.permute.xlu0 %5698 }
0x3895   :  { %v5701_v24 = vmul.f32 %v7337_v22, %v5699_v23 }
0x3897   :  { %5703 = vrot.lane.b32.xlu1 %v5701_v24, %s7371_s22  ;;  %s7374_s22 = smov 112  }
0x3909   :  { %v5704_v25 = vpop.permute.xlu1 %5703 }
0x390a   :  { %v5706_v26 = vadd.f32 %v5704_v25, %v5696_v8 }
0x390c   :  { %7338 = vtanh.f32 %v5706_v26 }
0x3916   :  { %v7339_v29 = vpop.eup %7338 }
0x3917   :  { %5709 = vrot.lane.b32.xlu0 %v7339_v29, %s7372_s27 }
0x391b   :  { %7016 = vrot.lane.b32.xlu0 %v7015_v31, %s7374_s22 }
0x3989   :  { %v5710_v32 = vpop.permute.xlu0 %5709 }
0x398a   :  { %v5712_v34 = vmul.f32 %v7337_v22, %v5710_v32 }
0x398c   :  { %5718 = vrot.lane.b32.xlu1 %v5712_v34, %s7373_s28 }
0x398d   :  { %v7017_v35 = vpop.permute.xlu0 %7016 }
0x398e   :  { %v7019_v38 = vunpack.i.h.bf16 %v7017_v35  ;;  %v7018_v30 = vunpack.i.l.bf16 %v7017_v35 }
0x3990   :  { %v7002_v39 = vpack.c.bf16 %v7019_v38, %v7018_v30 }
0x3992   :  { %7004 = vmatpush3.bf16.msk.msra.mxu1 %vm7410_vm4, %v7002_v39 }
0x39fe   :  { %v5719_v9 = vpop.permute.xlu1 %5718 }
0x39ff   :  { %6748 = vmatmul.mubr.msk.f32.vlgmr.msra.gmra.mrb[70].mxu0 %vm301_vm7, %v5719_v9 }
0x3ad2   :  { %v5791_v41 = vpop.f32.mrb[70].mxu0 }
0x3ad3   :  { %v5792_v42 = vadd.f32 %v6078_v6, %v5791_v41  ;;  %v6749_v43 = vpop.f32.mrb[71].mxu0 }
0x3ad5   :  { %v5795_v45 = vmax.f32 %v5792_v42, 0.0 }
0x3ad7   :  { %6755 = vmatmul.mubr.msk.f32.vlgmr.msra.gmra.mrb[70].mxu1 %vm301_vm7, %v5795_v45 }
0x3baa   :  { %v5877_v7 = vpop.f32.mrb[70].mxu1 }
0x3bab   :  { %v5878_v47 = vadd.f32 %v6081_v46, %v5877_v7  ;;  %v6756_v48 = vpop.f32.mrb[71].mxu1 }
0x3bad   :  { %5882 = vst.msk [vmem:[#allocation3] sm:$0xf] %vm5881_vm8, %v5878_v47 }
0x3bae   :  { %7353 = shalt.err (!%p7350_p4)
}
0x3baf   :  { %s7354_s8 = scalar_lea.hbm %s8348_s2, 64 }
0x3bb0   :  { %p7355_p5 = scmp.ne.s32.totalorder %s8348_s2, %s7354_s8  ;;  %p7358_p6 = scmp.lt.u32.totalorder %s7354_s8, %s8348_s2 }
0x3bb2   :  { %p7360_p7 = pnand %p7358_p6, %p7355_p5 }
0x3bb4   :  { %7363 = shalt.err (!%p7360_p7)
}
0x3bb5   :  { %5892 = dma.vmem_to_hbm [thread:$0]  %s5890_s4, 64, %s8348_s2, [#allocation4]  }
0x3bb6   :  { %7364 = dma.done.wait [#allocation4], 64  }
0x3bb7   :  { %7365 = vsyncadd [#allocation4], 4294967232 }
0x3bb8   :  { %5896 = vsyncpa [#allocation4], 1 }

</bundles_post_ra>
